<compile_context>
chip_gen: v6e
topology: v6e:2x2x1
jax: 0.10.0
libtpu: 0.0.40
codegen_flags: <defaults>
</compile_context>

<pallas_src>
import numpy as np
import jax
import jax.numpy as jnp
from jax.experimental import pallas as pl
from jax.experimental.pallas import tpu as pltpu


def _pool_len(l):
    # MaxPool1d(kernel=5, stride=2), no padding, floor mode.
    return (l - 5) // 2 + 1


# ----------------------- in-kernel building blocks -------------------------

def _write_padded(pad_ref, x, lin):
    """Write x (lin, C) into pad_ref (lin+4, C) with 2 zero rows each side."""
    pad_ref[...] = jnp.zeros_like(pad_ref)
    pad_ref[2:lin + 2, :] = x


def _conv5_bn_relu(pad_ref, w_ref, scale_ref, shift_ref, lin):
    """'Same' Conv1d(k=5) + folded BatchNorm + ReLU from a padded VMEM ref.

    pad_ref: (lin+4, Cin) zero-padded input, w_ref: (5, Cin, Cout),
    scale/shift: (1, Cout).  Returns (lin, Cout) f32.
    """
    acc = jnp.dot(pad_ref[0:lin, :], w_ref[0],
                  preferred_element_type=jnp.float32)
    for k in range(1, 5):
        acc = acc + jnp.dot(pad_ref[k:k + lin, :], w_ref[k],
                            preferred_element_type=jnp.float32)
    return jnp.maximum(acc * scale_ref[...] + shift_ref[...], 0.0)


def _maxpool5s2(act_ref, lin):
    """MaxPool1d(5, stride=2): max of 5 stride-2 sublane reads (no matmul)."""
    p = _pool_len(lin)
    m = act_ref[pl.ds(0, p, 2), :]
    for k in range(1, 5):
        m = jnp.maximum(m, act_ref[pl.ds(k, p, 2), :])
    return m


# ------------------------------ fused kernels ------------------------------

def _make_encoder_kernel(L):
    """Whole LeadEncoder for one lead: conv/pool trunk + gap, VMEM-resident."""
    P1 = _pool_len(L)
    P2 = _pool_len(P1)

    def kernel(x_ref, w1_ref, s1_ref, h1_ref,
               w2_ref, s2_ref, h2_ref, wp2_ref, bp2_ref,
               w3_ref, s3_ref, h3_ref, wp3_ref, bp3_ref,
               o_ref,
               pad1, act1, pad2, act2, pad3, act3):
        # ---- stage 1: conv1 (Cin=1 -> VPU broadcast MAC) + BN + ReLU + pool
        _write_padded(pad1, x_ref[0], L)                  # (L+4, 1)
        acc = pad1[0:L, :] * w1_ref[0:1, :]               # (L,1)*(1,C1)
        for k in range(1, 5):
            acc = acc + pad1[k:k + L, :] * w1_ref[k:k + 1, :]
        act1[...] = jnp.maximum(acc * s1_ref[...] + h1_ref[...], 0.0)
        x2 = _maxpool5s2(act1, L)                         # (P1, C1)

        # ---- stage 2: residual = conv2(x); x = pointconv2(x) + residual; pool
        _write_padded(pad2, x2, P1)
        r2 = _conv5_bn_relu(pad2, w2_ref, s2_ref, h2_ref, P1)
        act2[...] = (jnp.dot(x2, wp2_ref[...],
                             preferred_element_type=jnp.float32)
                     + bp2_ref[...] + r2)
        x3 = _maxpool5s2(act2, P1)                        # (P2, C2)

        # ---- stage 3
        _write_padded(pad3, x3, P2)
        r3 = _conv5_bn_relu(pad3, w3_ref, s3_ref, h3_ref, P2)
        act3[...] = (jnp.dot(x3, wp3_ref[...],
                             preferred_element_type=jnp.float32)
                     + bp3_ref[...] + r3)
        x4 = _maxpool5s2(act3, P2)                        # (P3, C3)

        # ---- global average pool
        o_ref[0] = jnp.mean(x4, axis=0, keepdims=True).astype(o_ref.dtype)

    return kernel


def _make_classifier_kernel(F):
    """Whole ClassificationHead for one batch element: trunk + gap + fc->fc1."""
    P1 = _pool_len(F)
    P2 = _pool_len(P1)

    def kernel(x_ref, w1_ref, s1_ref, h1_ref,
               w2_ref, s2_ref, h2_ref, wp2_ref, bp2_ref,
               w3_ref, s3_ref, h3_ref, wp3_ref, bp3_ref,
               wf_ref, bf_ref, wf1_ref, bf1_ref,
               o_ref,
               pad1, act1, pad2, act2, pad3, act3):
        # ---- stage 1
        _write_padded(pad1, x_ref[0], F)                  # (F+4, 12)
        act1[...] = _conv5_bn_relu(pad1, w1_ref, s1_ref, h1_ref, F)
        x2 = _maxpool5s2(act1, F)                         # (P1, C1)

        # ---- stage 2
        _write_padded(pad2, x2, P1)
        r2 = _conv5_bn_relu(pad2, w2_ref, s2_ref, h2_ref, P1)
        act2[...] = (jnp.dot(x2, wp2_ref[...],
                             preferred_element_type=jnp.float32)
                     + bp2_ref[...] + r2)
        x3 = _maxpool5s2(act2, P1)                        # (P2, C2)

        # ---- stage 3
        _write_padded(pad3, x3, P2)
        r3 = _conv5_bn_relu(pad3, w3_ref, s3_ref, h3_ref, P2)
        act3[...] = (jnp.dot(x3, wp3_ref[...],
                             preferred_element_type=jnp.float32)
                     + bp3_ref[...] + r3)
        x4 = _maxpool5s2(act3, P2)                        # (P3, C3)

        # ---- gap + (Dropout(p=0.5) is identity in eval mode) + fc -> fc1
        feat = jnp.mean(x4, axis=0, keepdims=True)        # (1, C3)
        h = jnp.dot(feat, wf_ref[...],
                    preferred_element_type=jnp.float32) + bf_ref[...]
        y = jnp.dot(h, wf1_ref[...],
                    preferred_element_type=jnp.float32) + bf1_ref[...]
        o_ref[0] = y.astype(o_ref.dtype)

    return kernel


# --------------------------------- wrappers --------------------------------

def _const_spec(shape):
    if len(shape) == 2:
        return pl.BlockSpec(shape, lambda i: (0, 0))
    return pl.BlockSpec(shape, lambda i: (0, 0, 0))


def encoder_forward(leads, p):
    """leads: (N, L, 1) per-lead signals -> (N, 1, 4*C_enc) features."""
    N, L, cin = leads.shape
    assert cin == 1
    w1, s1, h1 = p['conv1']          # (5, 1, C1)
    w2, s2, h2 = p['conv2']          # (5, C1, C2)
    w3, s3, h3 = p['conv3']          # (5, C2, C3)
    wp2, bp2 = p['pc2']
    wp3, bp3 = p['pc3']
    C1, C2, C3 = w1.shape[-1], w2.shape[-1], w3.shape[-1]
    P1 = _pool_len(L)
    P2 = _pool_len(P1)
    assert _pool_len(P2) >= 1
    w1r = w1.reshape(5, C1)          # Cin = 1 -> 2D taps for the VPU path

    return pl.pallas_call(
        _make_encoder_kernel(L),
        out_shape=jax.ShapeDtypeStruct((N, 1, C3), jnp.float32),
        grid=(N,),
        in_specs=[
            pl.BlockSpec((1, L, 1), lambda i: (i, 0, 0)),
            _const_spec((5, C1)), _const_spec((1, C1)), _const_spec((1, C1)),
            _const_spec((5, C1, C2)), _const_spec((1, C2)), _const_spec((1, C2)),
            _const_spec((C1, C2)), _const_spec((1, C2)),
            _const_spec((5, C2, C3)), _const_spec((1, C3)), _const_spec((1, C3)),
            _const_spec((C2, C3)), _const_spec((1, C3)),
        ],
        out_specs=pl.BlockSpec((1, 1, C3), lambda i: (i, 0, 0)),
        scratch_shapes=[
            pltpu.VMEM((L + 4, 1), jnp.float32),   # padded conv1 input
            pltpu.VMEM((L, C1), jnp.float32),      # conv1 output (pre-pool)
            pltpu.VMEM((P1 + 4, C1), jnp.float32),
            pltpu.VMEM((P1, C2), jnp.float32),
            pltpu.VMEM((P2 + 4, C2), jnp.float32),
            pltpu.VMEM((P2, C3), jnp.float32),
        ],
        compiler_params=pltpu.CompilerParams(
            dimension_semantics=("parallel",)),
    )(leads, w1r, s1, h1, w2, s2, h2, wp2, bp2, w3, s3, h3, wp3, bp3)


def classifier_forward(x_blc, p):
    """x_blc: (B, F, 12) classifier input (length=F, channels=12 leads)."""
    B, F, Cin0 = x_blc.shape
    w1, s1, h1 = p['conv1']          # (5, 12, C1)
    w2, s2, h2 = p['conv2']
    w3, s3, h3 = p['conv3']
    wp2, bp2 = p['pc2']
    wp3, bp3 = p['pc3']
    wf, bf = p['fc']                 # (C3, H), (1, H)
    wf1, bf1 = p['fc1']              # (H, NC), (1, NC)
    C1, C2, C3 = w1.shape[-1], w2.shape[-1], w3.shape[-1]
    H, NC = wf.shape[-1], wf1.shape[-1]
    P1 = _pool_len(F)
    P2 = _pool_len(P1)
    assert _pool_len(P2) >= 1

    # Zero-pad the hidden dim (500 -> 512): identical result, lane-aligned.
    Hp = ((H + 127) // 128) * 128
    if Hp != H:
        wf = jnp.pad(wf, ((0, 0), (0, Hp - H)))
        bf = jnp.pad(bf, ((0, 0), (0, Hp - H)))
        wf1 = jnp.pad(wf1, ((0, Hp - H), (0, 0)))

    out = pl.pallas_call(
        _make_classifier_kernel(F),
        out_shape=jax.ShapeDtypeStruct((B, 1, NC), jnp.float32),
        grid=(B,),
        in_specs=[
            pl.BlockSpec((1, F, Cin0), lambda i: (i, 0, 0)),
            _const_spec((5, Cin0, C1)), _const_spec((1, C1)), _const_spec((1, C1)),
            _const_spec((5, C1, C2)), _const_spec((1, C2)), _const_spec((1, C2)),
            _const_spec((C1, C2)), _const_spec((1, C2)),
            _const_spec((5, C2, C3)), _const_spec((1, C3)), _const_spec((1, C3)),
            _const_spec((C2, C3)), _const_spec((1, C3)),
            _const_spec((C3, Hp)), _const_spec((1, Hp)),
            _const_spec((Hp, NC)), _const_spec((1, NC)),
        ],
        out_specs=pl.BlockSpec((1, 1, NC), lambda i: (i, 0, 0)),
        scratch_shapes=[
            pltpu.VMEM((F + 4, Cin0), jnp.float32),
            pltpu.VMEM((F, C1), jnp.float32),
            pltpu.VMEM((P1 + 4, C1), jnp.float32),
            pltpu.VMEM((P1, C2), jnp.float32),
            pltpu.VMEM((P2 + 4, C2), jnp.float32),
            pltpu.VMEM((P2, C3), jnp.float32),
        ],
        compiler_params=pltpu.CompilerParams(
            dimension_semantics=("parallel",)),
    )(x_blc, w1, s1, h1, w2, s2, h2, wp2, bp2, w3, s3, h3, wp3, bp3,
      wf, bf, wf1, bf1)
    return out[:, 0, :]


def ecg12_forward(x_bcl, enc_params, cls_params):
    """x_bcl: (B, 12, L) -- PyTorch NCL input convention."""
    B, nlead, L = x_bcl.shape
    # All 12 leads go through encoder_1 (exactly as in the reference forward).
    leads = x_bcl.reshape(B * nlead, L, 1)                  # BLC, Cin = 1
    feat = encoder_forward(leads, enc_params)               # (B*12, 1, 4*C)
    C3e = feat.shape[-1]
    # torch.cat([...], dim=1): classifier sees channels=12 leads, length=4*C.
    # The only inter-kernel XLA op left is this tiny (B, 12, 4*C) transpose.
    cls_in = feat.reshape(B, nlead, C3e).transpose(0, 2, 1)  # (B, 4*C, 12)
    return classifier_forward(cls_in, cls_params)            # (B, NC)


# ------------------------- pure-JAX reference -------------------------------

def _conv_ref(x, w, scale, shift):
    B, L, Cin = x.shape
    xp = jnp.pad(x, ((0, 0), (2, 2), (0, 0)))
    acc = sum(jnp.einsum('blc,cd->bld', xp[:, k:k + L], w[k]) for k in range(5))
    return jnp.maximum(acc * scale + shift, 0.0)


def _maxpool_ref(x):
    B, L, C = x.shape
    Lout = _pool_len(L)
    return jnp.stack([jnp.max(x[:, 2 * i:2 * i + 5], axis=1)
                      for i in range(Lout)], axis=1)


def _trunk_ref(x, p):
    x = _conv_ref(x, *p['conv1'])
    x = _maxpool_ref(x)
    res = _conv_ref(x, *p['conv2'])
    x = jnp.einsum('blc,cd->bld', x, p['pc2'][0]) + p['pc2'][1] + res
    x = _maxpool_ref(x)
    res = _conv_ref(x, *p['conv3'])
    x = jnp.einsum('blc,cd->bld', x, p['pc3'][0]) + p['pc3'][1] + res
    x = _maxpool_ref(x)
    return x


def ecg12_forward_ref(x_bcl, enc_params, cls_params):
    B, nlead, L = x_bcl.shape
    leads = x_bcl.reshape(B * nlead, L, 1)
    feat = jnp.mean(_trunk_ref(leads, enc_params), axis=1)   # (B*12, 4*C)
    cls_in = feat.reshape(B, nlead, -1).transpose(0, 2, 1)
    f = jnp.mean(_trunk_ref(cls_in, cls_params), axis=1)
    w1, b1 = cls_params['fc']
    w2, b2 = cls_params['fc1']
    return (f @ w1 + b1) @ w2 + b2


# ------------------------- parameter construction ---------------------------

def init_conv_block(key, cin, cout):
    """Conv1d(k=5, no bias) weight + folded eval-mode BatchNorm scale/shift."""
    k1, k2, k3, k4, k5 = jax.random.split(key, 5)
    w = jax.random.normal(k1, (5, cin, cout), jnp.float32) / np.sqrt(5 * cin)
    gamma = 1.0 + 0.1 * jax.random.normal(k2, (1, cout), jnp.float32)
    beta = 0.1 * jax.random.normal(k3, (1, cout), jnp.float32)
    rmean = 0.1 * jax.random.normal(k4, (1, cout), jnp.float32)
    rvar = 1.0 + 0.1 * jnp.abs(jax.random.normal(k5, (1, cout), jnp.float32))
    scale = gamma / jnp.sqrt(rvar + 1e-5)
    shift = beta - rmean * scale
    return w, scale, shift


def init_pointconv(key, cin, cout):
    k1, k2 = jax.random.split(key)
    w = jax.random.normal(k1, (cin, cout), jnp.float32) / np.sqrt(cin)
    b = 0.1 * jax.random.normal(k2, (1, cout), jnp.float32)
    return w, b


def init_linear(key, din, dout):
    k1, k2 = jax.random.split(key)
    w = jax.random.normal(k1, (din, dout), jnp.float32) / np.sqrt(din)
    b = 0.1 * jax.random.normal(k2, (1, dout), jnp.float32)
    return w, b


def init_encoder(key, c):
    ks = jax.random.split(key, 5)
    return {'conv1': init_conv_block(ks[0], 1, c),
            'conv2': init_conv_block(ks[1], c, 2 * c),
            'conv3': init_conv_block(ks[2], 2 * c, 4 * c),
            'pc2': init_pointconv(ks[3], c, 2 * c),
            'pc3': init_pointconv(ks[4], 2 * c, 4 * c)}


def init_classifier(key, input_channel, c, num_classes, hidden):
    ks = jax.random.split(key, 7)
    return {'conv1': init_conv_block(ks[0], input_channel, c),
            'conv2': init_conv_block(ks[1], c, 2 * c),
            'conv3': init_conv_block(ks[2], 2 * c, 4 * c),
            'pc2': init_pointconv(ks[3], c, 2 * c),
            'pc3': init_pointconv(ks[4], 2 * c, 4 * c),
            'fc': init_linear(ks[5], 4 * c, hidden),
            'fc1': init_linear(ks[6], hidden, num_classes)}


# --------------------------------- main --------------------------------------

if __name__ == "__main__":
    key = jax.random.PRNGKey(0)
    k_x, k_enc, k_cls = jax.random.split(key, 3)

    B = 2             # batch
    L = 64            # ECG signal length (small demo size)
    C_ENC = 8         # LeadEncoder initial_channel (small demo size)
    NUM_CLASSES = 2
    HIDDEN = 500      # ClassificationHead hidden_units default (padded to 512)
    # ClassificationHead is constructed with initial_channel=32 (hardcoded in
    # the PyTorch module) and input_channel=12 (concatenated lead features).
    x = jax.random.normal(k_x, (B, 12, L), jnp.float32)

    enc_params = init_encoder(k_enc, C_ENC)
    cls_params = init_classifier(k_cls, input_channel=12, c=32,
                                 num_classes=NUM_CLASSES, hidden=HIDDEN)

    fwd = jax.jit(ecg12_forward)
    y = jax.block_until_ready(fwd(x, enc_params, cls_params))
    assert y.shape == (B, NUM_CLASSES)

    y_ref = jax.block_until_ready(ecg12_forward_ref(x, enc_params, cls_params))
    assert np.allclose(np.asarray(y), np.asarray(y_ref), rtol=1e-2, atol=1e-2), \
        "Pallas output does not match JAX reference"

    print("KERNEL_OK")
</pallas_src>

<mosaic_0001>
module attributes {stable_mosaic.version = 11 : i64} {
  func.func @kernel(%arg0: i32, %arg1: memref<1x64x1xf32, #tpu.memory_space<vmem>>, %arg2: memref<5x8xf32, #tpu.memory_space<vmem>>, %arg3: memref<1x8xf32, #tpu.memory_space<vmem>>, %arg4: memref<1x8xf32, #tpu.memory_space<vmem>>, %arg5: memref<5x8x16xf32, #tpu.memory_space<vmem>>, %arg6: memref<1x16xf32, #tpu.memory_space<vmem>>, %arg7: memref<1x16xf32, #tpu.memory_space<vmem>>, %arg8: memref<8x16xf32, #tpu.memory_space<vmem>>, %arg9: memref<1x16xf32, #tpu.memory_space<vmem>>, %arg10: memref<5x16x32xf32, #tpu.memory_space<vmem>>, %arg11: memref<1x32xf32, #tpu.memory_space<vmem>>, %arg12: memref<1x32xf32, #tpu.memory_space<vmem>>, %arg13: memref<16x32xf32, #tpu.memory_space<vmem>>, %arg14: memref<1x32xf32, #tpu.memory_space<vmem>>, %arg15: memref<1x1x32xf32, #tpu.memory_space<vmem>>, %arg16: memref<68x1xf32, #tpu.memory_space<vmem>>, %arg17: memref<64x8xf32, #tpu.memory_space<vmem>>, %arg18: memref<34x8xf32, #tpu.memory_space<vmem>>, %arg19: memref<30x16xf32, #tpu.memory_space<vmem>>, %arg20: memref<17x16xf32, #tpu.memory_space<vmem>>, %arg21: memref<13x32xf32, #tpu.memory_space<vmem>>) attributes {dimension_semantics = [#tpu.dimension_semantics<parallel>], iteration_bounds = array<i64: 24>, scalar_prefetch = 0 : i64, scratch_operands = 6 : i64, tpu.core_type = #tpu.core_type<tc>, window_params = [{transform_indices = @transform_0, window_bounds = array<i64: 1, 64, 1>}, {pipeline_mode = #tpu.pipeline_mode<synchronous>, transform_indices = @transform_1, window_bounds = array<i64: 5, 8>}, {pipeline_mode = #tpu.pipeline_mode<synchronous>, transform_indices = @transform_2, window_bounds = array<i64: 1, 8>}, {pipeline_mode = #tpu.pipeline_mode<synchronous>, transform_indices = @transform_3, window_bounds = array<i64: 1, 8>}, {pipeline_mode = #tpu.pipeline_mode<synchronous>, transform_indices = @transform_4, window_bounds = array<i64: 5, 8, 16>}, {pipeline_mode = #tpu.pipeline_mode<synchronous>, transform_indices = @transform_5, window_bounds = array<i64: 1, 16>}, {pipeline_mode = #tpu.pipeline_mode<synchronous>, transform_indices = @transform_6, window_bounds = array<i64: 1, 16>}, {pipeline_mode = #tpu.pipeline_mode<synchronous>, transform_indices = @transform_7, window_bounds = array<i64: 8, 16>}, {pipeline_mode = #tpu.pipeline_mode<synchronous>, transform_indices = @transform_8, window_bounds = array<i64: 1, 16>}, {pipeline_mode = #tpu.pipeline_mode<synchronous>, transform_indices = @transform_9, window_bounds = array<i64: 5, 16, 32>}, {pipeline_mode = #tpu.pipeline_mode<synchronous>, transform_indices = @transform_10, window_bounds = array<i64: 1, 32>}, {pipeline_mode = #tpu.pipeline_mode<synchronous>, transform_indices = @transform_11, window_bounds = array<i64: 1, 32>}, {pipeline_mode = #tpu.pipeline_mode<synchronous>, transform_indices = @transform_12, window_bounds = array<i64: 16, 32>}, {pipeline_mode = #tpu.pipeline_mode<synchronous>, transform_indices = @transform_13, window_bounds = array<i64: 1, 32>}, {transform_indices = @transform_14, window_bounds = array<i64: 1, 1, 32>}]} {
    %c0 = arith.constant 0 : index
    %c0_0 = arith.constant 0 : index
    %c0_1 = arith.constant 0 : index
    %0 = vector.load %arg1[%c0, %c0_0, %c0_1] : memref<1x64x1xf32, #tpu.memory_space<vmem>>, vector<1x64x1xf32>
    %1 = vector.shape_cast %0 : vector<1x64x1xf32> to vector<64x1xf32>
    %cst = arith.constant 0.000000e+00 : f32
    %2 = vector.broadcast %cst : f32 to vector<68x1xf32>
    %c0_2 = arith.constant 0 : index
    %c0_3 = arith.constant 0 : index
    %3 = vector.load %arg16[%c0_2, %c0_3] : memref<68x1xf32, #tpu.memory_space<vmem>>, vector<68x1xf32>
    tpu.vector_store %arg16[%c0_2, %c0_3], %2 {strides = array<i32>} : memref<68x1xf32, #tpu.memory_space<vmem>>, vector<68x1xf32>,
    %c2 = arith.constant 2 : index
    %c0_4 = arith.constant 0 : index
    %4 = vector.load %arg16[%c2, %c0_4] : memref<68x1xf32, #tpu.memory_space<vmem>>, vector<64x1xf32>
    tpu.vector_store %arg16[%c2, %c0_4], %1 {strides = array<i32>} : memref<68x1xf32, #tpu.memory_space<vmem>>, vector<64x1xf32>,
    %c0_5 = arith.constant 0 : index
    %c0_6 = arith.constant 0 : index
    %5 = vector.load %arg16[%c0_5, %c0_6] : memref<68x1xf32, #tpu.memory_space<vmem>>, vector<64x1xf32>
    %c0_7 = arith.constant 0 : index
    %c0_8 = arith.constant 0 : index
    %6 = vector.load %arg2[%c0_7, %c0_8] : memref<5x8xf32, #tpu.memory_space<vmem>>, vector<1x8xf32>
    %7 = vector.broadcast %5 : vector<64x1xf32> to vector<64x8xf32>
    %8 = vector.broadcast %6 : vector<1x8xf32> to vector<64x8xf32>
    %9 = arith.mulf %7, %8 : vector<64x8xf32>
    %c1 = arith.constant 1 : index
    %c0_9 = arith.constant 0 : index
    %10 = vector.load %arg16[%c1, %c0_9] : memref<68x1xf32, #tpu.memory_space<vmem>>, vector<64x1xf32>
    %c1_10 = arith.constant 1 : index
    %c0_11 = arith.constant 0 : index
    %11 = vector.load %arg2[%c1_10, %c0_11] : memref<5x8xf32, #tpu.memory_space<vmem>>, vector<1x8xf32>
    %12 = vector.broadcast %10 : vector<64x1xf32> to vector<64x8xf32>
    %13 = vector.broadcast %11 : vector<1x8xf32> to vector<64x8xf32>
    %14 = arith.mulf %12, %13 : vector<64x8xf32>
    %15 = arith.addf %9, %14 : vector<64x8xf32>
    %c2_12 = arith.constant 2 : index
    %c0_13 = arith.constant 0 : index
    %16 = vector.load %arg16[%c2_12, %c0_13] : memref<68x1xf32, #tpu.memory_space<vmem>>, vector<64x1xf32>
    %c2_14 = arith.constant 2 : index
    %c0_15 = arith.constant 0 : index
    %17 = vector.load %arg2[%c2_14, %c0_15] : memref<5x8xf32, #tpu.memory_space<vmem>>, vector<1x8xf32>
    %18 = vector.broadcast %16 : vector<64x1xf32> to vector<64x8xf32>
    %19 = vector.broadcast %17 : vector<1x8xf32> to vector<64x8xf32>
    %20 = arith.mulf %18, %19 : vector<64x8xf32>
    %21 = arith.addf %15, %20 : vector<64x8xf32>
    %c3 = arith.constant 3 : index
    %c0_16 = arith.constant 0 : index
    %22 = vector.load %arg16[%c3, %c0_16] : memref<68x1xf32, #tpu.memory_space<vmem>>, vector<64x1xf32>
    %c3_17 = arith.constant 3 : index
    %c0_18 = arith.constant 0 : index
    %23 = vector.load %arg2[%c3_17, %c0_18] : memref<5x8xf32, #tpu.memory_space<vmem>>, vector<1x8xf32>
    %24 = vector.broadcast %22 : vector<64x1xf32> to vector<64x8xf32>
    %25 = vector.broadcast %23 : vector<1x8xf32> to vector<64x8xf32>
    %26 = arith.mulf %24, %25 : vector<64x8xf32>
    %27 = arith.addf %21, %26 : vector<64x8xf32>
    %c4 = arith.constant 4 : index
    %c0_19 = arith.constant 0 : index
    %28 = vector.load %arg16[%c4, %c0_19] : memref<68x1xf32, #tpu.memory_space<vmem>>, vector<64x1xf32>
    %c4_20 = arith.constant 4 : index
    %c0_21 = arith.constant 0 : index
    %29 = vector.load %arg2[%c4_20, %c0_21] : memref<5x8xf32, #tpu.memory_space<vmem>>, vector<1x8xf32>
    %30 = vector.broadcast %28 : vector<64x1xf32> to vector<64x8xf32>
    %31 = vector.broadcast %29 : vector<1x8xf32> to vector<64x8xf32>
    %32 = arith.mulf %30, %31 : vector<64x8xf32>
    %33 = arith.addf %27, %32 : vector<64x8xf32>
    %c0_22 = arith.constant 0 : index
    %c0_23 = arith.constant 0 : index
    %34 = vector.load %arg3[%c0_22, %c0_23] : memref<1x8xf32, #tpu.memory_space<vmem>>, vector<1x8xf32>
    %35 = vector.broadcast %34 : vector<1x8xf32> to vector<64x8xf32>
    %36 = arith.mulf %33, %35 : vector<64x8xf32>
    %c0_24 = arith.constant 0 : index
    %c0_25 = arith.constant 0 : index
    %37 = vector.load %arg4[%c0_24, %c0_25] : memref<1x8xf32, #tpu.memory_space<vmem>>, vector<1x8xf32>
    %38 = vector.broadcast %37 : vector<1x8xf32> to vector<64x8xf32>
    %39 = arith.addf %36, %38 : vector<64x8xf32>
    %cst_26 = arith.constant 0.000000e+00 : f32
    %40 = vector.broadcast %cst_26 : f32 to vector<64x8xf32>
    %41 = arith.maximumf %39, %40 : vector<64x8xf32>
    %c0_27 = arith.constant 0 : index
    %c0_28 = arith.constant 0 : index
    %42 = vector.load %arg17[%c0_27, %c0_28] : memref<64x8xf32, #tpu.memory_space<vmem>>, vector<64x8xf32>
    tpu.vector_store %arg17[%c0_27, %c0_28], %41 {strides = array<i32>} : memref<64x8xf32, #tpu.memory_space<vmem>>, vector<64x8xf32>,
    %c0_29 = arith.constant 0 : index
    %c0_30 = arith.constant 0 : index
    %43 = tpu.strided_load %arg17[%c0_29, %c0_30] {strides = array<i32: 2, 1>} : memref<64x8xf32, #tpu.memory_space<vmem>>, vector<30x8xf32>
    %c1_31 = arith.constant 1 : index
    %c0_32 = arith.constant 0 : index
    %44 = tpu.strided_load %arg17[%c1_31, %c0_32] {strides = array<i32: 2, 1>} : memref<64x8xf32, #tpu.memory_space<vmem>>, vector<30x8xf32>
    %45 = arith.maximumf %43, %44 : vector<30x8xf32>
    %c2_33 = arith.constant 2 : index
    %c0_34 = arith.constant 0 : index
    %46 = tpu.strided_load %arg17[%c2_33, %c0_34] {strides = array<i32: 2, 1>} : memref<64x8xf32, #tpu.memory_space<vmem>>, vector<30x8xf32>
    %47 = arith.maximumf %45, %46 : vector<30x8xf32>
    %c3_35 = arith.constant 3 : index
    %c0_36 = arith.constant 0 : index
    %48 = tpu.strided_load %arg17[%c3_35, %c0_36] {strides = array<i32: 2, 1>} : memref<64x8xf32, #tpu.memory_space<vmem>>, vector<30x8xf32>
    %49 = arith.maximumf %47, %48 : vector<30x8xf32>
    %c4_37 = arith.constant 4 : index
    %c0_38 = arith.constant 0 : index
    %50 = tpu.strided_load %arg17[%c4_37, %c0_38] {strides = array<i32: 2, 1>} : memref<64x8xf32, #tpu.memory_space<vmem>>, vector<30x8xf32>
    %51 = arith.maximumf %49, %50 : vector<30x8xf32>
    %cst_39 = arith.constant 0.000000e+00 : f32
    %52 = vector.broadcast %cst_39 : f32 to vector<34x8xf32>
    %c0_40 = arith.constant 0 : index
    %c0_41 = arith.constant 0 : index
    %53 = vector.load %arg18[%c0_40, %c0_41] : memref<34x8xf32, #tpu.memory_space<vmem>>, vector<34x8xf32>
    tpu.vector_store %arg18[%c0_40, %c0_41], %52 {strides = array<i32>} : memref<34x8xf32, #tpu.memory_space<vmem>>, vector<34x8xf32>,
    %c2_42 = arith.constant 2 : index
    %c0_43 = arith.constant 0 : index
    %54 = vector.load %arg18[%c2_42, %c0_43] : memref<34x8xf32, #tpu.memory_space<vmem>>, vector<30x8xf32>
    tpu.vector_store %arg18[%c2_42, %c0_43], %51 {strides = array<i32>} : memref<34x8xf32, #tpu.memory_space<vmem>>, vector<30x8xf32>,
    %c0_44 = arith.constant 0 : index
    %c0_45 = arith.constant 0 : index
    %55 = vector.load %arg18[%c0_44, %c0_45] : memref<34x8xf32, #tpu.memory_space<vmem>>, vector<30x8xf32>
    %c0_46 = arith.constant 0 : index
    %c0_47 = arith.constant 0 : index
    %c0_48 = arith.constant 0 : index
    %56 = vector.load %arg5[%c0_46, %c0_47, %c0_48] : memref<5x8x16xf32, #tpu.memory_space<vmem>>, vector<1x8x16xf32>
    %57 = vector.shape_cast %56 : vector<1x8x16xf32> to vector<8x16xf32>
    %cst_49 = arith.constant dense<0.000000e+00> : vector<30x16xf32>
    %58 = tpu.matmul %55, %57, %cst_49 {dimension_numbers = #tpu.dot_dimension_numbers<[1], [0], [0], [1], [0, 0, 1, 1], [], []>} : vector<30x8xf32>, vector<8x16xf32>, vector<30x16xf32> -> vector<30x16xf32>
    %c1_50 = arith.constant 1 : index
    %c0_51 = arith.constant 0 : index
    %59 = vector.load %arg18[%c1_50, %c0_51] : memref<34x8xf32, #tpu.memory_space<vmem>>, vector<30x8xf32>
    %c1_52 = arith.constant 1 : index
    %c0_53 = arith.constant 0 : index
    %c0_54 = arith.constant 0 : index
    %60 = vector.load %arg5[%c1_52, %c0_53, %c0_54] : memref<5x8x16xf32, #tpu.memory_space<vmem>>, vector<1x8x16xf32>
    %61 = vector.shape_cast %60 : vector<1x8x16xf32> to vector<8x16xf32>
    %cst_55 = arith.constant dense<0.000000e+00> : vector<30x16xf32>
    %62 = tpu.matmul %59, %61, %cst_55 {dimension_numbers = #tpu.dot_dimension_numbers<[1], [0], [0], [1], [0, 0, 1, 1], [], []>} : vector<30x8xf32>, vector<8x16xf32>, vector<30x16xf32> -> vector<30x16xf32>
    %63 = arith.addf %58, %62 : vector<30x16xf32>
    %c2_56 = arith.constant 2 : index
    %c0_57 = arith.constant 0 : index
    %64 = vector.load %arg18[%c2_56, %c0_57] : memref<34x8xf32, #tpu.memory_space<vmem>>, vector<30x8xf32>
    %c2_58 = arith.constant 2 : index
    %c0_59 = arith.constant 0 : index
    %c0_60 = arith.constant 0 : index
    %65 = vector.load %arg5[%c2_58, %c0_59, %c0_60] : memref<5x8x16xf32, #tpu.memory_space<vmem>>, vector<1x8x16xf32>
    %66 = vector.shape_cast %65 : vector<1x8x16xf32> to vector<8x16xf32>
    %cst_61 = arith.constant dense<0.000000e+00> : vector<30x16xf32>
    %67 = tpu.matmul %64, %66, %cst_61 {dimension_numbers = #tpu.dot_dimension_numbers<[1], [0], [0], [1], [0, 0, 1, 1], [], []>} : vector<30x8xf32>, vector<8x16xf32>, vector<30x16xf32> -> vector<30x16xf32>
    %68 = arith.addf %63, %67 : vector<30x16xf32>
    %c3_62 = arith.constant 3 : index
    %c0_63 = arith.constant 0 : index
    %69 = vector.load %arg18[%c3_62, %c0_63] : memref<34x8xf32, #tpu.memory_space<vmem>>, vector<30x8xf32>
    %c3_64 = arith.constant 3 : index
    %c0_65 = arith.constant 0 : index
    %c0_66 = arith.constant 0 : index
    %70 = vector.load %arg5[%c3_64, %c0_65, %c0_66] : memref<5x8x16xf32, #tpu.memory_space<vmem>>, vector<1x8x16xf32>
    %71 = vector.shape_cast %70 : vector<1x8x16xf32> to vector<8x16xf32>
    %cst_67 = arith.constant dense<0.000000e+00> : vector<30x16xf32>
    %72 = tpu.matmul %69, %71, %cst_67 {dimension_numbers = #tpu.dot_dimension_numbers<[1], [0], [0], [1], [0, 0, 1, 1], [], []>} : vector<30x8xf32>, vector<8x16xf32>, vector<30x16xf32> -> vector<30x16xf32>
    %73 = arith.addf %68, %72 : vector<30x16xf32>
    %c4_68 = arith.constant 4 : index
    %c0_69 = arith.constant 0 : index
    %74 = vector.load %arg18[%c4_68, %c0_69] : memref<34x8xf32, #tpu.memory_space<vmem>>, vector<30x8xf32>
    %c4_70 = arith.constant 4 : index
    %c0_71 = arith.constant 0 : index
    %c0_72 = arith.constant 0 : index
    %75 = vector.load %arg5[%c4_70, %c0_71, %c0_72] : memref<5x8x16xf32, #tpu.memory_space<vmem>>, vector<1x8x16xf32>
    %76 = vector.shape_cast %75 : vector<1x8x16xf32> to vector<8x16xf32>
    %cst_73 = arith.constant dense<0.000000e+00> : vector<30x16xf32>
    %77 = tpu.matmul %74, %76, %cst_73 {dimension_numbers = #tpu.dot_dimension_numbers<[1], [0], [0], [1], [0, 0, 1, 1], [], []>} : vector<30x8xf32>, vector<8x16xf32>, vector<30x16xf32> -> vector<30x16xf32>
    %78 = arith.addf %73, %77 : vector<30x16xf32>
    %c0_74 = arith.constant 0 : index
    %c0_75 = arith.constant 0 : index
    %79 = vector.load %arg6[%c0_74, %c0_75] : memref<1x16xf32, #tpu.memory_space<vmem>>, vector<1x16xf32>
    %80 = vector.broadcast %79 : vector<1x16xf32> to vector<30x16xf32>
    %81 = arith.mulf %78, %80 : vector<30x16xf32>
    %c0_76 = arith.constant 0 : index
    %c0_77 = arith.constant 0 : index
    %82 = vector.load %arg7[%c0_76, %c0_77] : memref<1x16xf32, #tpu.memory_space<vmem>>, vector<1x16xf32>
    %83 = vector.broadcast %82 : vector<1x16xf32> to vector<30x16xf32>
    %84 = arith.addf %81, %83 : vector<30x16xf32>
    %cst_78 = arith.constant 0.000000e+00 : f32
    %85 = vector.broadcast %cst_78 : f32 to vector<30x16xf32>
    %86 = arith.maximumf %84, %85 : vector<30x16xf32>
    %c0_79 = arith.constant 0 : index
    %c0_80 = arith.constant 0 : index
    %87 = vector.load %arg8[%c0_79, %c0_80] : memref<8x16xf32, #tpu.memory_space<vmem>>, vector<8x16xf32>
    %cst_81 = arith.constant dense<0.000000e+00> : vector<30x16xf32>
    %88 = tpu.matmul %51, %87, %cst_81 {dimension_numbers = #tpu.dot_dimension_numbers<[1], [0], [0], [1], [0, 0, 1, 1], [], []>} : vector<30x8xf32>, vector<8x16xf32>, vector<30x16xf32> -> vector<30x16xf32>
    %c0_82 = arith.constant 0 : index
    %c0_83 = arith.constant 0 : index
    %89 = vector.load %arg9[%c0_82, %c0_83] : memref<1x16xf32, #tpu.memory_space<vmem>>, vector<1x16xf32>
    %90 = vector.broadcast %89 : vector<1x16xf32> to vector<30x16xf32>
    %91 = arith.addf %88, %90 : vector<30x16xf32>
    %92 = arith.addf %91, %86 : vector<30x16xf32>
    %c0_84 = arith.constant 0 : index
    %c0_85 = arith.constant 0 : index
    %93 = vector.load %arg19[%c0_84, %c0_85] : memref<30x16xf32, #tpu.memory_space<vmem>>, vector<30x16xf32>
    tpu.vector_store %arg19[%c0_84, %c0_85], %92 {strides = array<i32>} : memref<30x16xf32, #tpu.memory_space<vmem>>, vector<30x16xf32>,
    %c0_86 = arith.constant 0 : index
    %c0_87 = arith.constant 0 : index
    %94 = tpu.strided_load %arg19[%c0_86, %c0_87] {strides = array<i32: 2, 1>} : memref<30x16xf32, #tpu.memory_space<vmem>>, vector<13x16xf32>
    %c1_88 = arith.constant 1 : index
    %c0_89 = arith.constant 0 : index
    %95 = tpu.strided_load %arg19[%c1_88, %c0_89] {strides = array<i32: 2, 1>} : memref<30x16xf32, #tpu.memory_space<vmem>>, vector<13x16xf32>
    %96 = arith.maximumf %94, %95 : vector<13x16xf32>
    %c2_90 = arith.constant 2 : index
    %c0_91 = arith.constant 0 : index
    %97 = tpu.strided_load %arg19[%c2_90, %c0_91] {strides = array<i32: 2, 1>} : memref<30x16xf32, #tpu.memory_space<vmem>>, vector<13x16xf32>
    %98 = arith.maximumf %96, %97 : vector<13x16xf32>
    %c3_92 = arith.constant 3 : index
    %c0_93 = arith.constant 0 : index
    %99 = tpu.strided_load %arg19[%c3_92, %c0_93] {strides = array<i32: 2, 1>} : memref<30x16xf32, #tpu.memory_space<vmem>>, vector<13x16xf32>
    %100 = arith.maximumf %98, %99 : vector<13x16xf32>
    %c4_94 = arith.constant 4 : index
    %c0_95 = arith.constant 0 : index
    %101 = tpu.strided_load %arg19[%c4_94, %c0_95] {strides = array<i32: 2, 1>} : memref<30x16xf32, #tpu.memory_space<vmem>>, vector<13x16xf32>
    %102 = arith.maximumf %100, %101 : vector<13x16xf32>
    %cst_96 = arith.constant 0.000000e+00 : f32
    %103 = vector.broadcast %cst_96 : f32 to vector<17x16xf32>
    %c0_97 = arith.constant 0 : index
    %c0_98 = arith.constant 0 : index
    %104 = vector.load %arg20[%c0_97, %c0_98] : memref<17x16xf32, #tpu.memory_space<vmem>>, vector<17x16xf32>
    tpu.vector_store %arg20[%c0_97, %c0_98], %103 {strides = array<i32>} : memref<17x16xf32, #tpu.memory_space<vmem>>, vector<17x16xf32>,
    %c2_99 = arith.constant 2 : index
    %c0_100 = arith.constant 0 : index
    %105 = vector.load %arg20[%c2_99, %c0_100] : memref<17x16xf32, #tpu.memory_space<vmem>>, vector<13x16xf32>
    tpu.vector_store %arg20[%c2_99, %c0_100], %102 {strides = array<i32>} : memref<17x16xf32, #tpu.memory_space<vmem>>, vector<13x16xf32>,
    %c0_101 = arith.constant 0 : index
    %c0_102 = arith.constant 0 : index
    %106 = vector.load %arg20[%c0_101, %c0_102] : memref<17x16xf32, #tpu.memory_space<vmem>>, vector<13x16xf32>
    %c0_103 = arith.constant 0 : index
    %c0_104 = arith.constant 0 : index
    %c0_105 = arith.constant 0 : index
    %107 = vector.load %arg10[%c0_103, %c0_104, %c0_105] : memref<5x16x32xf32, #tpu.memory_space<vmem>>, vector<1x16x32xf32>
    %108 = vector.shape_cast %107 : vector<1x16x32xf32> to vector<16x32xf32>
    %cst_106 = arith.constant dense<0.000000e+00> : vector<13x32xf32>
    %109 = tpu.matmul %106, %108, %cst_106 {dimension_numbers = #tpu.dot_dimension_numbers<[1], [0], [0], [1], [0, 0, 1, 1], [], []>} : vector<13x16xf32>, vector<16x32xf32>, vector<13x32xf32> -> vector<13x32xf32>
    %c1_107 = arith.constant 1 : index
    %c0_108 = arith.constant 0 : index
    %110 = vector.load %arg20[%c1_107, %c0_108] : memref<17x16xf32, #tpu.memory_space<vmem>>, vector<13x16xf32>
    %c1_109 = arith.constant 1 : index
    %c0_110 = arith.constant 0 : index
    %c0_111 = arith.constant 0 : index
    %111 = vector.load %arg10[%c1_109, %c0_110, %c0_111] : memref<5x16x32xf32, #tpu.memory_space<vmem>>, vector<1x16x32xf32>
    %112 = vector.shape_cast %111 : vector<1x16x32xf32> to vector<16x32xf32>
    %cst_112 = arith.constant dense<0.000000e+00> : vector<13x32xf32>
    %113 = tpu.matmul %110, %112, %cst_112 {dimension_numbers = #tpu.dot_dimension_numbers<[1], [0], [0], [1], [0, 0, 1, 1], [], []>} : vector<13x16xf32>, vector<16x32xf32>, vector<13x32xf32> -> vector<13x32xf32>
    %114 = arith.addf %109, %113 : vector<13x32xf32>
    %c2_113 = arith.constant 2 : index
    %c0_114 = arith.constant 0 : index
    %115 = vector.load %arg20[%c2_113, %c0_114] : memref<17x16xf32, #tpu.memory_space<vmem>>, vector<13x16xf32>
    %c2_115 = arith.constant 2 : index
    %c0_116 = arith.constant 0 : index
    %c0_117 = arith.constant 0 : index
    %116 = vector.load %arg10[%c2_115, %c0_116, %c0_117] : memref<5x16x32xf32, #tpu.memory_space<vmem>>, vector<1x16x32xf32>
    %117 = vector.shape_cast %116 : vector<1x16x32xf32> to vector<16x32xf32>
    %cst_118 = arith.constant dense<0.000000e+00> : vector<13x32xf32>
    %118 = tpu.matmul %115, %117, %cst_118 {dimension_numbers = #tpu.dot_dimension_numbers<[1], [0], [0], [1], [0, 0, 1, 1], [], []>} : vector<13x16xf32>, vector<16x32xf32>, vector<13x32xf32> -> vector<13x32xf32>
    %119 = arith.addf %114, %118 : vector<13x32xf32>
    %c3_119 = arith.constant 3 : index
    %c0_120 = arith.constant 0 : index
    %120 = vector.load %arg20[%c3_119, %c0_120] : memref<17x16xf32, #tpu.memory_space<vmem>>, vector<13x16xf32>
    %c3_121 = arith.constant 3 : index
    %c0_122 = arith.constant 0 : index
    %c0_123 = arith.constant 0 : index
    %121 = vector.load %arg10[%c3_121, %c0_122, %c0_123] : memref<5x16x32xf32, #tpu.memory_space<vmem>>, vector<1x16x32xf32>
    %122 = vector.shape_cast %121 : vector<1x16x32xf32> to vector<16x32xf32>
    %cst_124 = arith.constant dense<0.000000e+00> : vector<13x32xf32>
    %123 = tpu.matmul %120, %122, %cst_124 {dimension_numbers = #tpu.dot_dimension_numbers<[1], [0], [0], [1], [0, 0, 1, 1], [], []>} : vector<13x16xf32>, vector<16x32xf32>, vector<13x32xf32> -> vector<13x32xf32>
    %124 = arith.addf %119, %123 : vector<13x32xf32>
    %c4_125 = arith.constant 4 : index
    %c0_126 = arith.constant 0 : index
    %125 = vector.load %arg20[%c4_125, %c0_126] : memref<17x16xf32, #tpu.memory_space<vmem>>, vector<13x16xf32>
    %c4_127 = arith.constant 4 : index
    %c0_128 = arith.constant 0 : index
    %c0_129 = arith.constant 0 : index
    %126 = vector.load %arg10[%c4_127, %c0_128, %c0_129] : memref<5x16x32xf32, #tpu.memory_space<vmem>>, vector<1x16x32xf32>
    %127 = vector.shape_cast %126 : vector<1x16x32xf32> to vector<16x32xf32>
    %cst_130 = arith.constant dense<0.000000e+00> : vector<13x32xf32>
    %128 = tpu.matmul %125, %127, %cst_130 {dimension_numbers = #tpu.dot_dimension_numbers<[1], [0], [0], [1], [0, 0, 1, 1], [], []>} : vector<13x16xf32>, vector<16x32xf32>, vector<13x32xf32> -> vector<13x32xf32>
    %129 = arith.addf %124, %128 : vector<13x32xf32>
    %c0_131 = arith.constant 0 : index
    %c0_132 = arith.constant 0 : index
    %130 = vector.load %arg11[%c0_131, %c0_132] : memref<1x32xf32, #tpu.memory_space<vmem>>, vector<1x32xf32>
    %131 = vector.broadcast %130 : vector<1x32xf32> to vector<13x32xf32>
    %132 = arith.mulf %129, %131 : vector<13x32xf32>
    %c0_133 = arith.constant 0 : index
    %c0_134 = arith.constant 0 : index
    %133 = vector.load %arg12[%c0_133, %c0_134] : memref<1x32xf32, #tpu.memory_space<vmem>>, vector<1x32xf32>
    %134 = vector.broadcast %133 : vector<1x32xf32> to vector<13x32xf32>
    %135 = arith.addf %132, %134 : vector<13x32xf32>
    %cst_135 = arith.constant 0.000000e+00 : f32
    %136 = vector.broadcast %cst_135 : f32 to vector<13x32xf32>
    %137 = arith.maximumf %135, %136 : vector<13x32xf32>
    %c0_136 = arith.constant 0 : index
    %c0_137 = arith.constant 0 : index
    %138 = vector.load %arg13[%c0_136, %c0_137] : memref<16x32xf32, #tpu.memory_space<vmem>>, vector<16x32xf32>
    %cst_138 = arith.constant dense<0.000000e+00> : vector<13x32xf32>
    %139 = tpu.matmul %102, %138, %cst_138 {dimension_numbers = #tpu.dot_dimension_numbers<[1], [0], [0], [1], [0, 0, 1, 1], [], []>} : vector<13x16xf32>, vector<16x32xf32>, vector<13x32xf32> -> vector<13x32xf32>
    %c0_139 = arith.constant 0 : index
    %c0_140 = arith.constant 0 : index
    %140 = vector.load %arg14[%c0_139, %c0_140] : memref<1x32xf32, #tpu.memory_space<vmem>>, vector<1x32xf32>
    %141 = vector.broadcast %140 : vector<1x32xf32> to vector<13x32xf32>
    %142 = arith.addf %139, %141 : vector<13x32xf32>
    %143 = arith.addf %142, %137 : vector<13x32xf32>
    %c0_141 = arith.constant 0 : index
    %c0_142 = arith.constant 0 : index
    %144 = vector.load %arg21[%c0_141, %c0_142] : memref<13x32xf32, #tpu.memory_space<vmem>>, vector<13x32xf32>
    tpu.vector_store %arg21[%c0_141, %c0_142], %143 {strides = array<i32>} : memref<13x32xf32, #tpu.memory_space<vmem>>, vector<13x32xf32>,
    %c0_143 = arith.constant 0 : index
    %c0_144 = arith.constant 0 : index
    %145 = tpu.strided_load %arg21[%c0_143, %c0_144] {strides = array<i32: 2, 1>} : memref<13x32xf32, #tpu.memory_space<vmem>>, vector<5x32xf32>
    %c1_145 = arith.constant 1 : index
    %c0_146 = arith.constant 0 : index
    %146 = tpu.strided_load %arg21[%c1_145, %c0_146] {strides = array<i32: 2, 1>} : memref<13x32xf32, #tpu.memory_space<vmem>>, vector<5x32xf32>
    %147 = arith.maximumf %145, %146 : vector<5x32xf32>
    %c2_147 = arith.constant 2 : index
    %c0_148 = arith.constant 0 : index
    %148 = tpu.strided_load %arg21[%c2_147, %c0_148] {strides = array<i32: 2, 1>} : memref<13x32xf32, #tpu.memory_space<vmem>>, vector<5x32xf32>
    %149 = arith.maximumf %147, %148 : vector<5x32xf32>
    %c3_149 = arith.constant 3 : index
    %c0_150 = arith.constant 0 : index
    %150 = tpu.strided_load %arg21[%c3_149, %c0_150] {strides = array<i32: 2, 1>} : memref<13x32xf32, #tpu.memory_space<vmem>>, vector<5x32xf32>
    %151 = arith.maximumf %149, %150 : vector<5x32xf32>
    %c4_151 = arith.constant 4 : index
    %c0_152 = arith.constant 0 : index
    %152 = tpu.strided_load %arg21[%c4_151, %c0_152] {strides = array<i32: 2, 1>} : memref<13x32xf32, #tpu.memory_space<vmem>>, vector<5x32xf32>
    %153 = arith.maximumf %151, %152 : vector<5x32xf32>
    %cst_153 = arith.constant dense<0.000000e+00> : vector<32xf32>
    %154 = vector.multi_reduction <add>, %153, %cst_153 [0] : vector<5x32xf32> to vector<32xf32>
    %155 = vector.shape_cast %154 : vector<32xf32> to vector<1x32xf32>
    %cst_154 = arith.constant 5.000000e+00 : f32
    %156 = vector.broadcast %cst_154 : f32 to vector<1x32xf32>
    %157 = arith.divf %155, %156 : vector<1x32xf32>
    %c0_155 = arith.constant 0 : index
    %c0_156 = arith.constant 0 : index
    %c0_157 = arith.constant 0 : index
    %158 = vector.load %arg15[%c0_155, %c0_156, %c0_157] : memref<1x1x32xf32, #tpu.memory_space<vmem>>, vector<1x1x32xf32>
    %159 = vector.shape_cast %158 : vector<1x1x32xf32> to vector<1x32xf32>
    %160 = vector.shape_cast %157 : vector<1x32xf32> to vector<1x1x32xf32>
    tpu.vector_store %arg15[%c0_155, %c0_156, %c0_157], %160 {strides = array<i32>} : memref<1x1x32xf32, #tpu.memory_space<vmem>>, vector<1x1x32xf32>,
    return
  }
  func.func @transform_0(%arg0: i32) -> (i32, i32, i32) {
    %c0_i32 = arith.constant 0 : i32
    %c0_i32_0 = arith.constant 0 : i32
    %c0_i32_1 = arith.constant 0 : i32
    return %arg0, %c0_i32, %c0_i32_0 : i32, i32, i32
  }
  func.func @transform_1(%arg0: i32) -> (i32, i32) {
    %c0_i32 = arith.constant 0 : i32
    %c0_i32_0 = arith.constant 0 : i32
    %c0_i32_1 = arith.constant 0 : i32
    return %c0_i32, %c0_i32_0 : i32, i32
  }
  func.func @transform_2(%arg0: i32) -> (i32, i32) {
    %c0_i32 = arith.constant 0 : i32
    %c0_i32_0 = arith.constant 0 : i32
    %c0_i32_1 = arith.constant 0 : i32
    return %c0_i32, %c0_i32_0 : i32, i32
  }
  func.func @transform_3(%arg0: i32) -> (i32, i32) {
    %c0_i32 = arith.constant 0 : i32
    %c0_i32_0 = arith.constant 0 : i32
    %c0_i32_1 = arith.constant 0 : i32
    return %c0_i32, %c0_i32_0 : i32, i32
  }
  func.func @transform_4(%arg0: i32) -> (i32, i32, i32) {
    %c0_i32 = arith.constant 0 : i32
    %c0_i32_0 = arith.constant 0 : i32
    %c0_i32_1 = arith.constant 0 : i32
    %c0_i32_2 = arith.constant 0 : i32
    return %c0_i32, %c0_i32_0, %c0_i32_1 : i32, i32, i32
  }
  func.func @transform_5(%arg0: i32) -> (i32, i32) {
    %c0_i32 = arith.constant 0 : i32
    %c0_i32_0 = arith.constant 0 : i32
    %c0_i32_1 = arith.constant 0 : i32
    return %c0_i32, %c0_i32_0 : i32, i32
  }
  func.func @transform_6(%arg0: i32) -> (i32, i32) {
    %c0_i32 = arith.constant 0 : i32
    %c0_i32_0 = arith.constant 0 : i32
    %c0_i32_1 = arith.constant 0 : i32
    return %c0_i32, %c0_i32_0 : i32, i32
  }
  func.func @transform_7(%arg0: i32) -> (i32, i32) {
    %c0_i32 = arith.constant 0 : i32
    %c0_i32_0 = arith.constant 0 : i32
    %c0_i32_1 = arith.constant 0 : i32
    return %c0_i32, %c0_i32_0 : i32, i32
  }
  func.func @transform_8(%arg0: i32) -> (i32, i32) {
    %c0_i32 = arith.constant 0 : i32
    %c0_i32_0 = arith.constant 0 : i32
    %c0_i32_1 = arith.constant 0 : i32
    return %c0_i32, %c0_i32_0 : i32, i32
  }
  func.func @transform_9(%arg0: i32) -> (i32, i32, i32) {
    %c0_i32 = arith.constant 0 : i32
    %c0_i32_0 = arith.constant 0 : i32
    %c0_i32_1 = arith.constant 0 : i32
    %c0_i32_2 = arith.constant 0 : i32
    return %c0_i32, %c0_i32_0, %c0_i32_1 : i32, i32, i32
  }
  func.func @transform_10(%arg0: i32) -> (i32, i32) {
    %c0_i32 = arith.constant 0 : i32
    %c0_i32_0 = arith.constant 0 : i32
    %c0_i32_1 = arith.constant 0 : i32
    return %c0_i32, %c0_i32_0 : i32, i32
  }
  func.func @transform_11(%arg0: i32) -> (i32, i32) {
    %c0_i32 = arith.constant 0 : i32
    %c0_i32_0 = arith.constant 0 : i32
    %c0_i32_1 = arith.constant 0 : i32
    return %c0_i32, %c0_i32_0 : i32, i32
  }
  func.func @transform_12(%arg0: i32) -> (i32, i32) {
    %c0_i32 = arith.constant 0 : i32
    %c0_i32_0 = arith.constant 0 : i32
    %c0_i32_1 = arith.constant 0 : i32
    return %c0_i32, %c0_i32_0 : i32, i32
  }
  func.func @transform_13(%arg0: i32) -> (i32, i32) {
    %c0_i32 = arith.constant 0 : i32
    %c0_i32_0 = arith.constant 0 : i32
    %c0_i32_1 = arith.constant 0 : i32
    return %c0_i32, %c0_i32_0 : i32, i32
  }
  func.func @transform_14(%arg0: i32) -> (i32, i32, i32) {
    %c0_i32 = arith.constant 0 : i32
    %c0_i32_0 = arith.constant 0 : i32
    %c0_i32_1 = arith.constant 0 : i32
    return %arg0, %c0_i32, %c0_i32_0 : i32, i32, i32
  }
}

module attributes {stable_mosaic.version = 11 : i64} {
  func.func @kernel(%arg0: i32, %arg1: memref<1x32x12xf32, #tpu.memory_space<vmem>>, %arg2: memref<5x12x32xf32, #tpu.memory_space<vmem>>, %arg3: memref<1x32xf32, #tpu.memory_space<vmem>>, %arg4: memref<1x32xf32, #tpu.memory_space<vmem>>, %arg5: memref<5x32x64xf32, #tpu.memory_space<vmem>>, %arg6: memref<1x64xf32, #tpu.memory_space<vmem>>, %arg7: memref<1x64xf32, #tpu.memory_space<vmem>>, %arg8: memref<32x64xf32, #tpu.memory_space<vmem>>, %arg9: memref<1x64xf32, #tpu.memory_space<vmem>>, %arg10: memref<5x64x128xf32, #tpu.memory_space<vmem>>, %arg11: memref<1x128xf32, #tpu.memory_space<vmem>>, %arg12: memref<1x128xf32, #tpu.memory_space<vmem>>, %arg13: memref<64x128xf32, #tpu.memory_space<vmem>>, %arg14: memref<1x128xf32, #tpu.memory_space<vmem>>, %arg15: memref<128x512xf32, #tpu.memory_space<vmem>>, %arg16: memref<1x512xf32, #tpu.memory_space<vmem>>, %arg17: memref<512x2xf32, #tpu.memory_space<vmem>>, %arg18: memref<1x2xf32, #tpu.memory_space<vmem>>, %arg19: memref<1x1x2xf32, #tpu.memory_space<vmem>>, %arg20: memref<36x12xf32, #tpu.memory_space<vmem>>, %arg21: memref<32x32xf32, #tpu.memory_space<vmem>>, %arg22: memref<18x32xf32, #tpu.memory_space<vmem>>, %arg23: memref<14x64xf32, #tpu.memory_space<vmem>>, %arg24: memref<9x64xf32, #tpu.memory_space<vmem>>, %arg25: memref<5x128xf32, #tpu.memory_space<vmem>>) attributes {dimension_semantics = [#tpu.dimension_semantics<parallel>], iteration_bounds = array<i64: 2>, scalar_prefetch = 0 : i64, scratch_operands = 6 : i64, tpu.core_type = #tpu.core_type<tc>, window_params = [{transform_indices = @transform_0, window_bounds = array<i64: 1, 32, 12>}, {pipeline_mode = #tpu.pipeline_mode<synchronous>, transform_indices = @transform_1, window_bounds = array<i64: 5, 12, 32>}, {pipeline_mode = #tpu.pipeline_mode<synchronous>, transform_indices = @transform_2, window_bounds = array<i64: 1, 32>}, {pipeline_mode = #tpu.pipeline_mode<synchronous>, transform_indices = @transform_3, window_bounds = array<i64: 1, 32>}, {pipeline_mode = #tpu.pipeline_mode<synchronous>, transform_indices = @transform_4, window_bounds = array<i64: 5, 32, 64>}, {pipeline_mode = #tpu.pipeline_mode<synchronous>, transform_indices = @transform_5, window_bounds = array<i64: 1, 64>}, {pipeline_mode = #tpu.pipeline_mode<synchronous>, transform_indices = @transform_6, window_bounds = array<i64: 1, 64>}, {pipeline_mode = #tpu.pipeline_mode<synchronous>, transform_indices = @transform_7, window_bounds = array<i64: 32, 64>}, {pipeline_mode = #tpu.pipeline_mode<synchronous>, transform_indices = @transform_8, window_bounds = array<i64: 1, 64>}, {pipeline_mode = #tpu.pipeline_mode<synchronous>, transform_indices = @transform_9, window_bounds = array<i64: 5, 64, 128>}, {pipeline_mode = #tpu.pipeline_mode<synchronous>, transform_indices = @transform_10, window_bounds = array<i64: 1, 128>}, {pipeline_mode = #tpu.pipeline_mode<synchronous>, transform_indices = @transform_11, window_bounds = array<i64: 1, 128>}, {pipeline_mode = #tpu.pipeline_mode<synchronous>, transform_indices = @transform_12, window_bounds = array<i64: 64, 128>}, {pipeline_mode = #tpu.pipeline_mode<synchronous>, transform_indices = @transform_13, window_bounds = array<i64: 1, 128>}, {pipeline_mode = #tpu.pipeline_mode<synchronous>, transform_indices = @transform_14, window_bounds = array<i64: 128, 512>}, {pipeline_mode = #tpu.pipeline_mode<synchronous>, transform_indices = @transform_15, window_bounds = array<i64: 1, 512>}, {pipeline_mode = #tpu.pipeline_mode<synchronous>, transform_indices = @transform_16, window_bounds = array<i64: 512, 2>}, {pipeline_mode = #tpu.pipeline_mode<synchronous>, transform_indices = @transform_17, window_bounds = array<i64: 1, 2>}, {transform_indices = @transform_18, window_bounds = array<i64: 1, 1, 2>}]} {
    %c0 = arith.constant 0 : index
    %c0_0 = arith.constant 0 : index
    %c0_1 = arith.constant 0 : index
    %0 = vector.load %arg1[%c0, %c0_0, %c0_1] : memref<1x32x12xf32, #tpu.memory_space<vmem>>, vector<1x32x12xf32>
    %1 = vector.shape_cast %0 : vector<1x32x12xf32> to vector<32x12xf32>
    %cst = arith.constant 0.000000e+00 : f32
    %2 = vector.broadcast %cst : f32 to vector<36x12xf32>
    %c0_2 = arith.constant 0 : index
    %c0_3 = arith.constant 0 : index
    %3 = vector.load %arg20[%c0_2, %c0_3] : memref<36x12xf32, #tpu.memory_space<vmem>>, vector<36x12xf32>
    tpu.vector_store %arg20[%c0_2, %c0_3], %2 {strides = array<i32>} : memref<36x12xf32, #tpu.memory_space<vmem>>, vector<36x12xf32>,
    %c2 = arith.constant 2 : index
    %c0_4 = arith.constant 0 : index
    %4 = vector.load %arg20[%c2, %c0_4] : memref<36x12xf32, #tpu.memory_space<vmem>>, vector<32x12xf32>
    tpu.vector_store %arg20[%c2, %c0_4], %1 {strides = array<i32>} : memref<36x12xf32, #tpu.memory_space<vmem>>, vector<32x12xf32>,
    %c0_5 = arith.constant 0 : index
    %c0_6 = arith.constant 0 : index
    %5 = vector.load %arg20[%c0_5, %c0_6] : memref<36x12xf32, #tpu.memory_space<vmem>>, vector<32x12xf32>
    %c0_7 = arith.constant 0 : index
    %c0_8 = arith.constant 0 : index
    %c0_9 = arith.constant 0 : index
    %6 = vector.load %arg2[%c0_7, %c0_8, %c0_9] : memref<5x12x32xf32, #tpu.memory_space<vmem>>, vector<1x12x32xf32>
    %7 = vector.shape_cast %6 : vector<1x12x32xf32> to vector<12x32xf32>
    %cst_10 = arith.constant dense<0.000000e+00> : vector<32x32xf32>
    %8 = tpu.matmul %5, %7, %cst_10 {dimension_numbers = #tpu.dot_dimension_numbers<[1], [0], [0], [1], [0, 0, 1, 1], [], []>} : vector<32x12xf32>, vector<12x32xf32>, vector<32x32xf32> -> vector<32x32xf32>
    %c1 = arith.constant 1 : index
    %c0_11 = arith.constant 0 : index
    %9 = vector.load %arg20[%c1, %c0_11] : memref<36x12xf32, #tpu.memory_space<vmem>>, vector<32x12xf32>
    %c1_12 = arith.constant 1 : index
    %c0_13 = arith.constant 0 : index
    %c0_14 = arith.constant 0 : index
    %10 = vector.load %arg2[%c1_12, %c0_13, %c0_14] : memref<5x12x32xf32, #tpu.memory_space<vmem>>, vector<1x12x32xf32>
    %11 = vector.shape_cast %10 : vector<1x12x32xf32> to vector<12x32xf32>
    %cst_15 = arith.constant dense<0.000000e+00> : vector<32x32xf32>
    %12 = tpu.matmul %9, %11, %cst_15 {dimension_numbers = #tpu.dot_dimension_numbers<[1], [0], [0], [1], [0, 0, 1, 1], [], []>} : vector<32x12xf32>, vector<12x32xf32>, vector<32x32xf32> -> vector<32x32xf32>
    %13 = arith.addf %8, %12 : vector<32x32xf32>
    %c2_16 = arith.constant 2 : index
    %c0_17 = arith.constant 0 : index
    %14 = vector.load %arg20[%c2_16, %c0_17] : memref<36x12xf32, #tpu.memory_space<vmem>>, vector<32x12xf32>
    %c2_18 = arith.constant 2 : index
    %c0_19 = arith.constant 0 : index
    %c0_20 = arith.constant 0 : index
    %15 = vector.load %arg2[%c2_18, %c0_19, %c0_20] : memref<5x12x32xf32, #tpu.memory_space<vmem>>, vector<1x12x32xf32>
    %16 = vector.shape_cast %15 : vector<1x12x32xf32> to vector<12x32xf32>
    %cst_21 = arith.constant dense<0.000000e+00> : vector<32x32xf32>
    %17 = tpu.matmul %14, %16, %cst_21 {dimension_numbers = #tpu.dot_dimension_numbers<[1], [0], [0], [1], [0, 0, 1, 1], [], []>} : vector<32x12xf32>, vector<12x32xf32>, vector<32x32xf32> -> vector<32x32xf32>
    %18 = arith.addf %13, %17 : vector<32x32xf32>
    %c3 = arith.constant 3 : index
    %c0_22 = arith.constant 0 : index
    %19 = vector.load %arg20[%c3, %c0_22] : memref<36x12xf32, #tpu.memory_space<vmem>>, vector<32x12xf32>
    %c3_23 = arith.constant 3 : index
    %c0_24 = arith.constant 0 : index
    %c0_25 = arith.constant 0 : index
    %20 = vector.load %arg2[%c3_23, %c0_24, %c0_25] : memref<5x12x32xf32, #tpu.memory_space<vmem>>, vector<1x12x32xf32>
    %21 = vector.shape_cast %20 : vector<1x12x32xf32> to vector<12x32xf32>
    %cst_26 = arith.constant dense<0.000000e+00> : vector<32x32xf32>
    %22 = tpu.matmul %19, %21, %cst_26 {dimension_numbers = #tpu.dot_dimension_numbers<[1], [0], [0], [1], [0, 0, 1, 1], [], []>} : vector<32x12xf32>, vector<12x32xf32>, vector<32x32xf32> -> vector<32x32xf32>
    %23 = arith.addf %18, %22 : vector<32x32xf32>
    %c4 = arith.constant 4 : index
    %c0_27 = arith.constant 0 : index
    %24 = vector.load %arg20[%c4, %c0_27] : memref<36x12xf32, #tpu.memory_space<vmem>>, vector<32x12xf32>
    %c4_28 = arith.constant 4 : index
    %c0_29 = arith.constant 0 : index
    %c0_30 = arith.constant 0 : index
    %25 = vector.load %arg2[%c4_28, %c0_29, %c0_30] : memref<5x12x32xf32, #tpu.memory_space<vmem>>, vector<1x12x32xf32>
    %26 = vector.shape_cast %25 : vector<1x12x32xf32> to vector<12x32xf32>
    %cst_31 = arith.constant dense<0.000000e+00> : vector<32x32xf32>
    %27 = tpu.matmul %24, %26, %cst_31 {dimension_numbers = #tpu.dot_dimension_numbers<[1], [0], [0], [1], [0, 0, 1, 1], [], []>} : vector<32x12xf32>, vector<12x32xf32>, vector<32x32xf32> -> vector<32x32xf32>
    %28 = arith.addf %23, %27 : vector<32x32xf32>
    %c0_32 = arith.constant 0 : index
    %c0_33 = arith.constant 0 : index
    %29 = vector.load %arg3[%c0_32, %c0_33] : memref<1x32xf32, #tpu.memory_space<vmem>>, vector<1x32xf32>
    %30 = vector.broadcast %29 : vector<1x32xf32> to vector<32x32xf32>
    %31 = arith.mulf %28, %30 : vector<32x32xf32>
    %c0_34 = arith.constant 0 : index
    %c0_35 = arith.constant 0 : index
    %32 = vector.load %arg4[%c0_34, %c0_35] : memref<1x32xf32, #tpu.memory_space<vmem>>, vector<1x32xf32>
    %33 = vector.broadcast %32 : vector<1x32xf32> to vector<32x32xf32>
    %34 = arith.addf %31, %33 : vector<32x32xf32>
    %cst_36 = arith.constant 0.000000e+00 : f32
    %35 = vector.broadcast %cst_36 : f32 to vector<32x32xf32>
    %36 = arith.maximumf %34, %35 : vector<32x32xf32>
    %c0_37 = arith.constant 0 : index
    %c0_38 = arith.constant 0 : index
    %37 = vector.load %arg21[%c0_37, %c0_38] : memref<32x32xf32, #tpu.memory_space<vmem>>, vector<32x32xf32>
    tpu.vector_store %arg21[%c0_37, %c0_38], %36 {strides = array<i32>} : memref<32x32xf32, #tpu.memory_space<vmem>>, vector<32x32xf32>,
    %c0_39 = arith.constant 0 : index
    %c0_40 = arith.constant 0 : index
    %38 = tpu.strided_load %arg21[%c0_39, %c0_40] {strides = array<i32: 2, 1>} : memref<32x32xf32, #tpu.memory_space<vmem>>, vector<14x32xf32>
    %c1_41 = arith.constant 1 : index
    %c0_42 = arith.constant 0 : index
    %39 = tpu.strided_load %arg21[%c1_41, %c0_42] {strides = array<i32: 2, 1>} : memref<32x32xf32, #tpu.memory_space<vmem>>, vector<14x32xf32>
    %40 = arith.maximumf %38, %39 : vector<14x32xf32>
    %c2_43 = arith.constant 2 : index
    %c0_44 = arith.constant 0 : index
    %41 = tpu.strided_load %arg21[%c2_43, %c0_44] {strides = array<i32: 2, 1>} : memref<32x32xf32, #tpu.memory_space<vmem>>, vector<14x32xf32>
    %42 = arith.maximumf %40, %41 : vector<14x32xf32>
    %c3_45 = arith.constant 3 : index
    %c0_46 = arith.constant 0 : index
    %43 = tpu.strided_load %arg21[%c3_45, %c0_46] {strides = array<i32: 2, 1>} : memref<32x32xf32, #tpu.memory_space<vmem>>, vector<14x32xf32>
    %44 = arith.maximumf %42, %43 : vector<14x32xf32>
    %c4_47 = arith.constant 4 : index
    %c0_48 = arith.constant 0 : index
    %45 = tpu.strided_load %arg21[%c4_47, %c0_48] {strides = array<i32: 2, 1>} : memref<32x32xf32, #tpu.memory_space<vmem>>, vector<14x32xf32>
    %46 = arith.maximumf %44, %45 : vector<14x32xf32>
    %cst_49 = arith.constant 0.000000e+00 : f32
    %47 = vector.broadcast %cst_49 : f32 to vector<18x32xf32>
    %c0_50 = arith.constant 0 : index
    %c0_51 = arith.constant 0 : index
    %48 = vector.load %arg22[%c0_50, %c0_51] : memref<18x32xf32, #tpu.memory_space<vmem>>, vector<18x32xf32>
    tpu.vector_store %arg22[%c0_50, %c0_51], %47 {strides = array<i32>} : memref<18x32xf32, #tpu.memory_space<vmem>>, vector<18x32xf32>,
    %c2_52 = arith.constant 2 : index
    %c0_53 = arith.constant 0 : index
    %49 = vector.load %arg22[%c2_52, %c0_53] : memref<18x32xf32, #tpu.memory_space<vmem>>, vector<14x32xf32>
    tpu.vector_store %arg22[%c2_52, %c0_53], %46 {strides = array<i32>} : memref<18x32xf32, #tpu.memory_space<vmem>>, vector<14x32xf32>,
    %c0_54 = arith.constant 0 : index
    %c0_55 = arith.constant 0 : index
    %50 = vector.load %arg22[%c0_54, %c0_55] : memref<18x32xf32, #tpu.memory_space<vmem>>, vector<14x32xf32>
    %c0_56 = arith.constant 0 : index
    %c0_57 = arith.constant 0 : index
    %c0_58 = arith.constant 0 : index
    %51 = vector.load %arg5[%c0_56, %c0_57, %c0_58] : memref<5x32x64xf32, #tpu.memory_space<vmem>>, vector<1x32x64xf32>
    %52 = vector.shape_cast %51 : vector<1x32x64xf32> to vector<32x64xf32>
    %cst_59 = arith.constant dense<0.000000e+00> : vector<14x64xf32>
    %53 = tpu.matmul %50, %52, %cst_59 {dimension_numbers = #tpu.dot_dimension_numbers<[1], [0], [0], [1], [0, 0, 1, 1], [], []>} : vector<14x32xf32>, vector<32x64xf32>, vector<14x64xf32> -> vector<14x64xf32>
    %c1_60 = arith.constant 1 : index
    %c0_61 = arith.constant 0 : index
    %54 = vector.load %arg22[%c1_60, %c0_61] : memref<18x32xf32, #tpu.memory_space<vmem>>, vector<14x32xf32>
    %c1_62 = arith.constant 1 : index
    %c0_63 = arith.constant 0 : index
    %c0_64 = arith.constant 0 : index
    %55 = vector.load %arg5[%c1_62, %c0_63, %c0_64] : memref<5x32x64xf32, #tpu.memory_space<vmem>>, vector<1x32x64xf32>
    %56 = vector.shape_cast %55 : vector<1x32x64xf32> to vector<32x64xf32>
    %cst_65 = arith.constant dense<0.000000e+00> : vector<14x64xf32>
    %57 = tpu.matmul %54, %56, %cst_65 {dimension_numbers = #tpu.dot_dimension_numbers<[1], [0], [0], [1], [0, 0, 1, 1], [], []>} : vector<14x32xf32>, vector<32x64xf32>, vector<14x64xf32> -> vector<14x64xf32>
    %58 = arith.addf %53, %57 : vector<14x64xf32>
    %c2_66 = arith.constant 2 : index
    %c0_67 = arith.constant 0 : index
    %59 = vector.load %arg22[%c2_66, %c0_67] : memref<18x32xf32, #tpu.memory_space<vmem>>, vector<14x32xf32>
    %c2_68 = arith.constant 2 : index
    %c0_69 = arith.constant 0 : index
    %c0_70 = arith.constant 0 : index
    %60 = vector.load %arg5[%c2_68, %c0_69, %c0_70] : memref<5x32x64xf32, #tpu.memory_space<vmem>>, vector<1x32x64xf32>
    %61 = vector.shape_cast %60 : vector<1x32x64xf32> to vector<32x64xf32>
    %cst_71 = arith.constant dense<0.000000e+00> : vector<14x64xf32>
    %62 = tpu.matmul %59, %61, %cst_71 {dimension_numbers = #tpu.dot_dimension_numbers<[1], [0], [0], [1], [0, 0, 1, 1], [], []>} : vector<14x32xf32>, vector<32x64xf32>, vector<14x64xf32> -> vector<14x64xf32>
    %63 = arith.addf %58, %62 : vector<14x64xf32>
    %c3_72 = arith.constant 3 : index
    %c0_73 = arith.constant 0 : index
    %64 = vector.load %arg22[%c3_72, %c0_73] : memref<18x32xf32, #tpu.memory_space<vmem>>, vector<14x32xf32>
    %c3_74 = arith.constant 3 : index
    %c0_75 = arith.constant 0 : index
    %c0_76 = arith.constant 0 : index
    %65 = vector.load %arg5[%c3_74, %c0_75, %c0_76] : memref<5x32x64xf32, #tpu.memory_space<vmem>>, vector<1x32x64xf32>
    %66 = vector.shape_cast %65 : vector<1x32x64xf32> to vector<32x64xf32>
    %cst_77 = arith.constant dense<0.000000e+00> : vector<14x64xf32>
    %67 = tpu.matmul %64, %66, %cst_77 {dimension_numbers = #tpu.dot_dimension_numbers<[1], [0], [0], [1], [0, 0, 1, 1], [], []>} : vector<14x32xf32>, vector<32x64xf32>, vector<14x64xf32> -> vector<14x64xf32>
    %68 = arith.addf %63, %67 : vector<14x64xf32>
    %c4_78 = arith.constant 4 : index
    %c0_79 = arith.constant 0 : index
    %69 = vector.load %arg22[%c4_78, %c0_79] : memref<18x32xf32, #tpu.memory_space<vmem>>, vector<14x32xf32>
    %c4_80 = arith.constant 4 : index
    %c0_81 = arith.constant 0 : index
    %c0_82 = arith.constant 0 : index
    %70 = vector.load %arg5[%c4_80, %c0_81, %c0_82] : memref<5x32x64xf32, #tpu.memory_space<vmem>>, vector<1x32x64xf32>
    %71 = vector.shape_cast %70 : vector<1x32x64xf32> to vector<32x64xf32>
    %cst_83 = arith.constant dense<0.000000e+00> : vector<14x64xf32>
    %72 = tpu.matmul %69, %71, %cst_83 {dimension_numbers = #tpu.dot_dimension_numbers<[1], [0], [0], [1], [0, 0, 1, 1], [], []>} : vector<14x32xf32>, vector<32x64xf32>, vector<14x64xf32> -> vector<14x64xf32>
    %73 = arith.addf %68, %72 : vector<14x64xf32>
    %c0_84 = arith.constant 0 : index
    %c0_85 = arith.constant 0 : index
    %74 = vector.load %arg6[%c0_84, %c0_85] : memref<1x64xf32, #tpu.memory_space<vmem>>, vector<1x64xf32>
    %75 = vector.broadcast %74 : vector<1x64xf32> to vector<14x64xf32>
    %76 = arith.mulf %73, %75 : vector<14x64xf32>
    %c0_86 = arith.constant 0 : index
    %c0_87 = arith.constant 0 : index
    %77 = vector.load %arg7[%c0_86, %c0_87] : memref<1x64xf32, #tpu.memory_space<vmem>>, vector<1x64xf32>
    %78 = vector.broadcast %77 : vector<1x64xf32> to vector<14x64xf32>
    %79 = arith.addf %76, %78 : vector<14x64xf32>
    %cst_88 = arith.constant 0.000000e+00 : f32
    %80 = vector.broadcast %cst_88 : f32 to vector<14x64xf32>
    %81 = arith.maximumf %79, %80 : vector<14x64xf32>
    %c0_89 = arith.constant 0 : index
    %c0_90 = arith.constant 0 : index
    %82 = vector.load %arg8[%c0_89, %c0_90] : memref<32x64xf32, #tpu.memory_space<vmem>>, vector<32x64xf32>
    %cst_91 = arith.constant dense<0.000000e+00> : vector<14x64xf32>
    %83 = tpu.matmul %46, %82, %cst_91 {dimension_numbers = #tpu.dot_dimension_numbers<[1], [0], [0], [1], [0, 0, 1, 1], [], []>} : vector<14x32xf32>, vector<32x64xf32>, vector<14x64xf32> -> vector<14x64xf32>
    %c0_92 = arith.constant 0 : index
    %c0_93 = arith.constant 0 : index
    %84 = vector.load %arg9[%c0_92, %c0_93] : memref<1x64xf32, #tpu.memory_space<vmem>>, vector<1x64xf32>
    %85 = vector.broadcast %84 : vector<1x64xf32> to vector<14x64xf32>
    %86 = arith.addf %83, %85 : vector<14x64xf32>
    %87 = arith.addf %86, %81 : vector<14x64xf32>
    %c0_94 = arith.constant 0 : index
    %c0_95 = arith.constant 0 : index
    %88 = vector.load %arg23[%c0_94, %c0_95] : memref<14x64xf32, #tpu.memory_space<vmem>>, vector<14x64xf32>
    tpu.vector_store %arg23[%c0_94, %c0_95], %87 {strides = array<i32>} : memref<14x64xf32, #tpu.memory_space<vmem>>, vector<14x64xf32>,
    %c0_96 = arith.constant 0 : index
    %c0_97 = arith.constant 0 : index
    %89 = tpu.strided_load %arg23[%c0_96, %c0_97] {strides = array<i32: 2, 1>} : memref<14x64xf32, #tpu.memory_space<vmem>>, vector<5x64xf32>
    %c1_98 = arith.constant 1 : index
    %c0_99 = arith.constant 0 : index
    %90 = tpu.strided_load %arg23[%c1_98, %c0_99] {strides = array<i32: 2, 1>} : memref<14x64xf32, #tpu.memory_space<vmem>>, vector<5x64xf32>
    %91 = arith.maximumf %89, %90 : vector<5x64xf32>
    %c2_100 = arith.constant 2 : index
    %c0_101 = arith.constant 0 : index
    %92 = tpu.strided_load %arg23[%c2_100, %c0_101] {strides = array<i32: 2, 1>} : memref<14x64xf32, #tpu.memory_space<vmem>>, vector<5x64xf32>
    %93 = arith.maximumf %91, %92 : vector<5x64xf32>
    %c3_102 = arith.constant 3 : index
    %c0_103 = arith.constant 0 : index
    %94 = tpu.strided_load %arg23[%c3_102, %c0_103] {strides = array<i32: 2, 1>} : memref<14x64xf32, #tpu.memory_space<vmem>>, vector<5x64xf32>
    %95 = arith.maximumf %93, %94 : vector<5x64xf32>
    %c4_104 = arith.constant 4 : index
    %c0_105 = arith.constant 0 : index
    %96 = tpu.strided_load %arg23[%c4_104, %c0_105] {strides = array<i32: 2, 1>} : memref<14x64xf32, #tpu.memory_space<vmem>>, vector<5x64xf32>
    %97 = arith.maximumf %95, %96 : vector<5x64xf32>
    %cst_106 = arith.constant 0.000000e+00 : f32
    %98 = vector.broadcast %cst_106 : f32 to vector<9x64xf32>
    %c0_107 = arith.constant 0 : index
    %c0_108 = arith.constant 0 : index
    %99 = vector.load %arg24[%c0_107, %c0_108] : memref<9x64xf32, #tpu.memory_space<vmem>>, vector<9x64xf32>
    tpu.vector_store %arg24[%c0_107, %c0_108], %98 {strides = array<i32>} : memref<9x64xf32, #tpu.memory_space<vmem>>, vector<9x64xf32>,
    %c2_109 = arith.constant 2 : index
    %c0_110 = arith.constant 0 : index
    %100 = vector.load %arg24[%c2_109, %c0_110] : memref<9x64xf32, #tpu.memory_space<vmem>>, vector<5x64xf32>
    tpu.vector_store %arg24[%c2_109, %c0_110], %97 {strides = array<i32>} : memref<9x64xf32, #tpu.memory_space<vmem>>, vector<5x64xf32>,
    %c0_111 = arith.constant 0 : index
    %c0_112 = arith.constant 0 : index
    %101 = vector.load %arg24[%c0_111, %c0_112] : memref<9x64xf32, #tpu.memory_space<vmem>>, vector<5x64xf32>
    %c0_113 = arith.constant 0 : index
    %c0_114 = arith.constant 0 : index
    %c0_115 = arith.constant 0 : index
    %102 = vector.load %arg10[%c0_113, %c0_114, %c0_115] : memref<5x64x128xf32, #tpu.memory_space<vmem>>, vector<1x64x128xf32>
    %103 = vector.shape_cast %102 : vector<1x64x128xf32> to vector<64x128xf32>
    %cst_116 = arith.constant dense<0.000000e+00> : vector<5x128xf32>
    %104 = tpu.matmul %101, %103, %cst_116 {dimension_numbers = #tpu.dot_dimension_numbers<[1], [0], [0], [1], [0, 0, 1, 1], [], []>} : vector<5x64xf32>, vector<64x128xf32>, vector<5x128xf32> -> vector<5x128xf32>
    %c1_117 = arith.constant 1 : index
    %c0_118 = arith.constant 0 : index
    %105 = vector.load %arg24[%c1_117, %c0_118] : memref<9x64xf32, #tpu.memory_space<vmem>>, vector<5x64xf32>
    %c1_119 = arith.constant 1 : index
    %c0_120 = arith.constant 0 : index
    %c0_121 = arith.constant 0 : index
    %106 = vector.load %arg10[%c1_119, %c0_120, %c0_121] : memref<5x64x128xf32, #tpu.memory_space<vmem>>, vector<1x64x128xf32>
    %107 = vector.shape_cast %106 : vector<1x64x128xf32> to vector<64x128xf32>
    %cst_122 = arith.constant dense<0.000000e+00> : vector<5x128xf32>
    %108 = tpu.matmul %105, %107, %cst_122 {dimension_numbers = #tpu.dot_dimension_numbers<[1], [0], [0], [1], [0, 0, 1, 1], [], []>} : vector<5x64xf32>, vector<64x128xf32>, vector<5x128xf32> -> vector<5x128xf32>
    %109 = arith.addf %104, %108 : vector<5x128xf32>
    %c2_123 = arith.constant 2 : index
    %c0_124 = arith.constant 0 : index
    %110 = vector.load %arg24[%c2_123, %c0_124] : memref<9x64xf32, #tpu.memory_space<vmem>>, vector<5x64xf32>
    %c2_125 = arith.constant 2 : index
    %c0_126 = arith.constant 0 : index
    %c0_127 = arith.constant 0 : index
    %111 = vector.load %arg10[%c2_125, %c0_126, %c0_127] : memref<5x64x128xf32, #tpu.memory_space<vmem>>, vector<1x64x128xf32>
    %112 = vector.shape_cast %111 : vector<1x64x128xf32> to vector<64x128xf32>
    %cst_128 = arith.constant dense<0.000000e+00> : vector<5x128xf32>
    %113 = tpu.matmul %110, %112, %cst_128 {dimension_numbers = #tpu.dot_dimension_numbers<[1], [0], [0], [1], [0, 0, 1, 1], [], []>} : vector<5x64xf32>, vector<64x128xf32>, vector<5x128xf32> -> vector<5x128xf32>
    %114 = arith.addf %109, %113 : vector<5x128xf32>
    %c3_129 = arith.constant 3 : index
    %c0_130 = arith.constant 0 : index
    %115 = vector.load %arg24[%c3_129, %c0_130] : memref<9x64xf32, #tpu.memory_space<vmem>>, vector<5x64xf32>
    %c3_131 = arith.constant 3 : index
    %c0_132 = arith.constant 0 : index
    %c0_133 = arith.constant 0 : index
    %116 = vector.load %arg10[%c3_131, %c0_132, %c0_133] : memref<5x64x128xf32, #tpu.memory_space<vmem>>, vector<1x64x128xf32>
    %117 = vector.shape_cast %116 : vector<1x64x128xf32> to vector<64x128xf32>
    %cst_134 = arith.constant dense<0.000000e+00> : vector<5x128xf32>
    %118 = tpu.matmul %115, %117, %cst_134 {dimension_numbers = #tpu.dot_dimension_numbers<[1], [0], [0], [1], [0, 0, 1, 1], [], []>} : vector<5x64xf32>, vector<64x128xf32>, vector<5x128xf32> -> vector<5x128xf32>
    %119 = arith.addf %114, %118 : vector<5x128xf32>
    %c4_135 = arith.constant 4 : index
    %c0_136 = arith.constant 0 : index
    %120 = vector.load %arg24[%c4_135, %c0_136] : memref<9x64xf32, #tpu.memory_space<vmem>>, vector<5x64xf32>
    %c4_137 = arith.constant 4 : index
    %c0_138 = arith.constant 0 : index
    %c0_139 = arith.constant 0 : index
    %121 = vector.load %arg10[%c4_137, %c0_138, %c0_139] : memref<5x64x128xf32, #tpu.memory_space<vmem>>, vector<1x64x128xf32>
    %122 = vector.shape_cast %121 : vector<1x64x128xf32> to vector<64x128xf32>
    %cst_140 = arith.constant dense<0.000000e+00> : vector<5x128xf32>
    %123 = tpu.matmul %120, %122, %cst_140 {dimension_numbers = #tpu.dot_dimension_numbers<[1], [0], [0], [1], [0, 0, 1, 1], [], []>} : vector<5x64xf32>, vector<64x128xf32>, vector<5x128xf32> -> vector<5x128xf32>
    %124 = arith.addf %119, %123 : vector<5x128xf32>
    %c0_141 = arith.constant 0 : index
    %c0_142 = arith.constant 0 : index
    %125 = vector.load %arg11[%c0_141, %c0_142] : memref<1x128xf32, #tpu.memory_space<vmem>>, vector<1x128xf32>
    %126 = vector.broadcast %125 : vector<1x128xf32> to vector<5x128xf32>
    %127 = arith.mulf %124, %126 : vector<5x128xf32>
    %c0_143 = arith.constant 0 : index
    %c0_144 = arith.constant 0 : index
    %128 = vector.load %arg12[%c0_143, %c0_144] : memref<1x128xf32, #tpu.memory_space<vmem>>, vector<1x128xf32>
    %129 = vector.broadcast %128 : vector<1x128xf32> to vector<5x128xf32>
    %130 = arith.addf %127, %129 : vector<5x128xf32>
    %cst_145 = arith.constant 0.000000e+00 : f32
    %131 = vector.broadcast %cst_145 : f32 to vector<5x128xf32>
    %132 = arith.maximumf %130, %131 : vector<5x128xf32>
    %c0_146 = arith.constant 0 : index
    %c0_147 = arith.constant 0 : index
    %133 = vector.load %arg13[%c0_146, %c0_147] : memref<64x128xf32, #tpu.memory_space<vmem>>, vector<64x128xf32>
    %cst_148 = arith.constant dense<0.000000e+00> : vector<5x128xf32>
    %134 = tpu.matmul %97, %133, %cst_148 {dimension_numbers = #tpu.dot_dimension_numbers<[1], [0], [0], [1], [0, 0, 1, 1], [], []>} : vector<5x64xf32>, vector<64x128xf32>, vector<5x128xf32> -> vector<5x128xf32>
    %c0_149 = arith.constant 0 : index
    %c0_150 = arith.constant 0 : index
    %135 = vector.load %arg14[%c0_149, %c0_150] : memref<1x128xf32, #tpu.memory_space<vmem>>, vector<1x128xf32>
    %136 = vector.broadcast %135 : vector<1x128xf32> to vector<5x128xf32>
    %137 = arith.addf %134, %136 : vector<5x128xf32>
    %138 = arith.addf %137, %132 : vector<5x128xf32>
    %c0_151 = arith.constant 0 : index
    %c0_152 = arith.constant 0 : index
    %139 = vector.load %arg25[%c0_151, %c0_152] : memref<5x128xf32, #tpu.memory_space<vmem>>, vector<5x128xf32>
    tpu.vector_store %arg25[%c0_151, %c0_152], %138 {strides = array<i32>} : memref<5x128xf32, #tpu.memory_space<vmem>>, vector<5x128xf32>,
    %c0_153 = arith.constant 0 : index
    %c0_154 = arith.constant 0 : index
    %140 = tpu.strided_load %arg25[%c0_153, %c0_154] {strides = array<i32: 2, 1>} : memref<5x128xf32, #tpu.memory_space<vmem>>, vector<1x128xf32>
    %c1_155 = arith.constant 1 : index
    %c0_156 = arith.constant 0 : index
    %141 = tpu.strided_load %arg25[%c1_155, %c0_156] {strides = array<i32: 2, 1>} : memref<5x128xf32, #tpu.memory_space<vmem>>, vector<1x128xf32>
    %142 = arith.maximumf %140, %141 : vector<1x128xf32>
    %c2_157 = arith.constant 2 : index
    %c0_158 = arith.constant 0 : index
    %143 = tpu.strided_load %arg25[%c2_157, %c0_158] {strides = array<i32: 2, 1>} : memref<5x128xf32, #tpu.memory_space<vmem>>, vector<1x128xf32>
    %144 = arith.maximumf %142, %143 : vector<1x128xf32>
    %c3_159 = arith.constant 3 : index
    %c0_160 = arith.constant 0 : index
    %145 = tpu.strided_load %arg25[%c3_159, %c0_160] {strides = array<i32: 2, 1>} : memref<5x128xf32, #tpu.memory_space<vmem>>, vector<1x128xf32>
    %146 = arith.maximumf %144, %145 : vector<1x128xf32>
    %c4_161 = arith.constant 4 : index
    %c0_162 = arith.constant 0 : index
    %147 = tpu.strided_load %arg25[%c4_161, %c0_162] {strides = array<i32: 2, 1>} : memref<5x128xf32, #tpu.memory_space<vmem>>, vector<1x128xf32>
    %148 = arith.maximumf %146, %147 : vector<1x128xf32>
    %cst_163 = arith.constant dense<0.000000e+00> : vector<128xf32>
    %149 = vector.multi_reduction <add>, %148, %cst_163 [0] : vector<1x128xf32> to vector<128xf32>
    %150 = vector.shape_cast %149 : vector<128xf32> to vector<1x128xf32>
    %cst_164 = arith.constant 1.000000e+00 : f32
    %151 = vector.broadcast %cst_164 : f32 to vector<1x128xf32>
    %152 = arith.divf %150, %151 : vector<1x128xf32>
    %c0_165 = arith.constant 0 : index
    %c0_166 = arith.constant 0 : index
    %153 = vector.load %arg15[%c0_165, %c0_166] : memref<128x512xf32, #tpu.memory_space<vmem>>, vector<128x512xf32>
    %cst_167 = arith.constant dense<0.000000e+00> : vector<1x512xf32>
    %154 = tpu.matmul %152, %153, %cst_167 {dimension_numbers = #tpu.dot_dimension_numbers<[1], [0], [0], [1], [0, 0, 1, 1], [], []>} : vector<1x128xf32>, vector<128x512xf32>, vector<1x512xf32> -> vector<1x512xf32>
    %c0_168 = arith.constant 0 : index
    %c0_169 = arith.constant 0 : index
    %155 = vector.load %arg16[%c0_168, %c0_169] : memref<1x512xf32, #tpu.memory_space<vmem>>, vector<1x512xf32>
    %156 = arith.addf %154, %155 : vector<1x512xf32>
    %c0_170 = arith.constant 0 : index
    %c0_171 = arith.constant 0 : index
    %157 = vector.load %arg17[%c0_170, %c0_171] : memref<512x2xf32, #tpu.memory_space<vmem>>, vector<512x2xf32>
    %cst_172 = arith.constant dense<0.000000e+00> : vector<1x2xf32>
    %158 = tpu.matmul %156, %157, %cst_172 {dimension_numbers = #tpu.dot_dimension_numbers<[1], [0], [0], [1], [0, 0, 1, 1], [], []>} : vector<1x512xf32>, vector<512x2xf32>, vector<1x2xf32> -> vector<1x2xf32>
    %c0_173 = arith.constant 0 : index
    %c0_174 = arith.constant 0 : index
    %159 = vector.load %arg18[%c0_173, %c0_174] : memref<1x2xf32, #tpu.memory_space<vmem>>, vector<1x2xf32>
    %160 = arith.addf %158, %159 : vector<1x2xf32>
    %c0_175 = arith.constant 0 : index
    %c0_176 = arith.constant 0 : index
    %c0_177 = arith.constant 0 : index
    %161 = vector.load %arg19[%c0_175, %c0_176, %c0_177] : memref<1x1x2xf32, #tpu.memory_space<vmem>>, vector<1x1x2xf32>
    %162 = vector.shape_cast %161 : vector<1x1x2xf32> to vector<1x2xf32>
    %163 = vector.shape_cast %160 : vector<1x2xf32> to vector<1x1x2xf32>
    tpu.vector_store %arg19[%c0_175, %c0_176, %c0_177], %163 {strides = array<i32>} : memref<1x1x2xf32, #tpu.memory_space<vmem>>, vector<1x1x2xf32>,
    return
  }
  func.func @transform_0(%arg0: i32) -> (i32, i32, i32) {
    %c0_i32 = arith.constant 0 : i32
    %c0_i32_0 = arith.constant 0 : i32
    %c0_i32_1 = arith.constant 0 : i32
    return %arg0, %c0_i32, %c0_i32_0 : i32, i32, i32
  }
  func.func @transform_1(%arg0: i32) -> (i32, i32, i32) {
    %c0_i32 = arith.constant 0 : i32
    %c0_i32_0 = arith.constant 0 : i32
    %c0_i32_1 = arith.constant 0 : i32
    %c0_i32_2 = arith.constant 0 : i32
    return %c0_i32, %c0_i32_0, %c0_i32_1 : i32, i32, i32
  }
  func.func @transform_2(%arg0: i32) -> (i32, i32) {
    %c0_i32 = arith.constant 0 : i32
    %c0_i32_0 = arith.constant 0 : i32
    %c0_i32_1 = arith.constant 0 : i32
    return %c0_i32, %c0_i32_0 : i32, i32
  }
  func.func @transform_3(%arg0: i32) -> (i32, i32) {
    %c0_i32 = arith.constant 0 : i32
    %c0_i32_0 = arith.constant 0 : i32
    %c0_i32_1 = arith.constant 0 : i32
    return %c0_i32, %c0_i32_0 : i32, i32
  }
  func.func @transform_4(%arg0: i32) -> (i32, i32, i32) {
    %c0_i32 = arith.constant 0 : i32
    %c0_i32_0 = arith.constant 0 : i32
    %c0_i32_1 = arith.constant 0 : i32
    %c0_i32_2 = arith.constant 0 : i32
    return %c0_i32, %c0_i32_0, %c0_i32_1 : i32, i32, i32
  }
  func.func @transform_5(%arg0: i32) -> (i32, i32) {
    %c0_i32 = arith.constant 0 : i32
    %c0_i32_0 = arith.constant 0 : i32
    %c0_i32_1 = arith.constant 0 : i32
    return %c0_i32, %c0_i32_0 : i32, i32
  }
  func.func @transform_6(%arg0: i32) -> (i32, i32) {
    %c0_i32 = arith.constant 0 : i32
    %c0_i32_0 = arith.constant 0 : i32
    %c0_i32_1 = arith.constant 0 : i32
    return %c0_i32, %c0_i32_0 : i32, i32
  }
  func.func @transform_7(%arg0: i32) -> (i32, i32) {
    %c0_i32 = arith.constant 0 : i32
    %c0_i32_0 = arith.constant 0 : i32
    %c0_i32_1 = arith.constant 0 : i32
    return %c0_i32, %c0_i32_0 : i32, i32
  }
  func.func @transform_8(%arg0: i32) -> (i32, i32) {
    %c0_i32 = arith.constant 0 : i32
    %c0_i32_0 = arith.constant 0 : i32
    %c0_i32_1 = arith.constant 0 : i32
    return %c0_i32, %c0_i32_0 : i32, i32
  }
  func.func @transform_9(%arg0: i32) -> (i32, i32, i32) {
    %c0_i32 = arith.constant 0 : i32
    %c0_i32_0 = arith.constant 0 : i32
    %c0_i32_1 = arith.constant 0 : i32
    %c0_i32_2 = arith.constant 0 : i32
    return %c0_i32, %c0_i32_0, %c0_i32_1 : i32, i32, i32
  }
  func.func @transform_10(%arg0: i32) -> (i32, i32) {
    %c0_i32 = arith.constant 0 : i32
    %c0_i32_0 = arith.constant 0 : i32
    %c0_i32_1 = arith.constant 0 : i32
    return %c0_i32, %c0_i32_0 : i32, i32
  }
  func.func @transform_11(%arg0: i32) -> (i32, i32) {
    %c0_i32 = arith.constant 0 : i32
    %c0_i32_0 = arith.constant 0 : i32
    %c0_i32_1 = arith.constant 0 : i32
    return %c0_i32, %c0_i32_0 : i32, i32
  }
  func.func @transform_12(%arg0: i32) -> (i32, i32) {
    %c0_i32 = arith.constant 0 : i32
    %c0_i32_0 = arith.constant 0 : i32
    %c0_i32_1 = arith.constant 0 : i32
    return %c0_i32, %c0_i32_0 : i32, i32
  }
  func.func @transform_13(%arg0: i32) -> (i32, i32) {
    %c0_i32 = arith.constant 0 : i32
    %c0_i32_0 = arith.constant 0 : i32
    %c0_i32_1 = arith.constant 0 : i32
    return %c0_i32, %c0_i32_0 : i32, i32
  }
  func.func @transform_14(%arg0: i32) -> (i32, i32) {
    %c0_i32 = arith.constant 0 : i32
    %c0_i32_0 = arith.constant 0 : i32
    %c0_i32_1 = arith.constant 0 : i32
    return %c0_i32, %c0_i32_0 : i32, i32
  }
  func.func @transform_15(%arg0: i32) -> (i32, i32) {
    %c0_i32 = arith.constant 0 : i32
    %c0_i32_0 = arith.constant 0 : i32
    %c0_i32_1 = arith.constant 0 : i32
    return %c0_i32, %c0_i32_0 : i32, i32
  }
  func.func @transform_16(%arg0: i32) -> (i32, i32) {
    %c0_i32 = arith.constant 0 : i32
    %c0_i32_0 = arith.constant 0 : i32
    %c0_i32_1 = arith.constant 0 : i32
    return %c0_i32, %c0_i32_0 : i32, i32
  }
  func.func @transform_17(%arg0: i32) -> (i32, i32) {
    %c0_i32 = arith.constant 0 : i32
    %c0_i32_0 = arith.constant 0 : i32
    %c0_i32_1 = arith.constant 0 : i32
    return %c0_i32, %c0_i32_0 : i32, i32
  }
  func.func @transform_18(%arg0: i32) -> (i32, i32, i32) {
    %c0_i32 = arith.constant 0 : i32
    %c0_i32_0 = arith.constant 0 : i32
    %c0_i32_1 = arith.constant 0 : i32
    return %arg0, %c0_i32, %c0_i32_0 : i32, i32, i32
  }
}

</mosaic_0001>

<bundles_post_ra>
// kernel: ecg12_forward.2
= control target key start
LH: loop header
LB: loop body
LE: loop exit
PB: predicated region body
PF: predicated region fallthrough
CT: control target
= control target key end

     0   :  { %s2576_s29 = smov 0   ;;  %s2905_s0 = inlined_call_operand.vmem [shape: f32[24,64,1], index: 0, kind: input, shape index: {}]   ;;  %s2906_s1 = inlined_call_operand.vmem [shape: f32[5,8], index: 1, kind: input, shape index: {}]   ;;  %s2907_s2 = inlined_call_operand.vmem [shape: f32[1,8], index: 2, kind: input, shape index: {}]   ;;  %s2908_s3 = inlined_call_operand.vmem [shape: f32[1,8], index: 3, kind: input, shape index: {}]   ;;  %s2909_s4 = inlined_call_operand.vmem [shape: f32[5,8,16], index: 4, kind: input, shape index: {}]   ;;  %s2910_s5 = inlined_call_operand.vmem [shape: f32[1,16], index: 5, kind: input, shape index: {}]   ;;  %s2911_s6 = inlined_call_operand.vmem [shape: f32[1,16], index: 6, kind: input, shape index: {}]   ;;  %s2912_s7 = inlined_call_operand.vmem [shape: f32[8,16], index: 7, kind: input, shape index: {}]   ;;  %s2913_s8 = inlined_call_operand.vmem [shape: f32[1,16], index: 8, kind: input, shape index: {}]   ;;  %s2914_s9 = inlined_call_operand.vmem [shape: f32[5,16,32], index: 9, kind: input, shape index: {}]   ;;  %s2915_s10 = inlined_call_operand.vmem [shape: f32[1,32], index: 10, kind: input, shape index: {}]   ;;  %s2916_s11 = inlined_call_operand.vmem [shape: f32[1,32], index: 11, kind: input, shape index: {}]   ;;  %s2917_s12 = inlined_call_operand.vmem [shape: f32[16,32], index: 12, kind: input, shape index: {}]   ;;  %s2918_s13 = inlined_call_operand.vmem [shape: f32[1,32], index: 13, kind: input, shape index: {}]   ;;  %s2919_s14 = inlined_call_operand.vmem [shape: f32[24,1,32], index: 14, kind: output, shape index: {}]  }
   0x1 LB: > { %s2264_s30 = sadd.s32 4294967295, %s2497_s29   ;;  %p2268_p0 = scmp.ge.s32.totalorder %s2497_s29, 1  ;;  %s2497_s29 = sphi %s2576_s29, %s24_s29  }
   0x2   : > { %p412_p1 = scmp.lt.s32.totalorder %s2497_s29, 25 }
   0x4   : > { %p413_p2 = pnand %p2268_p0, %p412_p1 }
   0x5   : > { %p2584_p3 = scmp.lt.s32.totalorder (!%p413_p2), %s2264_s30, 23 }
   0x6   : > { %416 = sbr.rel (%p413_p2) target bundleno = 754 (0x2f2), region = 76 }
   0xb   : > { %vm472_vm0 = vcmask 7168   ;;  %vm481_vm1 = vcmask 3072   ;;  %v2499_v0 = vmov 0   ;;  %v2500_v1 = vmov 0.0   ;;  %s2922_s30 = smov (!%p2584_p3, %s2264_s30), 23  ;;  %v2278_v50 = vld [vmem:[%s2909_s4 + $0x8] sm:$0xff] }
   0xc   : > { %2490 = vset.pattern.permute.xlu1 %v2499_v0  ;;  %2489 = vset.pattern.permute.xlu0 %v2499_v0  ;;  %473 = vst.msk [vmem:[#allocation2] sm:$0xff] %vm472_vm0, %v2500_v1  ;;  %474 = vst.msk [vmem:[#allocation2 + $0x8] sm:$0xff] %vm472_vm0, %v2500_v1  ;;  %s2334_s16 = sshll.u32 %s2922_s30, 6  ;;  %vm866_vm2 = vcmask 64512   ;;  %v945_v51 = vld [vmem:[%s2909_s4] sm:$0xff]  ;;  %v2638_v52 = vld [vmem:[%s2909_s4 + $0x10] sm:$0xff]  ;;  %s463_s28 = scalar_lea.vmem %s2919_s14, %s2922_s30 }
   0xd   : > { %475 = vst.msk [vmem:[#allocation2 + $0x10] sm:$0xff] %vm472_vm0, %v2500_v1  ;;  %476 = vst.msk [vmem:[#allocation2 + $0x18] sm:$0xff] %vm472_vm0, %v2500_v1  ;;  %s460_s19 = scalar_lea.vmem %s2905_s0, %s2334_s16  ;;  %2389 = vmatprep.subr.mxu0 %v2278_v50  ;;  %2397 = vmatprep.subr.mxu1 %v945_v51  ;;  %vm934_vm3 = vcmask 58368   ;;  %v2645_v53 = vld [vmem:[%s2909_s4 + $0x18] sm:$0xff]  ;;  %vm939_vm4 = vcmask 62464   ;;  %vm1602_vm5 = vcmask 130048  }
   0xe   : > { %477 = vst.msk [vmem:[#allocation2 + $0x20] sm:$0xff] %vm472_vm0, %v2500_v1  ;;  %478 = vst.msk [vmem:[#allocation2 + $0x28] sm:$0xff] %vm472_vm0, %v2500_v1  ;;  %v464_v2 = vld [vmem:[%s460_s19] sm:$0xff]  ;;  %v465_v3 = vld [vmem:[%s460_s19 + $0x8] sm:$0xff]  ;;  %2390 = vmatpush3.msra.mxu0 %v2278_v50  ;;  %2398 = vmatpush3.msra.mxu1 %v945_v51  ;;  %vm1637_vm6 = vcmask 122880   ;;  %vm1606_vm7 = vcmask 128000  }
   0xf   : > { %479 = vst.msk [vmem:[#allocation2 + $0x30] sm:$0xff] %vm472_vm0, %v2500_v1  ;;  %480 = vst.msk [vmem:[#allocation2 + $0x38] sm:$0xff] %vm472_vm0, %v2500_v1  ;;  %v466_v4 = vld [vmem:[%s460_s19 + $0x10] sm:$0xff]  ;;  %v467_v5 = vld [vmem:[%s460_s19 + $0x18] sm:$0xff]  ;;  %2405 = vmatprep.subr.mxu0 %v2638_v52  ;;  %2413 = vmatprep.subr.mxu1 %v2645_v53  ;;  %vm1640_vm8 = vcmask 126976   ;;  %vm2191_vm9 = vcmask 258048  }
  0x10   : > { %482 = vst.msk [vmem:[#allocation2 + $0x40] sm:$0xf] %vm481_vm1, %v2500_v1  ;;  %v468_v6 = vld [vmem:[%s460_s19 + $0x20] sm:$0xff]  ;;  %v469_v7 = vld [vmem:[%s460_s19 + $0x28] sm:$0xff]  ;;  %v470_v8 = vld [vmem:[%s460_s19 + $0x30] sm:$0xff]  ;;  %vm2189_vm10 = vcmask 261120  }
  0x11   : > { %483 = vst.msk [vmem:[#allocation2 + $0x2] sm:$0xff] %vm472_vm0, %v464_v2  ;;  %484 = vst.msk [vmem:[#allocation2 + $0xa] sm:$0xff] %vm472_vm0, %v465_v3  ;;  %v471_v9 = vld [vmem:[%s460_s19 + $0x38] sm:$0xff]  ;;  %vm2215_vm11 = vcmask 253952  }
  0x12   : > { %485 = vst.msk [vmem:[#allocation2 + $0x12] sm:$0xff] %vm472_vm0, %v466_v4  ;;  %486 = vst.msk [vmem:[#allocation2 + $0x1a] sm:$0xff] %vm472_vm0, %v467_v5 }
  0x13   : > { %487 = vst.msk [vmem:[#allocation2 + $0x22] sm:$0xff] %vm472_vm0, %v468_v6  ;;  %488 = vst.msk [vmem:[#allocation2 + $0x2a] sm:$0xff] %vm472_vm0, %v469_v7 }
  0x14   : > { %489 = vst.msk [vmem:[#allocation2 + $0x32] sm:$0xff] %vm472_vm0, %v470_v8  ;;  %490 = vst.msk [vmem:[#allocation2 + $0x3a] sm:$0xff] %vm472_vm0, %v471_v9 }
  0x15   : > { %930 = vst.msk [vmem:[#allocation4] sm:$0xff] %vm866_vm2, %v2500_v1  ;;  %931 = vst.msk [vmem:[#allocation4 + $0x8] sm:$0xff] %vm866_vm2, %v2500_v1 }
  0x16   : > { %932 = vst.msk [vmem:[#allocation4 + $0x10] sm:$0xff] %vm866_vm2, %v2500_v1  ;;  %933 = vst.msk [vmem:[#allocation4 + $0x18] sm:$0xff] %vm866_vm2, %v2500_v1 }
  0x17   : > { %935 = vst.msk [vmem:[#allocation4 + $0x20] sm:$0x3] %vm934_vm3, %v2500_v1 }
  0x18   : > { %v552_v10 = vld [vmem:[#allocation2 + $0x1] sm:$0xff]  ;;  %v553_v12 = vld [vmem:[#allocation2 + $0x9] sm:$0xff]  ;;  %1635 = vst.msk [vmem:[#allocation6] sm:$0xff] %vm1602_vm5, %v2500_v1  ;;  %1636 = vst.msk [vmem:[#allocation6 + $0x8] sm:$0xff] %vm1602_vm5, %v2500_v1 }
  0x19   : > { %v491_v11 = vld [vmem:[#allocation2] sm:$0xff]  ;;  %563 = vperm.xlu1 %2490, %v552_v10   ;;  %v492_v13 = vld [vmem:[#allocation2 + $0x8] sm:$0xff]  ;;  %v494_v14 = vld [vmem:[#allocation2 + $0x18] sm:$0xff]  ;;  %1638 = vst.msk [vmem:[#allocation6 + $0x10] sm:$0x1] %vm1637_vm6, %v2500_v1 }
  0x1a   : > { %502 = vperm.xlu0 %2489, %v491_v11   ;;  %v493_v15 = vld [vmem:[#allocation2 + $0x10] sm:$0xff]  ;;  %v555_v16 = vld [vmem:[#allocation2 + $0x19] sm:$0xff]  ;;  %v621_v19 = vld [vmem:[#allocation2 + $0x2] sm:$0xff] }
  0x1b   : > { %v554_v17 = vld [vmem:[#allocation2 + $0x11] sm:$0xff]  ;;  %v556_v20 = vld [vmem:[#allocation2 + $0x21] sm:$0xff]  ;;  %v557_v24 = vld [vmem:[#allocation2 + $0x29] sm:$0xff] }
  0x1c   : > { %v622_v18 = vld [vmem:[#allocation2 + $0xa] sm:$0xff]  ;;  %v495_v21 = vld [vmem:[#allocation2 + $0x20] sm:$0xff]  ;;  %v623_v23 = vld [vmem:[#allocation2 + $0x12] sm:$0xff] }
  0x1d   : > { %568 = vperm.xlu1 %2490, %v553_v12   ;;  %v624_v22 = vld [vmem:[#allocation2 + $0x1a] sm:$0xff]  ;;  %v496_v25 = vld [vmem:[#allocation2 + $0x28] sm:$0xff]  ;;  %v497_v29 = vld [vmem:[#allocation2 + $0x30] sm:$0xff] }
  0x1e   : > { %507 = vperm.xlu0 %2489, %v492_v13   ;;  %v691_v26 = vld [vmem:[#allocation2 + $0xb] sm:$0xff]  ;;  %v690_v27 = vld [vmem:[#allocation2 + $0x3] sm:$0xff]  ;;  %v498_v28 = vld [vmem:[#allocation2 + $0x38] sm:$0xff] }
  0x1f   : > { %v559_v30 = vld [vmem:[#allocation2 + $0x39] sm:$0xff]  ;;  %v558_v31 = vld [vmem:[#allocation2 + $0x31] sm:$0xff]  ;;  %v625_v33 = vld [vmem:[#allocation2 + $0x22] sm:$0xff] }
  0x20   : > { %v692_v32 = vld [vmem:[#allocation2 + $0x13] sm:$0xff]  ;;  %v626_v34 = vld [vmem:[#allocation2 + $0x2a] sm:$0xff]  ;;  %v693_v35 = vld [vmem:[#allocation2 + $0x1b] sm:$0xff] }
  0x21   : > { %517 = vperm.xlu1 %2490, %v494_v14   ;;  %v760_v36 = vld [vmem:[#allocation2 + $0xc] sm:$0xff]  ;;  %v759_v37 = vld [vmem:[#allocation2 + $0x4] sm:$0xff]  ;;  %v628_v38 = vld [vmem:[#allocation2 + $0x3a] sm:$0xff] }
  0x22   : > { %512 = vperm.xlu0 %2489, %v493_v15   ;;  %v627_v39 = vld [vmem:[#allocation2 + $0x32] sm:$0xff]  ;;  %v694_v41 = vld [vmem:[#allocation2 + $0x23] sm:$0xff]  ;;  %v697_v44 = vld [vmem:[#allocation2 + $0x3b] sm:$0xff] }
  0x23   : > { %v761_v40 = vld [vmem:[#allocation2 + $0x14] sm:$0xff]  ;;  %v695_v42 = vld [vmem:[#allocation2 + $0x2b] sm:$0xff]  ;;  %v762_v43 = vld [vmem:[#allocation2 + $0x1c] sm:$0xff] }
  0x24   : > { %v696_v45 = vld [vmem:[#allocation2 + $0x33] sm:$0xff]  ;;  %v763_v47 = vld [vmem:[#allocation2 + $0x24] sm:$0xff]  ;;  %v766_v48 = vld [vmem:[#allocation2 + $0x3c] sm:$0xff] }
  0x25   : > { %578 = vperm.xlu1 %2490, %v555_v16   ;;  %v764_v46 = vld [vmem:[#allocation2 + $0x2c] sm:$0xff]  ;;  %v765_v49 = vld [vmem:[#allocation2 + $0x34] sm:$0xff]  ;;  %v2667_v13 = vld [vmem:[%s2906_s1 + $0x1] ss:$0 sm:$0xff] }
  0x26   : > { %573 = vperm.xlu0 %2489, %v554_v17   ;;  %v2672_v14 = vld [vmem:[%s2906_s1] ss:$0 sm:$0xff]  ;;  %v2677_v15 = vld [vmem:[%s2906_s1 + $0x2] ss:$0 sm:$0xff] }
  0x29   : > { %637 = vperm.xlu1 %2490, %v622_v18  }
  0x2a   : > { %632 = vperm.xlu0 %2489, %v621_v19  }
  0x2d   : > { %583 = vperm.xlu1 %2490, %v556_v20  }
  0x2e   : > { %522 = vperm.xlu0 %2489, %v495_v21  }
  0x31   : > { %647 = vperm.xlu1 %2490, %v624_v22   ;;  %v2688_v22 = vld [vmem:[%s2906_s1 + $0x3] ss:$0 sm:$0xff] }
  0x32   : > { %642 = vperm.xlu0 %2489, %v623_v23  }
  0x35   : > { %588 = vperm.xlu1 %2490, %v557_v24  }
  0x36   : > { %527 = vperm.xlu0 %2489, %v496_v25  }
  0x39   : > { %706 = vperm.xlu1 %2490, %v691_v26  }
  0x3a   : > { %701 = vperm.xlu0 %2489, %v690_v27  }
  0x3d   : > { %537 = vperm.xlu1 %2490, %v498_v28  }
  0x3e   : > { %532 = vperm.xlu0 %2489, %v497_v29  }
  0x41   : > { %598 = vperm.xlu1 %2490, %v559_v30  }
  0x42   : > { %593 = vperm.xlu0 %2489, %v558_v31   ;;  %v2697_v31 = vld [vmem:[%s2906_s1 + $0x4] ss:$0 sm:$0xff] }
  0x45   : > { %711 = vperm.xlu1 %2490, %v692_v32  }
  0x46   : > { %652 = vperm.xlu0 %2489, %v625_v33  }
  0x49   : > { %657 = vperm.xlu1 %2490, %v626_v34  }
  0x4a   : > { %716 = vperm.xlu0 %2489, %v693_v35  }
  0x4d   : > { %775 = vperm.xlu1 %2490, %v760_v36  }
  0x4e   : > { %770 = vperm.xlu0 %2489, %v759_v37  }
  0x51   : > { %667 = vperm.xlu1 %2490, %v628_v38  }
  0x52   : > { %662 = vperm.xlu0 %2489, %v627_v39  }
  0x55   : > { %780 = vperm.xlu1 %2490, %v761_v40  }
  0x56   : > { %721 = vperm.xlu0 %2489, %v694_v41  }
  0x59   : > { %726 = vperm.xlu1 %2490, %v695_v42  }
  0x5a   : > { %785 = vperm.xlu0 %2489, %v762_v43   ;;  %v2707_v43 = vld [vmem:[%s2907_s2] ss:$0 sm:$0xff] }
  0x5d   : > { %736 = vperm.xlu1 %2490, %v697_v44  }
  0x5e   : > { %731 = vperm.xlu0 %2489, %v696_v45  }
  0x61   : > { %795 = vperm.xlu1 %2490, %v764_v46  }
  0x62   : > { %790 = vperm.xlu0 %2489, %v763_v47  }
  0x65   : > { %805 = vperm.xlu1 %2490, %v766_v48  }
  0x66   : > { %800 = vperm.xlu0 %2489, %v765_v49   ;;  %v2714_v49 = vld [vmem:[%s2908_s3] ss:$0 sm:$0xff] }
  0x94   : > { %v564_v54 = vpop.permute.xlu1 %563 }
  0x95   : > { %v503_v55 = vpop.permute.xlu0 %502  ;;  %v605_v18 = vmul.f32 %v2667_v13, %v564_v54 }
  0x96   : > { %v544_v19 = vmul.f32 %v2672_v14, %v503_v55 }
  0x98   : > { %v569_v56 = vpop.permute.xlu1 %568  ;;  %v613_v27 = vadd.f32 %v605_v18, %v544_v19 }
  0x99   : > { %v508_v57 = vpop.permute.xlu0 %507  ;;  %v606_v20 = vmul.f32 %v2667_v13, %v569_v56 }
  0x9a   : > { %v545_v21 = vmul.f32 %v2672_v14, %v508_v57 }
  0x9c   : > { %v518_v58 = vpop.permute.xlu1 %517  ;;  %v614_v28 = vadd.f32 %v606_v20, %v545_v21 }
  0x9d   : > { %v513_v59 = vpop.permute.xlu0 %512  ;;  %v547_v56 = vmul.f32 %v2672_v14, %v518_v58 }
  0x9e   : > { %v546_v41 = vmul.f32 %v2672_v14, %v513_v59 }
  0xa0   : > { %v579_v60 = vpop.permute.xlu1 %578 }
  0xa1   : > { %v574_v61 = vpop.permute.xlu0 %573  ;;  %v608_v46 = vmul.f32 %v2667_v13, %v579_v60 }
  0xa2   : > { %v607_v34 = vmul.f32 %v2667_v13, %v574_v61 }
  0xa4   : > { %v638_v62 = vpop.permute.xlu1 %637  ;;  %v615_v47 = vadd.f32 %v607_v34, %v546_v41 }
  0xa5   : > { %v633_v63 = vpop.permute.xlu0 %632  ;;  %v675_v23 = vmul.f32 %v2677_v15, %v638_v62  ;;  %v616_v62 = vadd.f32 %v608_v46, %v547_v56 }
  0xa6   : > { %v674_v24 = vmul.f32 %v2677_v15, %v633_v63 }
  0xa7   : > { %v683_v32 = vadd.f32 %v675_v23, %v614_v28 }
  0xa8   : > { %v2648_v0 = vpop.permute.xlu1 %583  ;;  %v682_v33 = vadd.f32 %v674_v24, %v613_v27 }
  0xa9   : > { %v2650_v2 = vpop.permute.xlu0 %522 }
  0xaa   : > { %v548_v21 = vmul.f32 %v2672_v14, %v2650_v2 }
  0xac   : > { %v648_v3 = vpop.permute.xlu1 %647 }
  0xad   : > { %v643_v4 = vpop.permute.xlu0 %642  ;;  %v677_v59 = vmul.f32 %v2677_v15, %v648_v3  ;;  %v609_v3 = vmul.f32 %v2667_v13, %v2648_v0 }
  0xae   : > { %v676_v42 = vmul.f32 %v2677_v15, %v643_v4 }
  0xaf   : > { %v685_v20 = vadd.f32 %v677_v59, %v616_v62  ;;  %v617_v34 = vadd.f32 %v609_v3, %v548_v21 }
  0xb0   : > { %v2652_v5 = vpop.permute.xlu1 %588  ;;  %v684_v57 = vadd.f32 %v676_v42, %v615_v47 }
  0xb1   : > { %v2654_v6 = vpop.permute.xlu0 %527  ;;  %v610_v23 = vmul.f32 %v2667_v13, %v2652_v5 }
  0xb2   : > { %v549_v27 = vmul.f32 %v2672_v14, %v2654_v6 }
  0xb4   : > { %v707_v7 = vpop.permute.xlu1 %706 }
  0xb5   : > { %v702_v8 = vpop.permute.xlu0 %701  ;;  %v744_v29 = vmul.f32 %v2688_v22, %v707_v7 }
  0xb6   : > { %v743_v30 = vmul.f32 %v2688_v22, %v702_v8 }
  0xb7   : > { %v752_v37 = vadd.f32 %v744_v29, %v683_v32 }
  0xb8   : > { %v2656_v9 = vpop.permute.xlu1 %537  ;;  %v751_v38 = vadd.f32 %v743_v30, %v682_v33 }
  0xb9   : > { %v2658_v10 = vpop.permute.xlu0 %532 }
  0xbc   : > { %v2660_v11 = vpop.permute.xlu1 %598 }
  0xbd   : > { %v2662_v12 = vpop.permute.xlu0 %593  ;;  %v612_v5 = vmul.f32 %v2667_v13, %v2660_v11  ;;  %v550_v11 = vmul.f32 %v2672_v14, %v2658_v10 }
  0xc0   : > { %v712_v16 = vpop.permute.xlu1 %711 }
  0xc1   : > { %v2679_v17 = vpop.permute.xlu0 %652  ;;  %v745_v48 = vmul.f32 %v2688_v22, %v712_v16 }
  0xc2   : > { %v678_v32 = vmul.f32 %v2677_v15, %v2679_v17  ;;  %v551_v17 = vmul.f32 %v2672_v14, %v2656_v9 }
  0xc3   : > { %v753_v63 = vadd.f32 %v745_v48, %v684_v57 }
  0xc4   : > { %v658_v25 = vpop.permute.xlu1 %657  ;;  %v686_v41 = vadd.f32 %v678_v32, %v617_v34  ;;  %v620_v46 = vadd.f32 %v612_v5, %v551_v17 }
  0xc5   : > { %v717_v26 = vpop.permute.xlu0 %716  ;;  %v679_v0 = vmul.f32 %v2677_v15, %v658_v25  ;;  %v611_v25 = vmul.f32 %v2667_v13, %v2662_v12 }
  0xc6   : > { %v746_v8 = vmul.f32 %v2688_v22, %v717_v26 }
  0xc7   : > { %v619_v14 = vadd.f32 %v611_v25, %v550_v11 }
  0xc8   : > { %v776_v35 = vpop.permute.xlu1 %775  ;;  %v754_v28 = vadd.f32 %v746_v8, %v685_v20 }
  0xc9   : > { %v771_v36 = vpop.permute.xlu0 %770  ;;  %v813_v39 = vmul.f32 %v2697_v31, %v776_v35 }
  0xca   : > { %v812_v40 = vmul.f32 %v2697_v31, %v771_v36 }
  0xcb   : > { %v821_v44 = vadd.f32 %v813_v39, %v752_v37  ;;  %v618_v37 = vadd.f32 %v610_v23, %v549_v27 }
  0xcc   : > { %v820_v45 = vadd.f32 %v812_v40, %v751_v38  ;;  %v668_v50 = vpop.permute.xlu1 %667 }
  0xcd   : > { %v663_v51 = vpop.permute.xlu0 %662  ;;  %v836_v54 = vmul.f32 %v2707_v43, %v821_v44  ;;  %v681_v42 = vmul.f32 %v2677_v15, %v668_v50  ;;  %v687_v44 = vadd.f32 %v679_v0, %v618_v37 }
  0xce   : > { %v835_v55 = vmul.f32 %v2707_v43, %v820_v45  ;;  %v680_v47 = vmul.f32 %v2677_v15, %v663_v51 }
  0xcf   : > { %v851_v60 = vadd.f32 %v2714_v49, %v836_v54  ;;  %v689_v59 = vadd.f32 %v681_v42, %v620_v46 }
  0xd0   : > { %v850_v61 = vadd.f32 %v2714_v49, %v835_v55  ;;  %v781_v4 = vpop.permute.xlu1 %780  ;;  %v688_v62 = vadd.f32 %v680_v47, %v619_v14 }
  0xd1   : > { %v722_v7 = vpop.permute.xlu0 %721  ;;  %v859_v16 = vmax.f32 %v851_v60, 0.0  ;;  %v814_v19 = vmul.f32 %v2697_v31, %v781_v4 }
  0xd2   : > { %v858_v18 = vmax.f32 %v850_v61, 0.0  ;;  %v747_v35 = vmul.f32 %v2688_v22, %v722_v7 }
  0xd3   : > { %868 = vst.msk [vmem:[#allocation3 + $0x8] sm:$0xff] %vm866_vm2, %v859_v16  ;;  %v822_v58 = vadd.f32 %v814_v19, %v753_v63 }
  0xd4   : > { %867 = vst.msk [vmem:[#allocation3] sm:$0xff] %vm866_vm2, %v858_v18  ;;  %v727_v24 = vpop.permute.xlu1 %726  ;;  %v755_v48 = vadd.f32 %v747_v35, %v686_v41 }
  0xd5   : > { %v786_v26 = vpop.permute.xlu0 %785  ;;  %v837_v29 = vmul.f32 %v2707_v43, %v822_v58  ;;  %v748_v39 = vmul.f32 %v2688_v22, %v727_v24 }
  0xd6   : > { %v815_v30 = vmul.f32 %v2697_v31, %v786_v26 }
  0xd7   : > { %v852_v2 = vadd.f32 %v2714_v49, %v837_v29  ;;  %v756_v56 = vadd.f32 %v748_v39, %v687_v44 }
  0xd8   : > { %v823_v33 = vadd.f32 %v815_v30, %v754_v28  ;;  %v737_v6 = vpop.permute.xlu1 %736 }
  0xd9   : > { %v732_v36 = vpop.permute.xlu0 %731  ;;  %v860_v38 = vmax.f32 %v852_v2, 0.0  ;;  %v750_v9 = vmul.f32 %v2688_v22, %v737_v6 }
  0xda   : > { %v838_v40 = vmul.f32 %v2707_v43, %v823_v33  ;;  %v749_v60 = vmul.f32 %v2688_v22, %v732_v36 }
  0xdb   : > { %869 = vst.msk [vmem:[#allocation3 + $0x10] sm:$0xff] %vm866_vm2, %v860_v38  ;;  %v875_v12 = vld [vmem:[#allocation3] ss:$2 sm:$0xff]  ;;  %v883_v13 = vld [vmem:[#allocation3 + $0x1] ss:$2 sm:$0xff]  ;;  %v758_v63 = vadd.f32 %v750_v9, %v689_v59  ;;  %v2297_v59 = vld [vmem:[%s2909_s4 + $0x20] sm:$0xff] }
  0xdc   : > { %v853_v45 = vadd.f32 %v2714_v49, %v838_v40  ;;  %v796_v54 = vpop.permute.xlu1 %795  ;;  %v890_v61 = vmax.f32 %v875_v12, %v883_v13  ;;  %v757_v58 = vadd.f32 %v749_v60, %v688_v62 }
  0xdd   : > { %v791_v55 = vpop.permute.xlu0 %790  ;;  %v817_v57 = vmul.f32 %v2697_v31, %v796_v54 }
  0xde   : > { %v861_v50 = vmax.f32 %v853_v45, 0.0  ;;  %v816_v10 = vmul.f32 %v2697_v31, %v791_v55 }
  0xdf   : > { %v825_v15 = vadd.f32 %v817_v57, %v756_v56 }
  0xe0   : > { %870 = vst.msk [vmem:[#allocation3 + $0x18] sm:$0xff] %vm866_vm2, %v861_v50  ;;  %v824_v51 = vadd.f32 %v816_v10, %v755_v48  ;;  %v806_v4 = vpop.permute.xlu1 %805 }
  0xe1   : > { %v801_v7 = vpop.permute.xlu0 %800  ;;  %v840_v8 = vmul.f32 %v2707_v43, %v825_v15  ;;  %v819_v18 = vmul.f32 %v2697_v31, %v806_v4 }
  0xe2   : > { %v839_v16 = vmul.f32 %v2707_v43, %v824_v51  ;;  %v818_v19 = vmul.f32 %v2697_v31, %v801_v7  ;;  %v895_v20 = vld [vmem:[#allocation3 + $0x2] ss:$2 sm:$0xff]  ;;  %v907_v24 = vld [vmem:[#allocation3 + $0x3] ss:$2 sm:$0xff]  ;;  %v1493_v51 = vld [vmem:[%s2912_s7] sm:$0xff] }
  0xe3   : > { %v902_v22 = vmax.f32 %v890_v61, %v895_v20  ;;  %v855_v3 = vadd.f32 %v2714_v49, %v840_v8  ;;  %v827_v23 = vadd.f32 %v819_v18, %v758_v63  ;;  %v919_v32 = vld [vmem:[#allocation3 + $0x4] ss:$2 sm:$0xff] }
  0xe4   : > { %v854_v21 = vadd.f32 %v2714_v49, %v839_v16  ;;  %v826_v26 = vadd.f32 %v818_v19, %v757_v58 }
  0xe5   : > { %v914_v27 = vmax.f32 %v902_v22, %v907_v24  ;;  %v863_v28 = vmax.f32 %v855_v3, 0.0  ;;  %v842_v30 = vmul.f32 %v2707_v43, %v827_v23  ;;  %v2310_v23 = vld [vmem:[%s2914_s9 + $0x18] sm:$0xff]  ;;  %v1645_v24 = vld [vmem:[%s2914_s9 + $0x8] sm:$0xff] }
  0xe6   : > { %v862_v29 = vmax.f32 %v854_v21, 0.0  ;;  %v841_v0 = vmul.f32 %v2707_v43, %v826_v26  ;;  %v2309_v26 = vld [vmem:[%s2914_s9 + $0x10] sm:$0xff] }
  0xe7   : > { %872 = vst.msk [vmem:[#allocation3 + $0x28] sm:$0xff] %vm866_vm2, %v863_v28  ;;  %v857_v31 = vadd.f32 %v2714_v49, %v842_v30  ;;  %v2771_v2 = vmax.f32 %v914_v27, %v919_v32  ;;  %v877_v5 = vld [vmem:[#allocation3 + $0x10] ss:$2 sm:$0xff]  ;;  %v885_v35 = vld [vmem:[#allocation3 + $0x11] ss:$2 sm:$0xff]  ;;  %v2833_v28 = vld [vmem:[%s2914_s9 + $0x28] sm:$0xff] }
  0xe8   : > { %871 = vst.msk [vmem:[#allocation3 + $0x20] sm:$0xff] %vm866_vm2, %v862_v29  ;;  %v856_v33 = vadd.f32 %v2714_v49, %v841_v0  ;;  %v891_v43 = vmax.f32 %v877_v5, %v885_v35  ;;  %v1644_v27 = vld [vmem:[%s2914_s9] sm:$0xff]  ;;  %v2839_v29 = vld [vmem:[%s2914_s9 + $0x38] sm:$0xff] }
  0xe9   : > { %v865_v34 = vmax.f32 %v857_v31, 0.0  ;;  %936 = vst.msk [vmem:[#allocation4 + $0x2] sm:$0xff] %vm866_vm2, %v2771_v2 }
  0xea   : > { %v864_v6 = vmax.f32 %v856_v33, 0.0 }
  0xeb   : > { %874 = vst.msk [vmem:[#allocation3 + $0x38] sm:$0xff] %vm866_vm2, %v865_v34 }
  0xec   : > { %873 = vst.msk [vmem:[#allocation3 + $0x30] sm:$0xff] %vm866_vm2, %v864_v6 }
  0xef   : > { %v897_v36 = vld [vmem:[#allocation3 + $0x12] ss:$2 sm:$0xff]  ;;  %v887_v38 = vld [vmem:[#allocation3 + $0x21] ss:$2 sm:$0xff] }
  0xf0   : > { %v879_v37 = vld [vmem:[#allocation3 + $0x20] ss:$2 sm:$0xff]  ;;  %v903_v39 = vmax.f32 %v891_v43, %v897_v36  ;;  %v909_v40 = vld [vmem:[#allocation3 + $0x13] ss:$2 sm:$0xff] }
  0xf1   : > { %v946_v17 = vld [vmem:[#allocation4 + $0x1] sm:$0xff]  ;;  %v892_v42 = vmax.f32 %v879_v37, %v887_v38 }
  0xf2   : > { %v941_v25 = vld [vmem:[#allocation4] sm:$0xff]  ;;  %v915_v49 = vmax.f32 %v903_v39, %v909_v40  ;;  %2391 = vmatprep.mubr.msk.f32.mxu0 %vm866_vm2, %v946_v17 }
  0xf3   : > { %2399 = vmatprep.mubr.msk.f32.mxu1 %vm866_vm2, %v941_v25  ;;  %v921_v41 = vld [vmem:[#allocation3 + $0x14] ss:$2 sm:$0xff]  ;;  %v889_v45 = vld [vmem:[#allocation3 + $0x31] ss:$2 sm:$0x3f] }
  0xf4   : > { %v927_v11 = vmax.f32 %v915_v49, %v921_v41  ;;  %v881_v44 = vld [vmem:[#allocation3 + $0x30] ss:$2 sm:$0x3f]  ;;  %v911_v55 = vld [vmem:[#allocation3 + $0x23] ss:$2 sm:$0xff] }
  0xf5   : > { %v893_v46 = vmax.f32 %v881_v44, %v889_v45  ;;  %v899_v47 = vld [vmem:[#allocation3 + $0x22] ss:$2 sm:$0xff]  ;;  %v901_v48 = vld [vmem:[#allocation3 + $0x32] ss:$2 sm:$0x3f] }
  0xf6   : > { %937 = vst.msk [vmem:[#allocation4 + $0xa] sm:$0xff] %vm866_vm2, %v927_v11  ;;  %v904_v9 = vmax.f32 %v892_v42, %v899_v47  ;;  %v913_v12 = vld [vmem:[#allocation3 + $0x33] ss:$2 sm:$0x3f]  ;;  %v923_v56 = vld [vmem:[#allocation3 + $0x24] ss:$2 sm:$0xff] }
  0xf7   : > { %v905_v54 = vmax.f32 %v893_v46, %v901_v48  ;;  %v925_v10 = vld [vmem:[#allocation3 + $0x34] ss:$2 sm:$0x3f]  ;;  %v1146_v7 = vld [vmem:[#allocation4 + $0x2] sm:$0xff] }
  0xf8   : > { %v916_v13 = vmax.f32 %v904_v9, %v911_v55  ;;  %v2302_v46 = vld [vmem:[%s2910_s5] ss:$0 sm:$0xff] }
  0xf9   : > { %v917_v50 = vmax.f32 %v905_v54, %v913_v12  ;;  %v2303_v55 = vld [vmem:[%s2911_s6] ss:$0 sm:$0xff] }
  0xfa   : > { %v928_v57 = vmax.f32 %v916_v13, %v923_v56 }
  0xfb   : > { %v929_v14 = vmax.f32 %v917_v50, %v925_v10 }
  0xfc   : > { %938 = vst.msk [vmem:[#allocation4 + $0x12] sm:$0xff] %vm866_vm2, %v928_v57 }
  0xfd   : > { %v947_v60 = vld [vmem:[#allocation4 + $0x9] sm:$0xff]  ;;  %940 = vst.msk [vmem:[#allocation4 + $0x1a] sm:$0x3f] %vm939_vm4, %v929_v14 }
  0xfe   : > { %v942_v15 = vld [vmem:[#allocation4 + $0x8] sm:$0xff]  ;;  %2392 = vmatmul.mubr.msk.f32.vlgmr.msra.gmra.mxu0 %vm866_vm2, %v947_v60 }
  0xff   : > { %2400 = vmatmul.mubr.msk.f32.vlgmr.msra.gmra.mxu1 %vm866_vm2, %v942_v15  ;;  %2406 = vmatpush3.msra.mxu0 %v2638_v52  ;;  %v1253_v8 = vld [vmem:[#allocation4 + $0x3] sm:$0xff] }
 0x100   : > { %2414 = vmatpush3.msra.mxu1 %v2645_v53  ;;  %2421 = vmatprep.subr.mxu0 %v2297_v59  ;;  %v1147_v52 = vld [vmem:[#allocation4 + $0xa] sm:$0xff] }
 0x101   : > { %2429 = vmatprep.subr.mxu1 %v1493_v51  ;;  %v1360_v58 = vld [vmem:[#allocation4 + $0x4] sm:$0xff] }
 0x103   : > { %v948_v61 = vld [vmem:[#allocation4 + $0x11] sm:$0xff] }
 0x104   : > { %v943_v62 = vld [vmem:[#allocation4 + $0x10] sm:$0xff]  ;;  %2394 = vmatprep.mubr.msk.f32.mxu0 %vm866_vm2, %v948_v61  ;;  %v949_v63 = vld [vmem:[#allocation4 + $0x19] sm:$0x3f] }
 0x105   : > { %2402 = vmatprep.mubr.msk.f32.mxu1 %vm866_vm2, %v943_v62  ;;  %v944_v4 = vld [vmem:[#allocation4 + $0x18] sm:$0x3f]  ;;  %2395 = vmatmul.mubr.msk.f32.gmra.mxu0 %vm866_vm2, %v949_v63  ;;  %v1254_v53 = vld [vmem:[#allocation4 + $0xb] sm:$0xff] }
 0x106   : > { %2403 = vmatmul.mubr.msk.f32.gmra.mxu1 %vm866_vm2, %v944_v4  ;;  %2407 = vmatprep.mubr.msk.f32.mxu0 %vm866_vm2, %v1146_v7  ;;  %v1148_v16 = vld [vmem:[#allocation4 + $0x12] sm:$0xff]  ;;  %v1149_v19 = vld [vmem:[#allocation4 + $0x1a] sm:$0x3f] }
 0x107   : > { %2415 = vmatprep.mubr.msk.f32.mxu1 %vm866_vm2, %v1253_v8  ;;  %v1255_v18 = vld [vmem:[#allocation4 + $0x13] sm:$0xff]  ;;  %v1256_v20 = vld [vmem:[#allocation4 + $0x1b] sm:$0x3f] }
 0x108   : > { %v1361_v22 = vld [vmem:[#allocation4 + $0xc] sm:$0xff]  ;;  %v1362_v3 = vld [vmem:[#allocation4 + $0x14] sm:$0xff]  ;;  %v1363_v21 = vld [vmem:[#allocation4 + $0x1c] sm:$0x3f] }
 0x109   : > { %2408 = vmatmul.mubr.msk.f32.vlgmr.msra.gmra.mxu0 %vm866_vm2, %v1147_v52 }
 0x10a   : > { %2416 = vmatmul.mubr.msk.f32.vlgmr.msra.gmra.mxu1 %vm866_vm2, %v1254_v53  ;;  %2422 = vmatpush3.msra.mxu0 %v2297_v59 }
 0x10b   : > { %2410 = vmatprep.mubr.msk.f32.mxu0 %vm866_vm2, %v1148_v16  ;;  %2418 = vmatprep.mubr.msk.f32.mxu1 %vm866_vm2, %v1255_v18 }
 0x10c   : > { %2430 = vmatpush3.msra.mxu1 %v1493_v51  ;;  %2437 = vmatprep.subr.mxu0 %v2310_v23 }
 0x10d   : > { %2411 = vmatmul.mubr.msk.f32.gmra.mxu0 %vm866_vm2, %v1149_v19  ;;  %2444 = vmatprep.subr.mxu1 %v1645_v24 }
 0x10e   : > { %2419 = vmatmul.mubr.msk.f32.gmra.mxu1 %vm866_vm2, %v1256_v20  ;;  %2423 = vmatprep.mubr.msk.f32.mxu0 %vm866_vm2, %v1360_v58 }
 0x10f   : > { %2431 = vmatprep.mubr.msk.f32.mxu1 %vm866_vm2, %v2771_v2 }
 0x111   : > { %2424 = vmatmul.mubr.msk.f32.vlgmr.msra.gmra.mxu0 %vm866_vm2, %v1361_v22 }
 0x112   : > { %2432 = vmatmul.mubr.msk.f32.vlgmr.msra.gmra.mxu1 %vm866_vm2, %v927_v11  ;;  %2426 = vmatprep.mubr.msk.f32.mxu0 %vm866_vm2, %v1362_v3 }
 0x113   : > { %2434 = vmatprep.mubr.msk.f32.mxu1 %vm866_vm2, %v928_v57  ;;  %2438 = vmatpush3.msra.mxu0 %v2310_v23  ;;  %v2304_v57 = vld [vmem:[%s2913_s8] ss:$0 sm:$0xff] }
 0x114   : > { %2445 = vmatpush3.msra.mxu1 %v1645_v24  ;;  %2439 = vmatprep.subr.mxu0 %v2309_v26 }
 0x115   : > { %2427 = vmatmul.mubr.msk.f32.gmra.mxu0 %vm866_vm2, %v1363_v21  ;;  %2446 = vmatprep.subr.mxu1 %v1644_v27 }
 0x116   : > { %2435 = vmatmul.mubr.msk.f32.gmra.mxu1 %vm866_vm2, %v929_v14  ;;  %2440 = vmatpush3.msra.mxu0 %v2309_v26 }
 0x117   : > { %2447 = vmatpush3.msra.mxu1 %v1644_v27  ;;  %2451 = vmatprep.subr.mxu0 %v2833_v28 }
 0x118   : > { %2458 = vmatprep.subr.mxu1 %v2839_v29 }
 0x1be   : > { %v2393_v30 = vpop.f32.mrf.mxu0 }
 0x1bf   : > { %v2401_v32 = vpop.f32.mrf.mxu1 }
 0x1c0   : > { %v1030_v0 = vpop.f32.mrf.mxu0  ;;  %v1133_v6 = vadd.f32 %v2401_v32, %v2393_v30 }
 0x1c1   : > { %v1127_v31 = vpop.f32.mrf.mxu1 }
 0x1c2   : > { %v1128_v37 = vadd.f32 %v1127_v31, %v1030_v0 }
 0x1c5   : > { %v2396_v2 = vpop.f32.mrf.mxu0 }
 0x1c6   : > { %v2404_v1 = vpop.f32.mrf.mxu1 }
 0x1c7   : > { %v1040_v33 = vpop.f32.mrf.mxu0  ;;  %v1143_v17 = vadd.f32 %v2404_v1, %v2396_v2 }
 0x1c8   : > { %v1137_v34 = vpop.f32.mrf.mxu1 }
 0x1c9   : > { %v2409_v5 = vpop.f32.mrf.mxu0  ;;  %v1138_v42 = vadd.f32 %v1137_v34, %v1040_v33 }
 0x1ca   : > { %v2417_v35 = vpop.f32.mrf.mxu1  ;;  %v1250_v38 = vadd.f32 %v2409_v5, %v1133_v6 }
 0x1cb   : > { %v1230_v43 = vpop.f32.mrf.mxu0 }
 0x1cc   : > { %v1337_v36 = vpop.f32.mrf.mxu1  ;;  %v1249_v25 = vadd.f32 %v1230_v43, %v1128_v37  ;;  %v1357_v11 = vadd.f32 %v2417_v35, %v1250_v38 }
 0x1cd   : > { %v2412_v39 = vpop.f32.mrf.mxu0 }
 0x1ce   : > { %v2420_v40 = vpop.f32.mrf.mxu1  ;;  %v1252_v44 = vadd.f32 %v2412_v39, %v1143_v17  ;;  %v1356_v48 = vadd.f32 %v1337_v36, %v1249_v25 }
 0x1cf   : > { %v1240_v49 = vpop.f32.mrf.mxu0 }
 0x1d0   : > { %v1347_v41 = vpop.f32.mrf.mxu1  ;;  %v1251_v9 = vadd.f32 %v1240_v49, %v1138_v42  ;;  %v1359_v56 = vadd.f32 %v2420_v40, %v1252_v44  ;;  %v2315_v44 = vld [vmem:[%s2914_s9 + $0x20] sm:$0xff] }
 0x1d1   : > { %v2425_v45 = vpop.f32.mrf.mxu0 }
 0x1d2   : > { %v2433_v47 = vpop.f32.mrf.mxu1  ;;  %v1464_v54 = vadd.f32 %v2425_v45, %v1357_v11  ;;  %v1358_v59 = vadd.f32 %v1347_v41, %v1251_v9 }
 0x1d3   : > { %v1444_v12 = vpop.f32.mrf.mxu0  ;;  %v1585_v61 = vadd.f32 %v2433_v47, %v2304_v57  ;;  %v2319_v47 = vld [vmem:[%s2914_s9 + $0x30] sm:$0xff] }
 0x1d4   : > { %v1579_v13 = vpop.f32.mrf.mxu1  ;;  %v1475_v50 = vmul.f32 %v2302_v46, %v1464_v54  ;;  %v1463_v10 = vadd.f32 %v1444_v12, %v1356_v48  ;;  %v2324_v48 = vld [vmem:[%s2914_s9 + $0x48] sm:$0xff]  ;;  %v2323_v54 = vld [vmem:[%s2914_s9 + $0x40] sm:$0xff] }
 0x1d5   : > { %v2428_v14 = vpop.f32.mrf.mxu0  ;;  %v1580_v53 = vadd.f32 %v2304_v57, %v1579_v13  ;;  %v2097_v12 = vld [vmem:[%s2917_s12] sm:$0xff] }
 0x1d6   : > { %v1486_v60 = vadd.f32 %v2303_v55, %v1475_v50  ;;  %v1474_v15 = vmul.f32 %v2302_v46, %v1463_v10  ;;  %v1466_v51 = vadd.f32 %v2428_v14, %v1359_v56  ;;  %v2436_v62 = vpop.f32.mrf.mxu1 }
 0x1d7   : > { %v1454_v63 = vpop.f32.mrf.mxu0  ;;  %v1595_v21 = vadd.f32 %v2436_v62, %v2304_v57 }
 0x1d8   : > { %v1490_v4 = vmax.f32 %v1486_v60, 0.0  ;;  %v1485_v7 = vadd.f32 %v2303_v55, %v1474_v15  ;;  %v1477_v8 = vmul.f32 %v2302_v46, %v1466_v51  ;;  %v1465_v52 = vadd.f32 %v1454_v63, %v1358_v59  ;;  %v1589_v58 = vpop.f32.mrf.mxu1 }
 0x1d9   : > { %v1590_v27 = vadd.f32 %v2304_v57, %v1589_v58 }
 0x1da   : > { %v1599_v16 = vadd.f32 %v1585_v61, %v1490_v4  ;;  %v1489_v18 = vmax.f32 %v1485_v7, 0.0  ;;  %v1488_v19 = vadd.f32 %v2303_v55, %v1477_v8  ;;  %v1476_v20 = vmul.f32 %v2302_v46, %v1465_v52  ;;  %v2327_v52 = vld [vmem:[%s2915_s10] ss:$0 sm:$0xff] }
 0x1dc   : > { %1604 = vst.msk [vmem:[#allocation5 + $0x8] sm:$0xff] %vm1602_vm5, %v1599_v16  ;;  %v1598_v22 = vadd.f32 %v1580_v53, %v1489_v18  ;;  %v1492_v3 = vmax.f32 %v1488_v19, 0.0  ;;  %v1487_v23 = vadd.f32 %v2303_v55, %v1476_v20  ;;  %v2328_v16 = vld [vmem:[%s2916_s11] ss:$0 sm:$0xff] }
 0x1de   : > { %1603 = vst.msk [vmem:[#allocation5] sm:$0xff] %vm1602_vm5, %v1598_v22  ;;  %v1601_v24 = vadd.f32 %v1595_v21, %v1492_v3  ;;  %v1491_v26 = vmax.f32 %v1487_v23, 0.0  ;;  %v2329_v22 = vld [vmem:[%s2918_s13] ss:$0 sm:$0xff] }
 0x1e0   : > { %1607 = vst.msk [vmem:[#allocation5 + $0x18] sm:$0x3f] %vm1606_vm7, %v1601_v24  ;;  %v1600_v30 = vadd.f32 %v1590_v27, %v1491_v26 }
 0x1e2   : > { %1605 = vst.msk [vmem:[#allocation5 + $0x10] sm:$0xff] %vm1602_vm5, %v1600_v30 }
 0x1e5   : > { %v1608_v32 = vld [vmem:[#allocation5] ss:$2 sm:$0xff]  ;;  %v1612_v0 = vld [vmem:[#allocation5 + $0x1] ss:$2 sm:$0xff] }
 0x1e6   : > { %v1615_v31 = vmax.f32 %v1608_v32, %v1612_v0 }
 0x1e9   : > { %v1610_v2 = vld [vmem:[#allocation5 + $0x10] ss:$2 sm:$0x1f]  ;;  %v1614_v1 = vld [vmem:[#allocation5 + $0x11] ss:$2 sm:$0x1f] }
 0x1ea   : > { %v1616_v33 = vmax.f32 %v1610_v2, %v1614_v1  ;;  %v1618_v34 = vld [vmem:[#allocation5 + $0x2] ss:$2 sm:$0xff]  ;;  %v1620_v5 = vld [vmem:[#allocation5 + $0x12] ss:$2 sm:$0x1f] }
 0x1eb   : > { %v1621_v35 = vmax.f32 %v1615_v31, %v1618_v34  ;;  %v1624_v43 = vld [vmem:[#allocation5 + $0x3] ss:$2 sm:$0xff]  ;;  %v1626_v36 = vld [vmem:[#allocation5 + $0x13] ss:$2 sm:$0x1f] }
 0x1ec   : > { %v1622_v6 = vmax.f32 %v1616_v33, %v1620_v5  ;;  %v1630_v39 = vld [vmem:[#allocation5 + $0x4] ss:$2 sm:$0xff]  ;;  %v1632_v40 = vld [vmem:[#allocation5 + $0x14] ss:$2 sm:$0x1f] }
 0x1ed   : > { %v1627_v37 = vmax.f32 %v1621_v35, %v1624_v43 }
 0x1ee   : > { %v1628_v38 = vmax.f32 %v1622_v6, %v1626_v36 }
 0x1ef   : > { %v1633_v17 = vmax.f32 %v1627_v37, %v1630_v39 }
 0x1f0   : > { %v1634_v25 = vmax.f32 %v1628_v38, %v1632_v40 }
 0x1f1   : > { %1639 = vst.msk [vmem:[#allocation6 + $0x2] sm:$0xff] %vm1602_vm5, %v1633_v17 }
 0x1f2   : > { %1641 = vst.msk [vmem:[#allocation6 + $0xa] sm:$0x1f] %vm1640_vm8, %v1634_v25 }
 0x1f8   : > { %v1646_v49 = vld [vmem:[#allocation6 + $0x1] sm:$0xff] }
 0x1f9   : > { %v1642_v41 = vld [vmem:[#allocation6] sm:$0xff]  ;;  %2441 = vmatprep.mubr.msk.f32.mxu0 %vm1602_vm5, %v1646_v49  ;;  %v1647_v42 = vld [vmem:[#allocation6 + $0x9] sm:$0x1f] }
 0x1fa   : > { %2448 = vmatprep.mubr.msk.f32.mxu1 %vm1602_vm5, %v1642_v41  ;;  %v1643_v11 = vld [vmem:[#allocation6 + $0x8] sm:$0x1f]  ;;  %2442 = vmatmul.mubr.msk.f32.vlgmr.msra.gmra.mxu0 %vm1602_vm5, %v1647_v42 }
 0x1fb   : > { %2449 = vmatmul.mubr.msk.f32.vlgmr.msra.gmra.mxu1 %vm1602_vm5, %v1643_v11  ;;  %v1813_v45 = vld [vmem:[#allocation6 + $0x2] sm:$0xff]  ;;  %2452 = vmatpush3.msra.mxu0 %v2833_v28  ;;  %v1814_v9 = vld [vmem:[#allocation6 + $0xa] sm:$0x1f]  ;;  %v2098_v28 = vld [vmem:[%s2917_s12 + $0x8] sm:$0xff] }
 0x1fc   : > { %v1901_v46 = vld [vmem:[#allocation6 + $0x3] sm:$0xff]  ;;  %2455 = vmatprep.mubr.msk.f32.mxu0 %vm1602_vm5, %v1813_v45  ;;  %2453 = vmatprep.subr.mxu0 %v2315_v44  ;;  %v1902_v55 = vld [vmem:[#allocation6 + $0xb] sm:$0x1f] }
 0x1fd   : > { %2459 = vmatpush3.msra.mxu1 %v2839_v29  ;;  %2462 = vmatprep.mubr.msk.f32.mxu1 %vm1602_vm5, %v1901_v46  ;;  %v1989_v29 = vld [vmem:[#allocation6 + $0x4] sm:$0xff]  ;;  %v1990_v13 = vld [vmem:[#allocation6 + $0xc] sm:$0x1f] }
 0x1fe   : > { %2454 = vmatpush3.msra.mxu0 %v2315_v44  ;;  %2460 = vmatprep.subr.mxu1 %v2319_v47 }
 0x1ff   : > { %2465 = vmatprep.subr.mxu0 %v2324_v48  ;;  %2461 = vmatpush3.msra.mxu1 %v2319_v47 }
 0x200   : > { %2456 = vmatmul.mubr.msk.f32.vlgmr.msra.gmra.mxu0 %vm1602_vm5, %v1814_v9  ;;  %2463 = vmatmul.mubr.msk.f32.vlgmr.msra.gmra.mxu1 %vm1602_vm5, %v1902_v55 }
 0x201   : > { %2466 = vmatpush3.msra.mxu0 %v2324_v48  ;;  %2472 = vmatprep.subr.mxu1 %v2098_v28 }
 0x202   : > { %2467 = vmatprep.subr.mxu0 %v2323_v54  ;;  %2469 = vmatprep.mubr.msk.f32.mxu0 %vm1602_vm5, %v1989_v29 }
 0x203   : > { %2473 = vmatpush3.msra.mxu1 %v2098_v28  ;;  %2476 = vmatprep.mubr.msk.f32.mxu1 %vm1602_vm5, %v1633_v17 }
 0x204   : > { %2468 = vmatpush3.msra.mxu0 %v2323_v54  ;;  %2474 = vmatprep.subr.mxu1 %v2097_v12 }
 0x205   : > { %2470 = vmatmul.mubr.msk.f32.vlgmr.msra.gmra.mxu0 %vm1602_vm5, %v1990_v13  ;;  %2475 = vmatpush3.msra.mxu1 %v2097_v12 }
 0x206   : > { %2477 = vmatmul.mubr.msk.f32.vlgmr.msra.gmra.mxu1 %vm1602_vm5, %v1634_v25 }
 0x2ba   : > { %v2443_v56 = vpop.f32.mrf.mxu0 }
 0x2bb   : > { %v2450_v50 = vpop.f32.mrf.mxu1 }
 0x2bc   : > { %v1723_v57 = vpop.f32.mrf.mxu0  ;;  %v1810_v14 = vadd.f32 %v2450_v50, %v2443_v56 }
 0x2bd   : > { %v1804_v10 = vpop.f32.mrf.mxu1 }
 0x2be   : > { %v1805_v60 = vadd.f32 %v1804_v10, %v1723_v57 }
 0x2c0   : > { %v2457_v59 = vpop.f32.mrf.mxu0  ;;  %v2464_v51 = vpop.f32.mrf.mxu1 }
 0x2c1   : > { %v1900_v15 = vadd.f32 %v2457_v59, %v1810_v14 }
 0x2c2   : > { %v1890_v61 = vpop.f32.mrf.mxu0  ;;  %v1978_v4 = vpop.f32.mrf.mxu1 }
 0x2c3   : > { %v1988_v62 = vadd.f32 %v2464_v51, %v1900_v15  ;;  %v1899_v63 = vadd.f32 %v1890_v61, %v1805_v60 }
 0x2c5   : > { %v1987_v7 = vadd.f32 %v1978_v4, %v1899_v63  ;;  %v2471_v8 = vpop.f32.mrf.mxu0 }
 0x2c6   : > { %v2076_v53 = vadd.f32 %v2471_v8, %v1988_v62  ;;  %v2478_v18 = vpop.f32.mrf.mxu1 }
 0x2c7   : > { %v2066_v19 = vpop.f32.mrf.mxu0  ;;  %v2184_v26 = vadd.f32 %v2478_v18, %v2329_v22 }
 0x2c8   : > { %v2085_v20 = vmul.f32 %v2327_v52, %v2076_v53  ;;  %v2075_v58 = vadd.f32 %v2066_v19, %v1987_v7  ;;  %v2178_v23 = vpop.f32.mrf.mxu1 }
 0x2c9   : > { %v2179_v0 = vadd.f32 %v2329_v22, %v2178_v23 }
 0x2ca   : > { %v2094_v3 = vadd.f32 %v2328_v16, %v2085_v20  ;;  %v2084_v21 = vmul.f32 %v2327_v52, %v2075_v58 }
 0x2cc   : > { %v2096_v24 = vmax.f32 %v2094_v3, 0.0  ;;  %v2093_v27 = vadd.f32 %v2328_v16, %v2084_v21 }
 0x2ce   : > { %v2188_v30 = vadd.f32 %v2184_v26, %v2096_v24  ;;  %v2095_v32 = vmax.f32 %v2093_v27, 0.0 }
 0x2d0   : > { %2192 = vst.msk [vmem:[#allocation7 + $0x8] sm:$0x1f] %vm2191_vm9, %v2188_v30  ;;  %v2187_v31 = vadd.f32 %v2179_v0, %v2095_v32 }
 0x2d2   : > { %2190 = vst.msk [vmem:[#allocation7] sm:$0xff] %vm2189_vm10, %v2187_v31 }
 0x2d9   : > { %v2193_v2 = vld [vmem:[#allocation7] ss:$2 sm:$0x1f]  ;;  %v2195_v1 = vld [vmem:[#allocation7 + $0x1] ss:$2 sm:$0x1f] }
 0x2da   : > { %v2196_v33 = vmax.f32 %v2193_v2, %v2195_v1  ;;  %v2198_v34 = vld [vmem:[#allocation7 + $0x2] ss:$2 sm:$0x1f]  ;;  %v2201_v35 = vld [vmem:[#allocation7 + $0x3] ss:$2 sm:$0x1f] }
 0x2db   : > { %v2204_v43 = vld [vmem:[#allocation7 + $0x4] ss:$2 sm:$0x1f] }
 0x2dc   : > { %v2199_v5 = vmax.f32 %v2196_v33, %v2198_v34 }
 0x2de   : > { %v2202_v6 = vmax.f32 %v2199_v5, %v2201_v35 }
 0x2e0   : > { %v2205_v36 = vmax.f32 %v2202_v6, %v2204_v43 }
 0x2e2   : > { %v2206_v37 = vsel %vm2191_vm9, %v2205_v36, 0.0 }
 0x2e3   : > { %v2207_v38 = vrot.slane %v2206_v37, 4 }
 0x2e5   : > { %v2208_v39 = vadd.f32 %v2207_v38, %v2206_v37 }
 0x2e7   : > { %v2209_v40 = vrot.slane %v2208_v39, 2 }
 0x2e9   : > { %v2210_v17 = vadd.f32 %v2209_v40, %v2208_v39 }
 0x2eb   : > { %v2211_v25 = vrot.slane %v2210_v17, 1 }
 0x2ed   : > { %v2212_v49 = vadd.f32 %v2211_v25, %v2210_v17 }
 0x2ef   : > { %v2214_v41 = vmul.f32 0.2, %v2212_v49 }
 0x2f1   : > { %2216 = vst.msk [vmem:[%s463_s28] sm:$0x1] %vm2215_vm11, %v2214_v41 }
 0x2f2 PF: > { %s24_s29 = sadd.s32 1, %s2497_s29  }
 0x2f3   : > { %p21_p4 = scmp.ge.s32.totalorder %s24_s29, 26  }
 0x2f5   :  { %23 = sbr.rel (!%p21_p4) target bundleno = 1 (0x1), region = 146 }

// kernel: ecg12_forward.3
= control target key start
LH: loop header
LB: loop body
LE: loop exit
PB: predicated region body
PF: predicated region fallthrough
CT: control target
= control target key end

     0   :  { %s4466_s0 = inlined_call_operand.vmem [shape: f32[2,32,12], index: 0, kind: input, shape index: {}]   ;;  %s4467_s1 = inlined_call_operand.vmem [shape: f32[5,12,32], index: 1, kind: input, shape index: {}]   ;;  %s4468_s2 = inlined_call_operand.vmem [shape: f32[1,32], index: 2, kind: input, shape index: {}]   ;;  %s4469_s3 = inlined_call_operand.vmem [shape: f32[1,32], index: 3, kind: input, shape index: {}]   ;;  %s4470_s4 = inlined_call_operand.vmem [shape: f32[5,32,64], index: 4, kind: input, shape index: {}]   ;;  %s4471_s5 = inlined_call_operand.vmem [shape: f32[1,64], index: 5, kind: input, shape index: {}]   ;;  %s4472_s6 = inlined_call_operand.vmem [shape: f32[1,64], index: 6, kind: input, shape index: {}]   ;;  %s4473_s7 = inlined_call_operand.vmem [shape: f32[32,64], index: 7, kind: input, shape index: {}]   ;;  %s4474_s8 = inlined_call_operand.vmem [shape: f32[1,64], index: 8, kind: input, shape index: {}]   ;;  %s4475_s9 = inlined_call_operand.vmem [shape: f32[5,64,128], index: 9, kind: input, shape index: {}]   ;;  %s4476_s10 = inlined_call_operand.vmem [shape: f32[1,128], index: 10, kind: input, shape index: {}]   ;;  %s4477_s11 = inlined_call_operand.vmem [shape: f32[1,128], index: 11, kind: input, shape index: {}]   ;;  %s4478_s12 = inlined_call_operand.vmem [shape: f32[64,128], index: 12, kind: input, shape index: {}]   ;;  %s4479_s13 = inlined_call_operand.vmem [shape: f32[1,128], index: 13, kind: input, shape index: {}]   ;;  %s4480_s14 = inlined_call_operand.vmem [shape: f32[128,512], index: 14, kind: input, shape index: {}]   ;;  %s4481_s15 = inlined_call_operand.vmem [shape: f32[1,512], index: 15, kind: input, shape index: {}]   ;;  %s4482_s16 = inlined_call_operand.vmem [shape: f32[512,2], index: 16, kind: input, shape index: {}]   ;;  %s4483_s17 = inlined_call_operand.vmem [shape: f32[1,2], index: 17, kind: input, shape index: {}]   ;;  %s4484_s18 = inlined_call_operand.hbm [shape: f32[2,1,2], index: 18, kind: output, shape index: {}]  }
   0x1   :  { %4491 = sst [smem:[#allocation16_spill]] %s4466_s0 }
   0x2   :  { %4492 = sst [smem:[#allocation17_spill]] %s4467_s1 }
   0x3   :  { %4493 = sst [smem:[#allocation18_spill]] %s4468_s2 }
   0x4   :  { %4494 = sst [smem:[#allocation19_spill]] %s4469_s3 }
   0x5   :  { %4495 = sst [smem:[#allocation20_spill]] %s4470_s4 }
   0x6   :  { %23 = vsyncpa [#allocation9], 0 }
   0x7   :  { %25 = vsyncpa [#allocation9 + $0x1], 0  ;;  %s3564_s27 = smov 0   ;;  %s3566_s28 = smov 0  }
   0x8   :  { %s3568_s29 = smov 0   ;;  %s3570_s30 = smov 0  }
   0x9 LB: > { %4496 = sst [smem:[#allocation11_spill]] %s3452_s27  ;;  %s3585_s0 = sadd.s32 4294967295, %s3464_s30   ;;  %s3464_s30 = sphi %s3570_s30, %s4510_s30   ;;  %s3460_s29 = sphi %s3568_s29, %s4512_s29   ;;  %s3456_s28 = sphi %s3566_s28, %s4514_s28   ;;  %s3452_s27 = sphi %s3564_s27, %s4513_s27  }
   0xa   : > { %4497 = sst [smem:[#allocation12_spill]] %s3460_s29  ;;  %s2822_s19 = sadd.s32 4294967294, %s3464_s30  }
   0xb   : > { %s3589_s1 = sadd.s32 1, %s3464_s30   ;;  %s421_s20 = sadd.s32 1, %s3460_s29 }
   0xc   : > { %4498 = sst [smem:[#allocation13_spill]] %s3589_s1  ;;  %s418_s21 = ssub.s32 %s3464_s30, %s3589_s1 }
   0xd   : > { %p431_p0 = scmp.ne.s32.totalorder %s3460_s29, %s3456_s28  ;;  %p419_p1 = scmp.eq.s32.totalorder %s418_s21, 0 }
   0xe   : > { %p432_p2 = scmp.eq.s32.totalorder %s3585_s0, 1  ;;  %p437_p3 = scmp.ne.s32.totalorder %s3456_s28, %s3452_s27 }
   0xf   : > { %p438_p4 = scmp.eq.s32.totalorder %s2822_s19, 1  ;;  %p2825_p7 = scmp.ge.s32.totalorder %s3464_s30, 1 }
  0x10   : > { %s3600_s22 = scalar_select %p419_p1, %s3460_s29, %s421_s20  }
  0x11   : > { %p3602_p5 = por %p432_p2, %p431_p0  ;;  %p3606_p6 = por %p438_p4, %p437_p3 }
  0x12   : > { %4499 = sst [smem:[#allocation14_spill]] %s3600_s22  ;;  %p515_p8 = scmp.lt.s32.totalorder %s3464_s30, 3 }
  0x13   : > { %s4501_s23 = scalar_select %p3606_p6, 1, 0 }
  0x14   : > { %p516_p9 = pnand %p2825_p7, %p515_p8 }
  0x15   : > { %4502 = sst [smem:[#allocation15_spill]] %s4501_s23  ;;  %p568_p10 = scmp.lt.s32.totalorder (!%p516_p9), %s3585_s0, 1 }
  0x16   : > { %519 = sbr.rel (%p516_p9) target bundleno = 1202 (0x4b2), region = 92  ;;  %s4503_s26 = sld [smem:[#allocation17_spill]] (!%p516_p9) }
  0x17   : > { %s4504_s23 = sld [smem:[#allocation16_spill]] (!%p516_p9)  ;;  %s566_s1 = sand.u32 (!%p516_p9), 1, %s3456_s28  }
  0x18   : > { %s4505_s4 = sld [smem:[#allocation20_spill]] (!%p516_p9)  ;;  %s2755_s29 = scalar_lea.sflag (!%p516_p9), [#allocation9], %s566_s1 }
  0x19   : > { %s4507_s3 = sld [smem:[#allocation19_spill]] (!%p516_p9) }
  0x1b   : > { %vm613_vm0 = vcmask 1043456   ;;  %vm577_vm1 = vcmask 97280   ;;  %vm582_vm2 = vcmask 93184   ;;  %s569_s21 = scalar_select %p568_p10, %s3585_s0, 1  ;;  %v3466_v2 = vmov 0.0  }
  0x1c   : > { %v2829_v0 = vld [vmem:[%s4503_s26 + $0x18] sm:$0xf]  ;;  %v2828_v1 = vld [vmem:[%s4503_s26 + $0x10] sm:$0xff]  ;;  %578 = vst.msk [vmem:[#allocation2] sm:$0xff] %vm577_vm1, %v3466_v2  ;;  %579 = vst.msk [vmem:[#allocation2 + $0x8] sm:$0xff] %vm577_vm1, %v3466_v2  ;;  %vm1161_vm3 = vcmask 261120  }
  0x1d   : > { %3359 = vmatprep.subr.msk.mxu1 %vm613_vm0, %v2829_v0  ;;  %3129 = vmatprep.subr.msk.mxu0 %vm613_vm0, %v2829_v0  ;;  %580 = vst.msk [vmem:[#allocation2 + $0x10] sm:$0xff] %vm577_vm1, %v3466_v2  ;;  %581 = vst.msk [vmem:[#allocation2 + $0x18] sm:$0xff] %vm577_vm1, %v3466_v2  ;;  %v593_v3 = vld [vmem:[%s4503_s26 + $0x8] sm:$0xf]  ;;  %s2938_s22 = sshll.u32 %s569_s21, 5  ;;  %v592_v13 = vld [vmem:[%s4503_s26] sm:$0xff] }
  0x1e   : > { %3361 = vmatpush3.msk.msra.mxu1 %vm613_vm0, %v2829_v0  ;;  %3130 = vmatpush3.msk.msra.mxu0 %vm613_vm0, %v2829_v0  ;;  %583 = vst.msk [vmem:[#allocation2 + $0x20] sm:$0xf] %vm582_vm2, %v3466_v2  ;;  %v2841_v4 = vld [vmem:[%s4503_s26 + $0x28] sm:$0xf]  ;;  %s572_s27 = scalar_lea.vmem %s4504_s23, %s2938_s22  ;;  %v2840_v14 = vld [vmem:[%s4503_s26 + $0x20] sm:$0xff]  ;;  %v2847_v23 = vld [vmem:[%s4503_s26 + $0x30] sm:$0xff] }
  0x1f   : > { %3360 = vmatprep.subr.mxu1 %v2828_v1  ;;  %3131 = vmatprep.subr.mxu0 %v2828_v1  ;;  %v573_v5 = vld [vmem:[%s572_s27] sm:$0xff]  ;;  %v574_v6 = vld [vmem:[%s572_s27 + $0x8] sm:$0xff]  ;;  %v575_v7 = vld [vmem:[%s572_s27 + $0x10] sm:$0xff]  ;;  %1193 = vst.msk [vmem:[#allocation4] sm:$0xff] %vm1161_vm3, %v3466_v2  ;;  %vm1195_vm4 = vcmask 254976   ;;  %vm1198_vm5 = vcmask 259072  }
  0x20   : > { %3362 = vmatpush3.msra.mxu1 %v2828_v1  ;;  %3132 = vmatpush3.msra.mxu0 %v2828_v1  ;;  %584 = vst.msk [vmem:[#allocation2 + $0x2] sm:$0xff] %vm577_vm1, %v573_v5  ;;  %585 = vst.msk [vmem:[#allocation2 + $0xa] sm:$0xff] %vm577_vm1, %v574_v6  ;;  %v576_v8 = vld [vmem:[%s572_s27 + $0x18] sm:$0xff]  ;;  %v2855_v20 = vld [vmem:[%s4503_s26 + $0x48] sm:$0xf]  ;;  %s4506_s27 = sld [smem:[#allocation18_spill]] }
  0x21   : > { %3139 = vmatprep.subr.msk.mxu1 %vm613_vm0, %v593_v3  ;;  %3149 = vmatprep.subr.msk.mxu0 %vm613_vm0, %v2841_v4  ;;  %586 = vst.msk [vmem:[#allocation2 + $0x12] sm:$0xff] %vm577_vm1, %v575_v7  ;;  %587 = vst.msk [vmem:[#allocation2 + $0x1a] sm:$0xff] %vm577_vm1, %v576_v8  ;;  %v2848_v17 = vld [vmem:[%s4503_s26 + $0x38] sm:$0xf]  ;;  %v2854_v26 = vld [vmem:[%s4503_s26 + $0x40] sm:$0xff]  ;;  %vm1759_vm6 = vcmask 523264  }
  0x22   : > { %1194 = vst.msk [vmem:[#allocation4 + $0x8] sm:$0xff] %vm1161_vm3, %v3466_v2  ;;  %v2866_v35 = vld [vmem:[%s4505_s4 + $0x38] sm:$0xff]  ;;  %v2865_v37 = vld [vmem:[%s4505_s4 + $0x30] sm:$0xff]  ;;  %v2864_v39 = vld [vmem:[%s4505_s4 + $0x28] sm:$0xff]  ;;  %vm1777_vm7 = vcmask 516096   ;;  %vm3467_vm8 = vmmov 0  }
  0x23   : > { %v1205_v36 = vld [vmem:[%s4505_s4 + $0x18] sm:$0xff]  ;;  %v1204_v38 = vld [vmem:[%s4505_s4 + $0x10] sm:$0xff]  ;;  %v1203_v40 = vld [vmem:[%s4505_s4 + $0x8] sm:$0xff]  ;;  %1196 = vst.msk [vmem:[#allocation4 + $0x10] sm:$0x3] %vm1195_vm4, %v3466_v2  ;;  %vm1761_vm9 = vcmask 521216  }
  0x24   : > { %v2863_v41 = vld [vmem:[%s4505_s4 + $0x20] sm:$0xff]  ;;  %v3724_v43 = vld [vmem:[%s4505_s4 + $0x58] sm:$0xff]  ;;  %1776 = vst.msk [vmem:[#allocation6] sm:$0xff] %vm1759_vm6, %v3466_v2  ;;  %vm1779_vm10 = vcmask 520192   ;;  %s567_s21 = scalar_lea.vmem [#allocation8], %s566_s1  ;;  %vm2752_vm11 = vcmask 8192  }
  0x25   : > { %v1202_v42 = vld [vmem:[%s4505_s4] sm:$0xff]  ;;  %v3729_v44 = vld [vmem:[%s4505_s4 + $0x78] sm:$0xff]  ;;  %1778 = vst.msk [vmem:[#allocation6 + $0x8] sm:$0x1] %vm1777_vm7, %v3466_v2  ;;  %s2767_s24 = sshll.u32 %s567_s21, 4  ;;  %s3468_s23 = smov [#allocation8]   ;;  %s2768_s24 = int_to_ptr.vmem [resolvable:$true] %s2767_s24 }
  0x26   : > { %s3404_s22 = scalar_lea.vmem %s2768_s24, 16 }
  0x27   : > { %v594_v9 = vld [vmem:[#allocation2 + $0x1] sm:$0xff]  ;;  %v595_v11 = vld [vmem:[#allocation2 + $0x9] sm:$0xff]  ;;  %p3405_p11 = scmp.ne.s32.totalorder %s2768_s24, %s3404_s22 }
  0x28   : > { %v596_v10 = vld [vmem:[#allocation2 + $0x11] sm:$0xff]  ;;  %3133 = vmatprep.mubr.msk.f32.mxu0 %vm577_vm1, %v594_v9  ;;  %v597_v12 = vld [vmem:[#allocation2 + $0x19] sm:$0xff]  ;;  %v802_v16 = vld [vmem:[#allocation2 + $0x2] sm:$0xff] }
  0x29   : > { %3136 = vmatprep.mubr.msk.f32.mxu1 %vm577_vm1, %v596_v10  ;;  %3134 = vmatmul.mubr.msk.f32.vlgmr.msra.gmra.mxu0 %vm577_vm1, %v595_v11  ;;  %v588_v15 = vld [vmem:[#allocation2] sm:$0xff]  ;;  %v589_v18 = vld [vmem:[#allocation2 + $0x8] sm:$0xff]  ;;  %v590_v21 = vld [vmem:[#allocation2 + $0x10] sm:$0xff]  ;;  %p3406_p12 = pnand %p3405_p11, %p3602_p5 }
  0x2a   : > { %3137 = vmatmul.mubr.msk.f32.vlgmr.msra.gmra.mxu1 %vm577_vm1, %v597_v12  ;;  %3150 = vmatpush3.msk.msra.mxu0 %vm613_vm0, %v2841_v4  ;;  %v803_v19 = vld [vmem:[#allocation2 + $0xa] sm:$0xff]  ;;  %v804_v22 = vld [vmem:[#allocation2 + $0x12] sm:$0xff]  ;;  %v805_v25 = vld [vmem:[#allocation2 + $0x1a] sm:$0xff] }
  0x2b   : > { %3140 = vmatpush3.msk.msra.mxu1 %vm613_vm0, %v593_v3  ;;  %3151 = vmatprep.subr.mxu0 %v2840_v14  ;;  %v591_v24 = vld [vmem:[#allocation2 + $0x18] sm:$0xff]  ;;  %v913_v27 = vld [vmem:[#allocation2 + $0x3] sm:$0xff]  ;;  %v914_v29 = vld [vmem:[#allocation2 + $0xb] sm:$0xff]  ;;  %p3407_p13 = pneg %p3406_p12 }
  0x2c   : > { %3141 = vmatprep.subr.mxu1 %v592_v13  ;;  %3143 = vmatprep.mubr.msk.f32.mxu1 %vm577_vm1, %v588_v15  ;;  %v1024_v28 = vld [vmem:[#allocation2 + $0x4] sm:$0xff]  ;;  %v1025_v30 = vld [vmem:[#allocation2 + $0xc] sm:$0xff]  ;;  %v1026_v32 = vld [vmem:[#allocation2 + $0x14] sm:$0xff] }
  0x2d   : > { %3142 = vmatpush3.msra.mxu1 %v592_v13  ;;  %3152 = vmatpush3.msra.mxu0 %v2840_v14  ;;  %v915_v31 = vld [vmem:[#allocation2 + $0x13] sm:$0xff]  ;;  %v916_v33 = vld [vmem:[#allocation2 + $0x1b] sm:$0xff] }
  0x2e   : > { %3153 = vmatprep.mubr.msk.f32.mxu0 %vm577_vm1, %v802_v16  ;;  %3159 = vmatprep.subr.msk.mxu1 %vm613_vm0, %v2848_v17  ;;  %v1027_v34 = vld [vmem:[#allocation2 + $0x1c] sm:$0xff] }
  0x2f   : > { %3144 = vmatmul.mubr.msk.f32.vlgmr.msra.gmra.mxu1 %vm577_vm1, %v589_v18  ;;  %3154 = vmatmul.mubr.msk.f32.vlgmr.msra.gmra.mxu0 %vm577_vm1, %v803_v19  ;;  %v2861_v3 = vld [vmem:[%s4506_s27] ss:$0 sm:$0xff]  ;;  %s2935_s27 = sshll.u32 %s3585_s0, 4  ;;  %s3408_s0 = sshll.u32 %s3468_s23, 4  ;;  %s3409_s0 = int_to_ptr.vmem [resolvable:$false] %s3408_s0 }
  0x30   : > { %3160 = vmatpush3.msk.msra.mxu1 %vm613_vm0, %v2848_v17  ;;  %3169 = vmatprep.subr.msk.mxu0 %vm613_vm0, %v2855_v20  ;;  %v2862_v9 = vld [vmem:[%s4507_s3] ss:$0 sm:$0xff]  ;;  %s2765_s20 = scalar_lea.hbm %s4484_s18, %s2935_s27  ;;  %s3410_s3 = scalar_lea.vmem %s3409_s0, 32 }
  0x31   : > { %3146 = vmatprep.mubr.msk.f32.mxu1 %vm577_vm1, %v590_v21  ;;  %3170 = vmatpush3.msk.msra.mxu0 %vm613_vm0, %v2855_v20  ;;  %p3411_p0 = scmp.lt.s32.totalorder %s2768_s24, %s3409_s0  ;;  %p3412_p1 = scmp.lt.s32.totalorder %s3410_s3, %s3404_s22 }
  0x32   : > { %3156 = vmatprep.mubr.msk.f32.mxu0 %vm577_vm1, %v804_v22  ;;  %3161 = vmatprep.subr.mxu1 %v2847_v23 }
  0x33   : > { %3147 = vmatmul.mubr.msk.f32.gmra.mxu1 %vm577_vm1, %v591_v24  ;;  %3157 = vmatmul.mubr.msk.f32.gmra.mxu0 %vm577_vm1, %v805_v25  ;;  %p3413_p2 = por %p3412_p1, %p3411_p0 }
  0x34   : > { %3162 = vmatpush3.msra.mxu1 %v2847_v23  ;;  %3171 = vmatprep.subr.mxu0 %v2854_v26 }
  0x35   : > { %3163 = vmatprep.mubr.msk.f32.mxu1 %vm577_vm1, %v913_v27  ;;  %3172 = vmatpush3.msra.mxu0 %v2854_v26  ;;  %p3414_p3 = pnand %p3413_p2, %p3407_p13 }
  0x36   : > { %3173 = vmatprep.mubr.msk.f32.mxu0 %vm577_vm1, %v1024_v28  ;;  %3179 = vmatprep.subr.mxu1 %v2866_v35 }
  0x37   : > { %3164 = vmatmul.mubr.msk.f32.vlgmr.msra.gmra.mxu1 %vm577_vm1, %v914_v29  ;;  %3174 = vmatmul.mubr.msk.f32.vlgmr.msra.gmra.mxu0 %vm577_vm1, %v1025_v30 }
  0x38   : > { %3166 = vmatprep.mubr.msk.f32.mxu1 %vm577_vm1, %v915_v31  ;;  %3176 = vmatprep.mubr.msk.f32.mxu0 %vm577_vm1, %v1026_v32 }
  0x39   : > { %3190 = vmatprep.subr.mxu0 %v1205_v36  ;;  %3180 = vmatpush3.msra.mxu1 %v2866_v35 }
  0x3a   : > { %3191 = vmatpush3.msra.mxu0 %v1205_v36  ;;  %3181 = vmatprep.subr.mxu1 %v2865_v37 }
  0x3b   : > { %3167 = vmatmul.mubr.msk.f32.gmra.mxu1 %vm577_vm1, %v916_v33  ;;  %3177 = vmatmul.mubr.msk.f32.gmra.mxu0 %vm577_vm1, %v1027_v34 }
  0x3c   : > { %3192 = vmatprep.subr.mxu0 %v1204_v38  ;;  %3182 = vmatpush3.msra.mxu1 %v2865_v37 }
  0x3d   : > { %3193 = vmatpush3.msra.mxu0 %v1204_v38  ;;  %3183 = vmatprep.subr.mxu1 %v2864_v39 }
  0x3e   : > { %3194 = vmatprep.subr.mxu0 %v1203_v40  ;;  %3184 = vmatpush3.msra.mxu1 %v2864_v39 }
  0x3f   : > { %3195 = vmatpush3.msra.mxu0 %v1203_v40  ;;  %3185 = vmatprep.subr.mxu1 %v2863_v41 }
  0x40   : > { %3196 = vmatprep.subr.mxu0 %v1202_v42  ;;  %3186 = vmatpush3.msra.mxu1 %v2863_v41 }
  0x41   : > { %3197 = vmatpush3.msra.mxu0 %v1202_v42  ;;  %3201 = vmatprep.subr.mxu1 %v3724_v43 }
  0x42   : > { %3212 = vmatprep.subr.mxu0 %v3729_v44 }
  0xe9   : > { %v3135_v45 = vpop.f32.mrf.mxu0 }
  0xea   : > { %v3138_v46 = vpop.f32.mrf.mxu1 }
  0xeb   : > { %v683_v47 = vpop.f32.mrf.mxu0 }
  0xec   : > { %v693_v48 = vpop.f32.mrf.mxu1 }
  0xef   : > { %v3145_v49 = vpop.f32.mrf.mxu1  ;;  %v3155_v50 = vpop.f32.mrf.mxu0 }
  0xf0   : > { %v789_v52 = vadd.f32 %v3145_v49, %v3135_v45 }
  0xf1   : > { %v783_v51 = vpop.f32.mrf.mxu1  ;;  %v890_v53 = vpop.f32.mrf.mxu0 }
  0xf2   : > { %v784_v55 = vadd.f32 %v783_v51, %v683_v47  ;;  %v910_v58 = vadd.f32 %v3155_v50, %v789_v52 }
  0xf3   : > { %v3148_v54 = vpop.f32.mrf.mxu1  ;;  %v3158_v56 = vpop.f32.mrf.mxu0 }
  0xf4   : > { %v799_v59 = vadd.f32 %v3148_v54, %v3138_v46  ;;  %v909_v62 = vadd.f32 %v890_v53, %v784_v55 }
  0xf5   : > { %v793_v57 = vpop.f32.mrf.mxu1  ;;  %v900_v60 = vpop.f32.mrf.mxu0 }
  0xf6   : > { %v794_v63 = vadd.f32 %v793_v57, %v693_v48  ;;  %v912_v5 = vadd.f32 %v3158_v56, %v799_v59  ;;  %v2873_v56 = vld [vmem:[%s4505_s4 + $0x50] sm:$0xff] }
  0xf7   : > { %v3165_v61 = vpop.f32.mrf.mxu1  ;;  %v3175_v1 = vpop.f32.mrf.mxu0  ;;  %v2879_v57 = vld [vmem:[%s4505_s4 + $0x70] sm:$0xff] }
  0xf8   : > { %v1021_v0 = vadd.f32 %v3165_v61, %v910_v58  ;;  %v911_v11 = vadd.f32 %v900_v60, %v794_v63  ;;  %v2872_v60 = vld [vmem:[%s4505_s4 + $0x48] sm:$0xff]  ;;  %v1668_v63 = vld [vmem:[%s4473_s7 + $0x18] sm:$0xff] }
  0xf9   : > { %v1001_v4 = vpop.f32.mrf.mxu1  ;;  %v1112_v8 = vpop.f32.mrf.mxu0  ;;  %v2878_v61 = vld [vmem:[%s4505_s4 + $0x68] sm:$0xff] }
  0xfa   : > { %v1132_v6 = vadd.f32 %v3175_v1, %v1021_v0  ;;  %v1020_v7 = vadd.f32 %v1001_v4, %v909_v62  ;;  %v2886_v62 = vld [vmem:[%s4505_s4 + $0x98] sm:$0xff]  ;;  %v2885_v4 = vld [vmem:[%s4505_s4 + $0x90] sm:$0xff] }
  0xfb   : > { %v3168_v10 = vpop.f32.mrf.mxu1  ;;  %v3178_v15 = vpop.f32.mrf.mxu0 }
  0xfc   : > { %v1143_v12 = vmul.f32 %v2861_v3, %v1132_v6  ;;  %v1131_v13 = vadd.f32 %v1112_v8, %v1020_v7  ;;  %v1023_v14 = vadd.f32 %v3168_v10, %v912_v5  ;;  %v1667_v5 = vld [vmem:[%s4473_s7 + $0x10] sm:$0xff]  ;;  %v2884_v6 = vld [vmem:[%s4505_s4 + $0x88] sm:$0xff]  ;;  %v2883_v8 = vld [vmem:[%s4505_s4 + $0x80] sm:$0xff] }
  0xfd   : > { %v1011_v16 = vpop.f32.mrf.mxu1  ;;  %v1122_v21 = vpop.f32.mrf.mxu0  ;;  %v1666_v7 = vld [vmem:[%s4473_s7 + $0x8] sm:$0xff] }
  0xfe   : > { %v1154_v17 = vadd.f32 %v2862_v9, %v1143_v12  ;;  %v1142_v18 = vmul.f32 %v2861_v3, %v1131_v13  ;;  %v1134_v19 = vadd.f32 %v3178_v15, %v1023_v14  ;;  %v1022_v20 = vadd.f32 %v1011_v16, %v911_v11  ;;  %v2901_v11 = vld [vmem:[%s4475_s9 + $0x78] sm:$0xff]  ;;  %v2900_v13 = vld [vmem:[%s4475_s9 + $0x70] sm:$0xff]  ;;  %v2899_v15 = vld [vmem:[%s4475_s9 + $0x68] sm:$0xff] }
  0xff   : > { %v1789_v12 = vld [vmem:[%s4475_s9 + $0x38] sm:$0xff]  ;;  %v1788_v14 = vld [vmem:[%s4475_s9 + $0x30] sm:$0xff]  ;;  %v1787_v16 = vld [vmem:[%s4475_s9 + $0x28] sm:$0xff] }
 0x100   : > { %v1158_v22 = vmax.f32 %v1154_v17, 0.0  ;;  %v1153_v23 = vadd.f32 %v2862_v9, %v1142_v18  ;;  %v1145_v24 = vmul.f32 %v2861_v3, %v1134_v19  ;;  %v1133_v25 = vadd.f32 %v1122_v21, %v1022_v20  ;;  %v2898_v17 = vld [vmem:[%s4475_s9 + $0x60] sm:$0xff]  ;;  %v2897_v19 = vld [vmem:[%s4475_s9 + $0x58] sm:$0xff]  ;;  %v2896_v21 = vld [vmem:[%s4475_s9 + $0x50] sm:$0xff] }
 0x101   : > { %v1786_v18 = vld [vmem:[%s4475_s9 + $0x20] sm:$0xff]  ;;  %v1785_v20 = vld [vmem:[%s4475_s9 + $0x18] sm:$0xff] }
 0x102   : > { %1163 = vst.msk [vmem:[#allocation3 + $0x8] sm:$0xff] %vm1161_vm3, %v1158_v22  ;;  %v1157_v26 = vmax.f32 %v1153_v23, 0.0  ;;  %v1156_v27 = vadd.f32 %v2862_v9, %v1145_v24  ;;  %v1144_v28 = vmul.f32 %v2861_v3, %v1133_v25  ;;  %v1784_v22 = vld [vmem:[%s4475_s9 + $0x10] sm:$0xff]  ;;  %v2895_v23 = vld [vmem:[%s4475_s9 + $0x48] sm:$0xff]  ;;  %v2894_v25 = vld [vmem:[%s4475_s9 + $0x40] sm:$0xff] }
 0x103   : > { %v1783_v24 = vld [vmem:[%s4475_s9 + $0x8] sm:$0xff] }
 0x104   : > { %1162 = vst.msk [vmem:[#allocation3] sm:$0xff] %vm1161_vm3, %v1157_v26  ;;  %v1160_v29 = vmax.f32 %v1156_v27, 0.0  ;;  %v1155_v30 = vadd.f32 %v2862_v9, %v1144_v28  ;;  %v1665_v9 = vld [vmem:[%s4473_s7] sm:$0xff] }
 0x105   : > { %v1782_v26 = vld [vmem:[%s4475_s9] sm:$0xff] }
 0x106   : > { %1165 = vst.msk [vmem:[#allocation3 + $0x18] sm:$0xff] %vm1161_vm3, %v1160_v29  ;;  %v1159_v31 = vmax.f32 %v1155_v30, 0.0 }
 0x108   : > { %1164 = vst.msk [vmem:[#allocation3 + $0x10] sm:$0xff] %vm1161_vm3, %v1159_v31 }
 0x10b   : > { %v1166_v32 = vld [vmem:[#allocation3] ss:$2 sm:$0xff]  ;;  %v1170_v33 = vld [vmem:[#allocation3 + $0x1] ss:$2 sm:$0xff] }
 0x10c   : > { %v1173_v34 = vmax.f32 %v1166_v32, %v1170_v33 }
 0x10f   : > { %v1168_v35 = vld [vmem:[#allocation3 + $0x10] ss:$2 sm:$0x3f]  ;;  %v1172_v36 = vld [vmem:[#allocation3 + $0x11] ss:$2 sm:$0x3f] }
 0x110   : > { %v1174_v37 = vmax.f32 %v1168_v35, %v1172_v36  ;;  %v1176_v38 = vld [vmem:[#allocation3 + $0x2] ss:$2 sm:$0xff]  ;;  %v1178_v39 = vld [vmem:[#allocation3 + $0x12] ss:$2 sm:$0x3f] }
 0x111   : > { %v1179_v40 = vmax.f32 %v1173_v34, %v1176_v38  ;;  %v1182_v42 = vld [vmem:[#allocation3 + $0x3] ss:$2 sm:$0xff]  ;;  %v1184_v45 = vld [vmem:[#allocation3 + $0x13] ss:$2 sm:$0x3f] }
 0x112   : > { %v1180_v41 = vmax.f32 %v1174_v37, %v1178_v39  ;;  %v1188_v48 = vld [vmem:[#allocation3 + $0x4] ss:$2 sm:$0xff]  ;;  %v1190_v49 = vld [vmem:[#allocation3 + $0x14] ss:$2 sm:$0x3f] }
 0x113   : > { %v1185_v46 = vmax.f32 %v1179_v40, %v1182_v42 }
 0x114   : > { %v1186_v47 = vmax.f32 %v1180_v41, %v1184_v45  ;;  %v2889_v41 = vld [vmem:[%s4471_s5] ss:$0 sm:$0xff] }
 0x115   : > { %v1191_v50 = vmax.f32 %v1185_v46, %v1188_v48  ;;  %v2890_v46 = vld [vmem:[%s4472_s6] ss:$0 sm:$0xff] }
 0x116   : > { %v3743_v51 = vmax.f32 %v1186_v47, %v1190_v49 }
 0x117   : > { %1197 = vst.msk [vmem:[#allocation4 + $0x2] sm:$0xff] %vm1161_vm3, %v1191_v50 }
 0x118   : > { %1199 = vst.msk [vmem:[#allocation4 + $0xa] sm:$0x3f] %vm1198_vm5, %v3743_v51 }
 0x11e   : > { %v1206_v52 = vld [vmem:[#allocation4 + $0x1] sm:$0xff] }
 0x11f   : > { %v1200_v53 = vld [vmem:[#allocation4] sm:$0xff]  ;;  %3187 = vmatprep.mubr.msk.f32.mxu1 %vm1161_vm3, %v1206_v52  ;;  %v1207_v54 = vld [vmem:[#allocation4 + $0x9] sm:$0x3f] }
 0x120   : > { %3198 = vmatprep.mubr.msk.f32.mxu0 %vm1161_vm3, %v1200_v53  ;;  %v1201_v55 = vld [vmem:[#allocation4 + $0x8] sm:$0x3f]  ;;  %3188 = vmatmul.mubr.msk.f32.vlgmr.msra.gmra.mxu1 %vm1161_vm3, %v1207_v54 }
 0x121   : > { %3199 = vmatmul.mubr.msk.f32.vlgmr.msra.gmra.mxu0 %vm1161_vm3, %v1201_v55  ;;  %v1465_v58 = vld [vmem:[#allocation4 + $0x3] sm:$0xff]  ;;  %3202 = vmatpush3.msra.mxu1 %v3724_v43  ;;  %v2871_v43 = vld [vmem:[%s4505_s4 + $0x40] sm:$0xff]  ;;  %v1466_v1 = vld [vmem:[#allocation4 + $0xb] sm:$0x3f] }
 0x122   : > { %3213 = vmatpush3.msra.mxu0 %v3729_v44  ;;  %v1375_v59 = vld [vmem:[#allocation4 + $0x2] sm:$0xff]  ;;  %3203 = vmatprep.subr.mxu1 %v2873_v56  ;;  %v2877_v44 = vld [vmem:[%s4505_s4 + $0x60] sm:$0xff]  ;;  %v1376_v0 = vld [vmem:[#allocation4 + $0xa] sm:$0x3f] }
 0x123   : > { %3209 = vmatprep.mubr.msk.f32.mxu1 %vm1161_vm3, %v1375_v59  ;;  %3214 = vmatprep.subr.mxu0 %v2879_v57  ;;  %v1555_v3 = vld [vmem:[#allocation4 + $0x4] sm:$0xff]  ;;  %v1556_v10 = vld [vmem:[#allocation4 + $0xc] sm:$0x3f] }
 0x124   : > { %3220 = vmatprep.mubr.msk.f32.mxu0 %vm1161_vm3, %v1465_v58  ;;  %3204 = vmatpush3.msra.mxu1 %v2873_v56 }
 0x125   : > { %3215 = vmatpush3.msra.mxu0 %v2879_v57  ;;  %3205 = vmatprep.subr.mxu1 %v2872_v60 }
 0x126   : > { %3216 = vmatprep.subr.mxu0 %v2878_v61  ;;  %3206 = vmatpush3.msra.mxu1 %v2872_v60 }
 0x127   : > { %3217 = vmatpush3.msra.mxu0 %v2878_v61  ;;  %3207 = vmatprep.subr.mxu1 %v2871_v43 }
 0x128   : > { %3218 = vmatprep.subr.mxu0 %v2877_v44  ;;  %3208 = vmatpush3.msra.mxu1 %v2871_v43 }
 0x129   : > { %3219 = vmatpush3.msra.mxu0 %v2877_v44  ;;  %3210 = vmatmul.mubr.msk.f32.vlgmr.msra.gmra.mxu1 %vm1161_vm3, %v1376_v0 }
 0x12a   : > { %3221 = vmatmul.mubr.msk.f32.vlgmr.msra.gmra.mxu0 %vm1161_vm3, %v1466_v1  ;;  %3223 = vmatprep.subr.mxu1 %v2886_v62 }
 0x12b   : > { %3234 = vmatprep.subr.mxu0 %v1668_v63  ;;  %3224 = vmatpush3.msra.mxu1 %v2886_v62 }
 0x12c   : > { %3231 = vmatprep.mubr.msk.f32.mxu1 %vm1161_vm3, %v1555_v3  ;;  %3235 = vmatpush3.msra.mxu0 %v1668_v63 }
 0x12d   : > { %3242 = vmatprep.mubr.msk.f32.mxu0 %vm1161_vm3, %v1191_v50  ;;  %3225 = vmatprep.subr.mxu1 %v2885_v4 }
 0x12e   : > { %3236 = vmatprep.subr.mxu0 %v1667_v5  ;;  %3226 = vmatpush3.msra.mxu1 %v2885_v4 }
 0x12f   : > { %3237 = vmatpush3.msra.mxu0 %v1667_v5  ;;  %3227 = vmatprep.subr.mxu1 %v2884_v6 }
 0x130   : > { %3238 = vmatprep.subr.mxu0 %v1666_v7  ;;  %3228 = vmatpush3.msra.mxu1 %v2884_v6  ;;  %v2911_v6 = vld [vmem:[%s4475_s9 + $0xb8] sm:$0xff] }
 0x131   : > { %3239 = vmatpush3.msra.mxu0 %v1666_v7  ;;  %3229 = vmatprep.subr.mxu1 %v2883_v8  ;;  %v2920_v7 = vld [vmem:[%s4475_s9 + $0xf8] sm:$0xff] }
 0x132   : > { %3240 = vmatprep.subr.mxu0 %v1665_v9  ;;  %3230 = vmatpush3.msra.mxu1 %v2883_v8 }
 0x133   : > { %3241 = vmatpush3.msra.mxu0 %v1665_v9  ;;  %3232 = vmatmul.mubr.msk.f32.vlgmr.msra.gmra.mxu1 %vm1161_vm3, %v1556_v10  ;;  %v2910_v10 = vld [vmem:[%s4475_s9 + $0xb0] sm:$0xff] }
 0x134   : > { %3243 = vmatmul.mubr.msk.f32.vlgmr.msra.gmra.mxu0 %vm1161_vm3, %v3743_v51  ;;  %3245 = vmatprep.subr.mxu1 %v3466_v2  ;;  %v2891_v51 = vld [vmem:[%s4474_s8] ss:$0 sm:$0xff] }
 0x135   : > { %3264 = vmatprep.subr.mxu0 %v3466_v2  ;;  %3246 = vmatpush3.msra.mxu1 %v2901_v11  ;;  %v2919_v11 = vld [vmem:[%s4475_s9 + $0xf0] sm:$0xff] }
 0x136   : > { %3265 = vmatpush3.msra.mxu0 %v1789_v12  ;;  %3247 = vmatprep.subr.mxu1 %v3466_v2  ;;  %v2909_v12 = vld [vmem:[%s4475_s9 + $0xa8] sm:$0xff] }
 0x137   : > { %3266 = vmatprep.subr.mxu0 %v3466_v2  ;;  %3248 = vmatpush3.msra.mxu1 %v2900_v13  ;;  %v2918_v13 = vld [vmem:[%s4475_s9 + $0xe8] sm:$0xff] }
 0x138   : > { %3267 = vmatpush3.msra.mxu0 %v1788_v14  ;;  %3249 = vmatprep.subr.mxu1 %v3466_v2  ;;  %v2908_v14 = vld [vmem:[%s4475_s9 + $0xa0] sm:$0xff] }
 0x139   : > { %3268 = vmatprep.subr.mxu0 %v3466_v2  ;;  %3250 = vmatpush3.msra.mxu1 %v2899_v15  ;;  %v2917_v15 = vld [vmem:[%s4475_s9 + $0xe0] sm:$0xff] }
 0x13a   : > { %3269 = vmatpush3.msra.mxu0 %v1787_v16  ;;  %3251 = vmatprep.subr.mxu1 %v3466_v2  ;;  %v2907_v16 = vld [vmem:[%s4475_s9 + $0x98] sm:$0xff] }
 0x13b   : > { %3270 = vmatprep.subr.mxu0 %v3466_v2  ;;  %3252 = vmatpush3.msra.mxu1 %v2898_v17  ;;  %v2916_v17 = vld [vmem:[%s4475_s9 + $0xd8] sm:$0xff] }
 0x13c   : > { %3271 = vmatpush3.msra.mxu0 %v1786_v18  ;;  %3253 = vmatprep.subr.mxu1 %v3466_v2  ;;  %v2906_v18 = vld [vmem:[%s4475_s9 + $0x90] sm:$0xff] }
 0x13d   : > { %3272 = vmatprep.subr.mxu0 %v3466_v2  ;;  %3254 = vmatpush3.msra.mxu1 %v2897_v19  ;;  %v2915_v19 = vld [vmem:[%s4475_s9 + $0xd0] sm:$0xff] }
 0x13e   : > { %3273 = vmatpush3.msra.mxu0 %v1785_v20  ;;  %3255 = vmatprep.subr.mxu1 %v3466_v2  ;;  %v2905_v20 = vld [vmem:[%s4475_s9 + $0x88] sm:$0xff] }
 0x13f   : > { %3274 = vmatprep.subr.mxu0 %v3466_v2  ;;  %3256 = vmatpush3.msra.mxu1 %v2896_v21  ;;  %v2914_v21 = vld [vmem:[%s4475_s9 + $0xc8] sm:$0xff] }
 0x140   : > { %3275 = vmatpush3.msra.mxu0 %v1784_v22  ;;  %3257 = vmatprep.subr.mxu1 %v3466_v2  ;;  %v2904_v22 = vld [vmem:[%s4475_s9 + $0x80] sm:$0xff] }
 0x141   : > { %3276 = vmatprep.subr.mxu0 %v3466_v2  ;;  %3258 = vmatpush3.msra.mxu1 %v2895_v23  ;;  %v2913_v23 = vld [vmem:[%s4475_s9 + $0xc0] sm:$0xff] }
 0x142   : > { %3277 = vmatpush3.msra.mxu0 %v1783_v24  ;;  %3259 = vmatprep.subr.mxu1 %v3466_v2  ;;  %v2929_v24 = vld [vmem:[%s4475_s9 + $0x138] sm:$0xff] }
 0x143   : > { %3278 = vmatprep.subr.mxu0 %v3466_v2  ;;  %3260 = vmatpush3.msra.mxu1 %v2894_v25 }
 0x144   : > { %3279 = vmatpush3.msra.mxu0 %v1782_v26  ;;  %3261 = vmatprep.mubr.msk.f32.mxu1 %vm3467_vm8, %v3466_v2 }
 0x145   : > { %3280 = vmatprep.mubr.msk.f32.mxu0 %vm3467_vm8, %v3466_v2  ;;  %3283 = vmatprep.subr.mxu1 %v3466_v2 }
 0x146   : > { %3302 = vmatprep.subr.mxu0 %v3466_v2 }
 0x1e0   : > { %v3189_v27 = vpop.f32.mrf.mxu1 }
 0x1e1   : > { %v3200_v28 = vpop.f32.mrf.mxu0 }
 0x1e2   : > { %v1285_v29 = vpop.f32.mrf.mxu1  ;;  %v1372_v32 = vadd.f32 %v3200_v28, %v3189_v27  ;;  %v2222_v27 = vld [vmem:[%s4478_s12 + $0x38] sm:$0xff]  ;;  %v2928_v28 = vld [vmem:[%s4475_s9 + $0x130] sm:$0xff] }
 0x1e3   : > { %v1366_v31 = vpop.f32.mrf.mxu0 }
 0x1e4   : > { %v1367_v34 = vadd.f32 %v1366_v31, %v1285_v29  ;;  %v2221_v29 = vld [vmem:[%s4478_s12 + $0x30] sm:$0xff]  ;;  %v2220_v31 = vld [vmem:[%s4478_s12 + $0x28] sm:$0xff] }
 0x1e9   : > { %v3211_v30 = vpop.f32.mrf.mxu1 }
 0x1ea   : > { %v1464_v35 = vadd.f32 %v3211_v30, %v1372_v32  ;;  %v3222_v36 = vpop.f32.mrf.mxu0  ;;  %v2927_v30 = vld [vmem:[%s4475_s9 + $0x128] sm:$0xff]  ;;  %v2926_v32 = vld [vmem:[%s4475_s9 + $0x120] sm:$0xff] }
 0x1eb   : > { %v1454_v33 = vpop.f32.mrf.mxu1 }
 0x1ec   : > { %v1463_v37 = vadd.f32 %v1454_v33, %v1367_v34  ;;  %v1554_v38 = vadd.f32 %v3222_v36, %v1464_v35  ;;  %v1544_v39 = vpop.f32.mrf.mxu0  ;;  %v2219_v33 = vld [vmem:[%s4478_s12 + $0x20] sm:$0xff]  ;;  %v2925_v34 = vld [vmem:[%s4475_s9 + $0x118] sm:$0xff]  ;;  %v2924_v36 = vld [vmem:[%s4475_s9 + $0x110] sm:$0xff] }
 0x1ed   : > { %v2218_v35 = vld [vmem:[%s4478_s12 + $0x18] sm:$0xff] }
 0x1ee   : > { %v1553_v42 = vadd.f32 %v1544_v39, %v1463_v37  ;;  %v2217_v37 = vld [vmem:[%s4478_s12 + $0x10] sm:$0xff]  ;;  %v2216_v39 = vld [vmem:[%s4478_s12 + $0x8] sm:$0xff] }
 0x1f3   : > { %v3233_v40 = vpop.f32.mrf.mxu1 }
 0x1f4   : > { %v1644_v45 = vadd.f32 %v3233_v40, %v1554_v38  ;;  %v3244_v47 = vpop.f32.mrf.mxu0  ;;  %v2923_v38 = vld [vmem:[%s4475_s9 + $0x108] sm:$0xff]  ;;  %v2922_v40 = vld [vmem:[%s4475_s9 + $0x100] sm:$0xff] }
 0x1f5   : > { %v1634_v48 = vpop.f32.mrf.mxu1  ;;  %v1754_v56 = vadd.f32 %v3244_v47, %v2891_v51  ;;  %v2379_v47 = vld [vmem:[%s4480_s14 + $0x1e0] sm:$0xff] }
 0x1f6   : > { %v1653_v49 = vmul.f32 %v2889_v41, %v1644_v45  ;;  %v1643_v50 = vadd.f32 %v1634_v48, %v1553_v42  ;;  %v1748_v54 = vpop.f32.mrf.mxu0  ;;  %v2380_v45 = vld [vmem:[%s4480_s14 + $0x1e8] sm:$0xff]  ;;  %v2381_v48 = vld [vmem:[%s4480_s14 + $0x1f0] sm:$0xff] }
 0x1f7   : > { %v1749_v60 = vadd.f32 %v2891_v51, %v1748_v54  ;;  %v2377_v51 = vld [vmem:[%s4480_s14 + $0x1d0] sm:$0xff]  ;;  %v2371_v54 = vld [vmem:[%s4480_s14 + $0x1a0] sm:$0xff] }
 0x1f8   : > { %v1662_v52 = vadd.f32 %v2890_v46, %v1653_v49  ;;  %v1652_v53 = vmul.f32 %v2889_v41, %v1643_v50  ;;  %v2215_v41 = vld [vmem:[%s4478_s12] sm:$0xff]  ;;  %v2378_v49 = vld [vmem:[%s4480_s14 + $0x1d8] sm:$0xff] }
 0x1f9   : > { %v2375_v50 = vld [vmem:[%s4480_s14 + $0x1c0] sm:$0xff] }
 0x1fa   : > { %v1664_v55 = vmax.f32 %v1662_v52, 0.0  ;;  %v1661_v57 = vadd.f32 %v2890_v46, %v1652_v53  ;;  %v2382_v46 = vld [vmem:[%s4480_s14 + $0x1f8] sm:$0xff]  ;;  %v2372_v52 = vld [vmem:[%s4480_s14 + $0x1a8] sm:$0xff] }
 0x1fb   : > { %v2374_v53 = vld [vmem:[%s4480_s14 + $0x1b8] sm:$0xff] }
 0x1fc   : > { %v1758_v58 = vadd.f32 %v1754_v56, %v1664_v55  ;;  %v1663_v59 = vmax.f32 %v1661_v57, 0.0  ;;  %v2373_v55 = vld [vmem:[%s4480_s14 + $0x1b0] sm:$0xff]  ;;  %v2368_v56 = vld [vmem:[%s4480_s14 + $0x188] sm:$0xff]  ;;  %v2370_v57 = vld [vmem:[%s4480_s14 + $0x198] sm:$0xff] }
 0x1fe   : > { %1762 = vst.msk [vmem:[#allocation5 + $0x8] sm:$0x3f] %vm1761_vm9, %v1758_v58  ;;  %v1757_v61 = vadd.f32 %v1749_v60, %v1663_v59  ;;  %v2367_v58 = vld [vmem:[%s4480_s14 + $0x180] sm:$0xff]  ;;  %v2369_v59 = vld [vmem:[%s4480_s14 + $0x190] sm:$0xff]  ;;  %v2364_v60 = vld [vmem:[%s4480_s14 + $0x168] sm:$0xff] }
 0x200   : > { %1760 = vst.msk [vmem:[#allocation5] sm:$0xff] %vm1759_vm6, %v1757_v61  ;;  %v2366_v61 = vld [vmem:[%s4480_s14 + $0x178] sm:$0xff] }
 0x207   : > { %v1763_v43 = vld [vmem:[#allocation5] ss:$2 sm:$0x1f]  ;;  %v1765_v44 = vld [vmem:[#allocation5 + $0x1] ss:$2 sm:$0x1f] }
 0x208   : > { %v1766_v62 = vmax.f32 %v1763_v43, %v1765_v44  ;;  %v1768_v63 = vld [vmem:[#allocation5 + $0x2] ss:$2 sm:$0x1f]  ;;  %v1771_v1 = vld [vmem:[#allocation5 + $0x3] ss:$2 sm:$0x1f] }
 0x209   : > { %v1774_v4 = vld [vmem:[#allocation5 + $0x4] ss:$2 sm:$0x1f]  ;;  %v2365_v44 = vld [vmem:[%s4480_s14 + $0x170] sm:$0xff] }
 0x20a   : > { %v1769_v0 = vmax.f32 %v1766_v62, %v1768_v63  ;;  %v2363_v43 = vld [vmem:[%s4480_s14 + $0x160] sm:$0xff]  ;;  %v2360_v62 = vld [vmem:[%s4480_s14 + $0x148] sm:$0xff]  ;;  %v2362_v63 = vld [vmem:[%s4480_s14 + $0x158] sm:$0xff] }
 0x20c   : > { %v1772_v3 = vmax.f32 %v1769_v0, %v1771_v1  ;;  %v2359_v0 = vld [vmem:[%s4480_s14 + $0x140] sm:$0xff]  ;;  %v2361_v1 = vld [vmem:[%s4480_s14 + $0x150] sm:$0xff] }
 0x20e   : > { %v3887_v5 = vmax.f32 %v1772_v3, %v1774_v4  ;;  %v2356_v3 = vld [vmem:[%s4480_s14 + $0x128] sm:$0xff]  ;;  %v2358_v4 = vld [vmem:[%s4480_s14 + $0x138] sm:$0xff] }
 0x210   : > { %1780 = vst.msk [vmem:[#allocation6 + $0x2] sm:$0x1f] %vm1779_vm10, %v3887_v5 }
 0x217   : > { %v1790_v8 = vld [vmem:[#allocation6 + $0x1] sm:$0x1f] }
 0x218   : > { %v1781_v9 = vld [vmem:[#allocation6] sm:$0x1f]  ;;  %3262 = vmatmul.mubr.msk.f32.vlgmr.msra.gmra.mxu1 %vm1759_vm6, %v1790_v8  ;;  %v2354_v8 = vld [vmem:[%s4480_s14 + $0x118] sm:$0xff] }
 0x219   : > { %3281 = vmatmul.mubr.msk.f32.vlgmr.msra.gmra.mxu0 %vm1759_vm6, %v1781_v9  ;;  %3284 = vmatpush3.msra.mxu1 %v2911_v6  ;;  %v1946_v25 = vld [vmem:[#allocation6 + $0x2] sm:$0x1f]  ;;  %v2351_v9 = vld [vmem:[%s4480_s14 + $0x100] sm:$0xff] }
 0x21a   : > { %3303 = vmatpush3.msra.mxu0 %v2920_v7  ;;  %3285 = vmatprep.subr.mxu1 %v3466_v2  ;;  %v2030_v26 = vld [vmem:[#allocation6 + $0x3] sm:$0x1f]  ;;  %v2352_v7 = vld [vmem:[%s4480_s14 + $0x108] sm:$0xff] }
 0x21b   : > { %3304 = vmatprep.subr.mxu0 %v3466_v2  ;;  %3286 = vmatpush3.msra.mxu1 %v2910_v10  ;;  %v2114_v42 = vld [vmem:[#allocation6 + $0x4] sm:$0x1f] }
 0x21c   : > { %3305 = vmatpush3.msra.mxu0 %v2919_v11  ;;  %3287 = vmatprep.subr.mxu1 %v3466_v2  ;;  %v2357_v6 = vld [vmem:[%s4480_s14 + $0x130] sm:$0xff]  ;;  %v2348_v11 = vld [vmem:[%s4480_s14 + $0xe8] sm:$0xff] }
 0x21d   : > { %3306 = vmatprep.subr.mxu0 %v3466_v2  ;;  %3288 = vmatpush3.msra.mxu1 %v2909_v12  ;;  %v2353_v10 = vld [vmem:[%s4480_s14 + $0x110] sm:$0xff]  ;;  %v2350_v12 = vld [vmem:[%s4480_s14 + $0xf8] sm:$0xff] }
 0x21e   : > { %3307 = vmatpush3.msra.mxu0 %v2918_v13  ;;  %3289 = vmatprep.subr.mxu1 %v3466_v2  ;;  %v2347_v13 = vld [vmem:[%s4480_s14 + $0xe0] sm:$0xff] }
 0x21f   : > { %3308 = vmatprep.subr.mxu0 %v3466_v2  ;;  %3290 = vmatpush3.msra.mxu1 %v2908_v14  ;;  %v2349_v14 = vld [vmem:[%s4480_s14 + $0xf0] sm:$0xff] }
 0x220   : > { %3309 = vmatpush3.msra.mxu0 %v2917_v15  ;;  %3291 = vmatprep.subr.mxu1 %v3466_v2  ;;  %v2344_v15 = vld [vmem:[%s4480_s14 + $0xc8] sm:$0xff] }
 0x221   : > { %3310 = vmatprep.subr.mxu0 %v3466_v2  ;;  %3292 = vmatpush3.msra.mxu1 %v2907_v16  ;;  %v2346_v16 = vld [vmem:[%s4480_s14 + $0xd8] sm:$0xff] }
 0x222   : > { %3311 = vmatpush3.msra.mxu0 %v2916_v17  ;;  %3293 = vmatprep.subr.mxu1 %v3466_v2  ;;  %v2343_v17 = vld [vmem:[%s4480_s14 + $0xc0] sm:$0xff] }
 0x223   : > { %3312 = vmatprep.subr.mxu0 %v3466_v2  ;;  %3294 = vmatpush3.msra.mxu1 %v2906_v18  ;;  %v2345_v18 = vld [vmem:[%s4480_s14 + $0xd0] sm:$0xff] }
 0x224   : > { %3313 = vmatpush3.msra.mxu0 %v2915_v19  ;;  %3295 = vmatprep.subr.mxu1 %v3466_v2  ;;  %v2340_v19 = vld [vmem:[%s4480_s14 + $0xa8] sm:$0xff] }
 0x225   : > { %3314 = vmatprep.subr.mxu0 %v3466_v2  ;;  %3296 = vmatpush3.msra.mxu1 %v2905_v20  ;;  %v2342_v20 = vld [vmem:[%s4480_s14 + $0xb8] sm:$0xff] }
 0x226   : > { %3315 = vmatpush3.msra.mxu0 %v2914_v21  ;;  %3297 = vmatprep.subr.mxu1 %v3466_v2  ;;  %v2339_v21 = vld [vmem:[%s4480_s14 + $0xa0] sm:$0xff] }
 0x227   : > { %3316 = vmatprep.subr.mxu0 %v3466_v2  ;;  %3298 = vmatpush3.msra.mxu1 %v2904_v22  ;;  %v2341_v22 = vld [vmem:[%s4480_s14 + $0xb0] sm:$0xff] }
 0x228   : > { %3299 = vmatprep.mubr.msk.f32.mxu1 %vm3467_vm8, %v3466_v2  ;;  %3317 = vmatpush3.msra.mxu0 %v2913_v23  ;;  %v2336_v23 = vld [vmem:[%s4480_s14 + $0x88] sm:$0xff] }
 0x229   : > { %3318 = vmatprep.mubr.msk.f32.mxu0 %vm3467_vm8, %v3466_v2  ;;  %3300 = vmatmul.mubr.msk.f32.vlgmr.msra.gmra.mxu1 %vm1759_vm6, %v1946_v25  ;;  %v2335_v25 = vld [vmem:[%s4480_s14 + $0x80] sm:$0xff] }
 0x22a   : > { %3319 = vmatmul.mubr.msk.f32.vlgmr.msra.gmra.mxu0 %vm1759_vm6, %v2030_v26  ;;  %3321 = vmatprep.subr.mxu1 %v3466_v2  ;;  %v2337_v26 = vld [vmem:[%s4480_s14 + $0x90] sm:$0xff] }
 0x22b   : > { %3340 = vmatprep.subr.mxu0 %v3466_v2  ;;  %3322 = vmatpush3.msra.mxu1 %v2929_v24  ;;  %v2338_v24 = vld [vmem:[%s4480_s14 + $0x98] sm:$0xff] }
 0x22c   : > { %3341 = vmatpush3.msra.mxu0 %v2222_v27  ;;  %3323 = vmatprep.subr.mxu1 %v3466_v2  ;;  %v2332_v27 = vld [vmem:[%s4480_s14 + $0x68] sm:$0xff] }
 0x22d   : > { %3342 = vmatprep.subr.mxu0 %v3466_v2  ;;  %3324 = vmatpush3.msra.mxu1 %v2928_v28  ;;  %v2334_v28 = vld [vmem:[%s4480_s14 + $0x78] sm:$0xff] }
 0x22e   : > { %3343 = vmatpush3.msra.mxu0 %v2221_v29  ;;  %3325 = vmatprep.subr.mxu1 %v3466_v2  ;;  %v2331_v29 = vld [vmem:[%s4480_s14 + $0x60] sm:$0xff] }
 0x22f   : > { %3344 = vmatprep.subr.mxu0 %v3466_v2  ;;  %3326 = vmatpush3.msra.mxu1 %v2927_v30  ;;  %v2333_v30 = vld [vmem:[%s4480_s14 + $0x70] sm:$0xff] }
 0x230   : > { %3345 = vmatpush3.msra.mxu0 %v2220_v31  ;;  %3327 = vmatprep.subr.mxu1 %v3466_v2  ;;  %v2328_v31 = vld [vmem:[%s4480_s14 + $0x48] sm:$0xff] }
 0x231   : > { %3346 = vmatprep.subr.mxu0 %v3466_v2  ;;  %3328 = vmatpush3.msra.mxu1 %v2926_v32  ;;  %v2330_v32 = vld [vmem:[%s4480_s14 + $0x58] sm:$0xff] }
 0x232   : > { %3347 = vmatpush3.msra.mxu0 %v2219_v33  ;;  %3329 = vmatprep.subr.mxu1 %v3466_v2  ;;  %v2327_v33 = vld [vmem:[%s4480_s14 + $0x40] sm:$0xff] }
 0x233   : > { %3348 = vmatprep.subr.mxu0 %v3466_v2  ;;  %3330 = vmatpush3.msra.mxu1 %v2925_v34  ;;  %v2329_v34 = vld [vmem:[%s4480_s14 + $0x50] sm:$0xff] }
 0x234   : > { %3349 = vmatpush3.msra.mxu0 %v2218_v35  ;;  %3331 = vmatprep.subr.mxu1 %v3466_v2  ;;  %v2324_v35 = vld [vmem:[%s4480_s14 + $0x28] sm:$0xff] }
 0x235   : > { %3350 = vmatprep.subr.mxu0 %v3466_v2  ;;  %3332 = vmatpush3.msra.mxu1 %v2924_v36  ;;  %v2326_v36 = vld [vmem:[%s4480_s14 + $0x38] sm:$0xff] }
 0x236   : > { %3351 = vmatpush3.msra.mxu0 %v2217_v37  ;;  %3333 = vmatprep.subr.mxu1 %v3466_v2  ;;  %v2323_v37 = vld [vmem:[%s4480_s14 + $0x20] sm:$0xff] }
 0x237   : > { %3352 = vmatprep.subr.mxu0 %v3466_v2  ;;  %3334 = vmatpush3.msra.mxu1 %v2923_v38  ;;  %v2325_v38 = vld [vmem:[%s4480_s14 + $0x30] sm:$0xff] }
 0x238   : > { %3353 = vmatpush3.msra.mxu0 %v2216_v39  ;;  %3335 = vmatprep.subr.mxu1 %v3466_v2  ;;  %v2320_v39 = vld [vmem:[%s4480_s14 + $0x8] sm:$0xff] }
 0x239   : > { %3354 = vmatprep.subr.mxu0 %v3466_v2  ;;  %3336 = vmatpush3.msra.mxu1 %v2922_v40  ;;  %v2322_v40 = vld [vmem:[%s4480_s14 + $0x18] sm:$0xff] }
 0x23a   : > { %3337 = vmatprep.mubr.msk.f32.mxu1 %vm3467_vm8, %v3466_v2  ;;  %3355 = vmatpush3.msra.mxu0 %v2215_v41  ;;  %v2319_v41 = vld [vmem:[%s4480_s14] sm:$0xff] }
 0x23b   : > { %3356 = vmatprep.mubr.msk.f32.mxu0 %vm3467_vm8, %v3466_v2  ;;  %3338 = vmatmul.mubr.msk.f32.vlgmr.msra.gmra.mxu1 %vm1759_vm6, %v2114_v42  ;;  %v2321_v42 = vld [vmem:[%s4480_s14 + $0x10] sm:$0xff] }
 0x23c   : > { %3357 = vmatmul.mubr.msk.f32.vlgmr.msra.gmra.mxu0 %vm1759_vm6, %v3887_v5  ;;  %2469 = vmatprep.mubr.f32.mxu1 %v3466_v2  ;;  %v2355_v5 = vld [vmem:[%s4480_s14 + $0x120] sm:$0xff] }
 0x23d   : > { %2540 = vmatprep.mubr.f32.mxu0 %v3466_v2  ;;  %2405 = vmatprep.subr.mxu1 %v2380_v45  ;;  %v2376_v2 = vld [vmem:[%s4480_s14 + $0x1c8] sm:$0xff]  ;;  %v2578_v45 = vld [vmem:[%s4482_s16 + $0xf8] sm:$0xff] }
 0x23e   : > { %2476 = vmatprep.subr.mxu0 %v2382_v46  ;;  %2406 = vmatpush1.msra.mxu1 %v2379_v47  ;;  %v2610_v46 = vld [vmem:[%s4482_s16 + $0x1f8] sm:$0xff] }
 0x23f   : > { %2477 = vmatpush1.msra.mxu0 %v2381_v48  ;;  %2407 = vmatprep.subr.mxu1 %v2376_v2 }
 0x240   : > { %2478 = vmatprep.subr.mxu0 %v2378_v49  ;;  %2408 = vmatpush1.msra.mxu1 %v2375_v50 }
 0x241   : > { %2479 = vmatpush1.msra.mxu0 %v2377_v51  ;;  %2409 = vmatprep.subr.mxu1 %v2372_v52 }
 0x242   : > { %2480 = vmatprep.subr.mxu0 %v2374_v53  ;;  %2410 = vmatpush1.msra.mxu1 %v2371_v54 }
 0x243   : > { %2481 = vmatpush1.msra.mxu0 %v2373_v55  ;;  %2411 = vmatprep.subr.mxu1 %v2368_v56 }
 0x244   : > { %2482 = vmatprep.subr.mxu0 %v2370_v57  ;;  %2412 = vmatpush1.msra.mxu1 %v2367_v58  ;;  %v2931_v58 = vld [vmem:[%s4476_s10] ss:$0 sm:$0xff] }
 0x245   : > { %2483 = vmatpush1.msra.mxu0 %v2369_v59  ;;  %2413 = vmatprep.subr.mxu1 %v2364_v60 }
 0x246   : > { %2484 = vmatprep.subr.mxu0 %v2366_v61  ;;  %2414 = vmatpush1.msra.mxu1 %v2363_v43  ;;  %v2932_v61 = vld [vmem:[%s4477_s11] ss:$0 sm:$0xff] }
 0x247   : > { %2485 = vmatpush1.msra.mxu0 %v2365_v44  ;;  %2415 = vmatprep.subr.mxu1 %v2360_v62 }
 0x248   : > { %2486 = vmatprep.subr.mxu0 %v2362_v63  ;;  %2416 = vmatpush1.msra.mxu1 %v2359_v0  ;;  %v2933_v63 = vld [vmem:[%s4479_s13] ss:$0 sm:$0xff] }
 0x249   : > { %2487 = vmatpush1.msra.mxu0 %v2361_v1  ;;  %2417 = vmatprep.subr.mxu1 %v2356_v3 }
 0x24a   : > { %2488 = vmatprep.subr.mxu0 %v2358_v4  ;;  %2418 = vmatpush1.msra.mxu1 %v2355_v5 }
 0x24b   : > { %2489 = vmatpush1.msra.mxu0 %v2357_v6  ;;  %2419 = vmatprep.subr.mxu1 %v2352_v7 }
 0x24c   : > { %2490 = vmatprep.subr.mxu0 %v2354_v8  ;;  %2420 = vmatpush1.msra.mxu1 %v2351_v9 }
 0x24d   : > { %2491 = vmatpush1.msra.mxu0 %v2353_v10  ;;  %2421 = vmatprep.subr.mxu1 %v2348_v11 }
 0x24e   : > { %2492 = vmatprep.subr.mxu0 %v2350_v12  ;;  %2422 = vmatpush1.msra.mxu1 %v2347_v13 }
 0x24f   : > { %2493 = vmatpush1.msra.mxu0 %v2349_v14  ;;  %2423 = vmatprep.subr.mxu1 %v2344_v15  ;;  %v2562_v14 = vld [vmem:[%s4482_s16 + $0x78] sm:$0xff] }
 0x250   : > { %2494 = vmatprep.subr.mxu0 %v2346_v16  ;;  %2424 = vmatpush1.msra.mxu1 %v2343_v17  ;;  %v2594_v15 = vld [vmem:[%s4482_s16 + $0x178] sm:$0xff]  ;;  %v2577_v16 = vld [vmem:[%s4482_s16 + $0xf0] sm:$0xff] }
 0x251   : > { %2495 = vmatpush1.msra.mxu0 %v2345_v18  ;;  %2425 = vmatprep.subr.mxu1 %v2340_v19  ;;  %v2609_v17 = vld [vmem:[%s4482_s16 + $0x1f0] sm:$0xff] }
 0x252   : > { %2496 = vmatprep.subr.mxu0 %v2342_v20  ;;  %2426 = vmatpush1.msra.mxu1 %v2339_v21  ;;  %v2561_v18 = vld [vmem:[%s4482_s16 + $0x70] sm:$0xff]  ;;  %v2576_v20 = vld [vmem:[%s4482_s16 + $0xe8] sm:$0xff] }
 0x253   : > { %2497 = vmatpush1.msra.mxu0 %v2341_v22  ;;  %2427 = vmatprep.subr.mxu1 %v2336_v23  ;;  %v2593_v19 = vld [vmem:[%s4482_s16 + $0x170] sm:$0xff]  ;;  %v2608_v21 = vld [vmem:[%s4482_s16 + $0x1e8] sm:$0xff] }
 0x254   : > { %2498 = vmatprep.subr.mxu0 %v2338_v24  ;;  %2428 = vmatpush1.msra.mxu1 %v2335_v25  ;;  %v2560_v22 = vld [vmem:[%s4482_s16 + $0x68] sm:$0xff]  ;;  %v2575_v24 = vld [vmem:[%s4482_s16 + $0xe0] sm:$0xff] }
 0x255   : > { %2499 = vmatpush1.msra.mxu0 %v2337_v26  ;;  %2429 = vmatprep.subr.mxu1 %v2332_v27  ;;  %v2592_v23 = vld [vmem:[%s4482_s16 + $0x168] sm:$0xff]  ;;  %v2607_v25 = vld [vmem:[%s4482_s16 + $0x1e0] sm:$0xff] }
 0x256   : > { %2500 = vmatprep.subr.mxu0 %v2334_v28  ;;  %2430 = vmatpush1.msra.mxu1 %v2331_v29  ;;  %v2559_v26 = vld [vmem:[%s4482_s16 + $0x60] sm:$0xff]  ;;  %v2574_v28 = vld [vmem:[%s4482_s16 + $0xd8] sm:$0xff] }
 0x257   : > { %2501 = vmatpush1.msra.mxu0 %v2333_v30  ;;  %2431 = vmatprep.subr.mxu1 %v2328_v31  ;;  %v2591_v27 = vld [vmem:[%s4482_s16 + $0x160] sm:$0xff]  ;;  %v2606_v29 = vld [vmem:[%s4482_s16 + $0x1d8] sm:$0xff] }
 0x258   : > { %2502 = vmatprep.subr.mxu0 %v2330_v32  ;;  %2432 = vmatpush1.msra.mxu1 %v2327_v33  ;;  %v2558_v30 = vld [vmem:[%s4482_s16 + $0x58] sm:$0xff]  ;;  %v2573_v32 = vld [vmem:[%s4482_s16 + $0xd0] sm:$0xff] }
 0x259   : > { %2503 = vmatpush1.msra.mxu0 %v2329_v34  ;;  %2433 = vmatprep.subr.mxu1 %v2324_v35  ;;  %v2590_v31 = vld [vmem:[%s4482_s16 + $0x158] sm:$0xff]  ;;  %v2605_v33 = vld [vmem:[%s4482_s16 + $0x1d0] sm:$0xff] }
 0x25a   : > { %2504 = vmatprep.subr.mxu0 %v2326_v36  ;;  %2434 = vmatpush1.msra.mxu1 %v2323_v37  ;;  %v2557_v34 = vld [vmem:[%s4482_s16 + $0x50] sm:$0xff]  ;;  %v2572_v36 = vld [vmem:[%s4482_s16 + $0xc8] sm:$0xff] }
 0x25b   : > { %2505 = vmatpush1.msra.mxu0 %v2325_v38  ;;  %2435 = vmatprep.subr.mxu1 %v2320_v39  ;;  %v2589_v35 = vld [vmem:[%s4482_s16 + $0x150] sm:$0xff]  ;;  %v2604_v37 = vld [vmem:[%s4482_s16 + $0x1c8] sm:$0xff] }
 0x25c   : > { %2506 = vmatprep.subr.mxu0 %v2322_v40  ;;  %2436 = vmatpush1.msra.mxu1 %v2319_v41  ;;  %v2556_v38 = vld [vmem:[%s4482_s16 + $0x48] sm:$0xff]  ;;  %v2571_v40 = vld [vmem:[%s4482_s16 + $0xc0] sm:$0xff] }
 0x25d   : > { %2507 = vmatpush1.msra.mxu0 %v2321_v42  ;;  %3059 = vmatprep.subr.mxu1 %v2578_v45  ;;  %v2588_v39 = vld [vmem:[%s4482_s16 + $0x148] sm:$0xff]  ;;  %v2603_v41 = vld [vmem:[%s4482_s16 + $0x1c0] sm:$0xff] }
 0x25e   : > { %3094 = vmatprep.subr.mxu0 %v2610_v46  ;;  %v2555_v42 = vld [vmem:[%s4482_s16 + $0x40] sm:$0xff]  ;;  %v2570_v46 = vld [vmem:[%s4482_s16 + $0xb8] sm:$0xff] }
 0x25f   : > { %v2587_v45 = vld [vmem:[%s4482_s16 + $0x140] sm:$0xff] }
 0x2d8   : > { %v1869_v47 = vpop.f32.mrf.mxu1 }
 0x2d9   : > { %v1942_v48 = vpop.f32.mrf.mxu0 }
 0x2da   : > { %v3263_v2 = vpop.f32.mrf.mxu1  ;;  %v1943_v54 = vadd.f32 %v1942_v48, %v1869_v47  ;;  %v2602_v47 = vld [vmem:[%s4482_s16 + $0x1b8] sm:$0xff] }
 0x2db   : > { %v3282_v49 = vpop.f32.mrf.mxu0  ;;  %v2554_v48 = vld [vmem:[%s4482_s16 + $0x38] sm:$0xff] }
 0x2dc   : > { %v2586_v2 = vld [vmem:[%s4482_s16 + $0x138] sm:$0xff]  ;;  %v2569_v49 = vld [vmem:[%s4482_s16 + $0xb0] sm:$0xff] }
 0x2e9   : > { %v2025_v50 = vpop.f32.mrf.mxu1 }
 0x2ea   : > { %v2109_v51 = vpop.f32.mrf.mxu0  ;;  %v2029_v55 = vadd.f32 %v2025_v50, %v1943_v54  ;;  %v2601_v50 = vld [vmem:[%s4482_s16 + $0x1b0] sm:$0xff]  ;;  %v2600_v54 = vld [vmem:[%s4482_s16 + $0x1a8] sm:$0xff] }
 0x2eb   : > { %v3301_v52 = vpop.f32.mrf.mxu1 }
 0x2ec   : > { %v3320_v53 = vpop.f32.mrf.mxu0  ;;  %v2113_v56 = vadd.f32 %v2109_v51, %v2029_v55  ;;  %v2553_v51 = vld [vmem:[%s4482_s16 + $0x30] sm:$0xff]  ;;  %v2552_v55 = vld [vmem:[%s4482_s16 + $0x28] sm:$0xff] }
 0x2ed   : > { %v2585_v52 = vld [vmem:[%s4482_s16 + $0x130] sm:$0xff]  ;;  %v2568_v53 = vld [vmem:[%s4482_s16 + $0xa8] sm:$0xff] }
 0x2fb   : > { %v2193_v57 = vpop.f32.mrf.mxu1 }
 0x2fc   : > { %v2299_v59 = vpop.f32.mrf.mxu0  ;;  %v2197_v60 = vadd.f32 %v2193_v57, %v2113_v56  ;;  %v2584_v56 = vld [vmem:[%s4482_s16 + $0x128] sm:$0xff]  ;;  %v2567_v57 = vld [vmem:[%s4482_s16 + $0xa0] sm:$0xff] }
 0x2fd   : > { %v3339_v43 = vpop.f32.mrf.mxu1  ;;  %v2300_v3 = vadd.f32 %v2933_v63, %v2299_v59  ;;  %v2551_v59 = vld [vmem:[%s4482_s16 + $0x20] sm:$0xff]  ;;  %v2565_v63 = vld [vmem:[%s4482_s16 + $0x90] sm:$0xff] }
 0x2fe   : > { %v3358_v44 = vpop.f32.mrf.mxu0  ;;  %v2205_v62 = vmul.f32 %v2931_v58, %v2197_v60  ;;  %v2599_v58 = vld [vmem:[%s4482_s16 + $0x1a0] sm:$0xff]  ;;  %v2598_v43 = vld [vmem:[%s4482_s16 + $0x198] sm:$0xff] }
 0x2ff   : > { %v2583_v60 = vld [vmem:[%s4482_s16 + $0x120] sm:$0xff]  ;;  %v2550_v44 = vld [vmem:[%s4482_s16 + $0x18] sm:$0xff] }
 0x300   : > { %v2213_v0 = vadd.f32 %v2932_v61, %v2205_v62  ;;  %v2566_v61 = vld [vmem:[%s4482_s16 + $0x98] sm:$0xff] }
 0x301   : > { %v2582_v62 = vld [vmem:[%s4482_s16 + $0x118] sm:$0xff] }
 0x302   : > { %v2214_v1 = vmax.f32 %v2213_v0, 0.0  ;;  %v2597_v0 = vld [vmem:[%s4482_s16 + $0x190] sm:$0xff] }
 0x304   : > { %v2303_v4 = vadd.f32 %v2300_v3, %v2214_v1  ;;  %v2549_v1 = vld [vmem:[%s4482_s16 + $0x10] sm:$0xff] }
 0x305   : > { %v2581_v3 = vld [vmem:[%s4482_s16 + $0x110] sm:$0xff] }
 0x306   : > { %2304 = vst [vmem:[#allocation7] sm:$0x1f] %v2303_v4  ;;  %v2564_v4 = vld [vmem:[%s4482_s16 + $0x88] sm:$0xff] }
 0x30d   : > { %v2305_v5 = vld [vmem:[#allocation7] ss:$2 sm:$0x1]  ;;  %v2307_v6 = vld [vmem:[#allocation7 + $0x1] ss:$2 sm:$0x1] }
 0x30e   : > { %v2308_v7 = vmax.f32 %v2305_v5, %v2307_v6  ;;  %v2310_v8 = vld [vmem:[#allocation7 + $0x2] ss:$2 sm:$0x1]  ;;  %v2313_v10 = vld [vmem:[#allocation7 + $0x3] ss:$2 sm:$0x1] }
 0x30f   : > { %v2316_v12 = vld [vmem:[#allocation7 + $0x4] ss:$2 sm:$0x1]  ;;  %v2596_v5 = vld [vmem:[%s4482_s16 + $0x188] sm:$0xff] }
 0x310   : > { %v2311_v9 = vmax.f32 %v2308_v7, %v2310_v8  ;;  %v2548_v6 = vld [vmem:[%s4482_s16 + $0x8] sm:$0xff]  ;;  %v2563_v8 = vld [vmem:[%s4482_s16 + $0x80] sm:$0xff] }
 0x311   : > { %v2580_v7 = vld [vmem:[%s4482_s16 + $0x108] sm:$0xff] }
 0x312   : > { %v2314_v11 = vmax.f32 %v2311_v9, %v2313_v10  ;;  %v2595_v9 = vld [vmem:[%s4482_s16 + $0x180] sm:$0xff] }
 0x313   : > { %v2547_v10 = vld [vmem:[%s4482_s16] sm:$0xff] }
 0x314   : > { %v2317_v13 = vmax.f32 %v2314_v11, %v2316_v12  ;;  %v2579_v11 = vld [vmem:[%s4482_s16 + $0x100] sm:$0xff]  ;;  %v2385_v12 = vlaneseq }
 0x316   : > { %2470 = vmatmul.mubr.f32.vlgmr.msra.gmra.mxu1 %v2317_v13  ;;  %2541 = vmatmul.mubr.f32.vlgmr.msra.gmra.mxu0 %v2317_v13  ;;  %v2386_v13 = vshrl.u32 %v2385_v12, 7 }
 0x317   : > { %3060 = vmatpush3.msra.mxu1 %v2562_v14  ;;  %3095 = vmatpush3.msra.mxu0 %v2594_v15 }
 0x318   : > { %3061 = vmatprep.subr.mxu1 %v2577_v16  ;;  %3096 = vmatprep.subr.mxu0 %v2609_v17  ;;  %v2391_v14 = vsub.s32 1, %v2386_v13  ;;  %v2399_v15 = vsub.s32 3, %v2386_v13  ;;  %v2387_v16 = vsub.s32 0, %v2386_v13  ;;  %v2395_v17 = vsub.s32 2, %v2386_v13 }
 0x319   : > { %3062 = vmatpush3.msra.mxu1 %v2561_v18  ;;  %3097 = vmatpush3.msra.mxu0 %v2593_v19  ;;  %v2383_v18 = vld [vmem:[%s4481_s15] sm:$0xf] }
 0x31a   : > { %3063 = vmatprep.subr.mxu1 %v2576_v20  ;;  %3098 = vmatprep.subr.mxu0 %v2608_v21  ;;  %v2392_v19 = vrot.slane %v2383_v18, %v2391_v14  ;;  %v2400_v20 = vrot.slane %v2383_v18, %v2399_v15  ;;  %v2388_v21 = vrot.slane %v2383_v18, %v2387_v16 }
 0x31b   : > { %3064 = vmatpush3.msra.mxu1 %v2560_v22  ;;  %3099 = vmatpush3.msra.mxu0 %v2592_v23  ;;  %v2396_v23 = vrot.slane %v2383_v18, %v2395_v17 }
 0x31c   : > { %3065 = vmatprep.subr.mxu1 %v2575_v24  ;;  %3100 = vmatprep.subr.mxu0 %v2607_v25 }
 0x31d   : > { %3066 = vmatpush3.msra.mxu1 %v2559_v26  ;;  %3101 = vmatpush3.msra.mxu0 %v2591_v27 }
 0x31e   : > { %3067 = vmatprep.subr.mxu1 %v2574_v28  ;;  %3102 = vmatprep.subr.mxu0 %v2606_v29 }
 0x31f   : > { %3068 = vmatpush3.msra.mxu1 %v2558_v30  ;;  %3103 = vmatpush3.msra.mxu0 %v2590_v31 }
 0x320   : > { %3069 = vmatprep.subr.mxu1 %v2573_v32  ;;  %3104 = vmatprep.subr.mxu0 %v2605_v33  ;;  %v2611_v33 = vld [vmem:[%s4483_s17] sm:$0x1] }
 0x321   : > { %3070 = vmatpush3.msra.mxu1 %v2557_v34  ;;  %3105 = vmatpush3.msra.mxu0 %v2589_v35 }
 0x322   : > { %3071 = vmatprep.subr.mxu1 %v2572_v36  ;;  %3106 = vmatprep.subr.mxu0 %v2604_v37 }
 0x323   : > { %3072 = vmatpush3.msra.mxu1 %v2556_v38  ;;  %3107 = vmatpush3.msra.mxu0 %v2588_v39 }
 0x324   : > { %3073 = vmatprep.subr.mxu1 %v2571_v40  ;;  %3108 = vmatprep.subr.mxu0 %v2603_v41 }
 0x325   : > { %3074 = vmatpush3.msra.mxu1 %v2555_v42  ;;  %3109 = vmatpush3.msra.mxu0 %v2587_v45 }
 0x326   : > { %3075 = vmatprep.subr.mxu1 %v2570_v46  ;;  %3110 = vmatprep.subr.mxu0 %v2602_v47 }
 0x327   : > { %3076 = vmatpush3.msra.mxu1 %v2554_v48  ;;  %3111 = vmatpush3.msra.mxu0 %v2586_v2 }
 0x328   : > { %3077 = vmatprep.subr.mxu1 %v2569_v49  ;;  %3112 = vmatprep.subr.mxu0 %v2601_v50 }
 0x329   : > { %3078 = vmatpush3.msra.mxu1 %v2553_v51  ;;  %3113 = vmatpush3.msra.mxu0 %v2585_v52 }
 0x32a   : > { %3079 = vmatprep.subr.mxu1 %v2568_v53  ;;  %3114 = vmatprep.subr.mxu0 %v2600_v54 }
 0x32b   : > { %3080 = vmatpush3.msra.mxu1 %v2552_v55  ;;  %3115 = vmatpush3.msra.mxu0 %v2584_v56 }
 0x32c   : > { %3081 = vmatprep.subr.mxu1 %v2567_v57  ;;  %3116 = vmatprep.subr.mxu0 %v2599_v58 }
 0x32d   : > { %3082 = vmatpush3.msra.mxu1 %v2551_v59  ;;  %3117 = vmatpush3.msra.mxu0 %v2583_v60 }
 0x32e   : > { %3083 = vmatprep.subr.mxu1 %v2566_v61  ;;  %3118 = vmatprep.subr.mxu0 %v2598_v43 }
 0x32f   : > { %3084 = vmatpush3.msra.mxu1 %v2550_v44  ;;  %3119 = vmatpush3.msra.mxu0 %v2582_v62 }
 0x330   : > { %3085 = vmatprep.subr.mxu1 %v2565_v63  ;;  %3120 = vmatprep.subr.mxu0 %v2597_v0 }
 0x331   : > { %3086 = vmatpush3.msra.mxu1 %v2549_v1  ;;  %3121 = vmatpush3.msra.mxu0 %v2581_v3 }
 0x332   : > { %3087 = vmatprep.subr.mxu1 %v2564_v4  ;;  %3122 = vmatprep.subr.mxu0 %v2596_v5 }
 0x333   : > { %3088 = vmatpush3.msra.mxu1 %v2548_v6  ;;  %3123 = vmatpush3.msra.mxu0 %v2580_v7 }
 0x334   : > { %3089 = vmatprep.subr.mxu1 %v2563_v8  ;;  %3124 = vmatprep.subr.mxu0 %v2595_v9 }
 0x335   : > { %3090 = vmatpush3.msra.mxu1 %v2547_v10  ;;  %3125 = vmatpush3.msra.mxu0 %v2579_v11 }
 0x3d6   : > { %v2471_v22 = vpop.f32.mrf.mxu1  ;;  %v2542_v24 = vpop.f32.mrf.mxu0 }
 0x3d7   : > { %v2472_v29 = vadd.f32 %v2471_v22, %v2388_v21  ;;  %v2543_v30 = vadd.f32 %v2542_v24, %v2396_v23 }
 0x3d8   : > { %v2473_v25 = vpop.f32.mrf.mxu1  ;;  %v2544_v26 = vpop.f32.mrf.mxu0 }
 0x3d9   : > { %v2474_v27 = vadd.f32 %v2473_v25, %v2392_v19  ;;  %v2545_v28 = vadd.f32 %v2544_v26, %v2400_v20 }
 0x3db   : > { %2676 = vmatprep.mubr.f32.mxu1 %v2474_v27  ;;  %2746 = vmatprep.mubr.f32.mxu0 %v2545_v28 }
 0x3dc   : > { %2677 = vmatmul.mubr.f32.vlgmr.msra.gmra.mxu1 %v2472_v29  ;;  %2747 = vmatmul.mubr.f32.vlgmr.msra.gmra.mxu0 %v2543_v30 }
 0x49c   : > { %v3091_v31 = vpop.f32.mrf.mxu1  ;;  %v3126_v32 = vpop.f32.mrf.mxu0 }
 0x49e   : > { %v3092_v34 = vpop.f32.mrf.mxu1  ;;  %v3127_v35 = vpop.f32.mrf.mxu0 }
 0x49f   : > { %v3093_v36 = vadd.f32 %v3092_v34, %v3091_v31  ;;  %v3128_v38 = vadd.f32 %v3127_v35, %v3126_v32 }
 0x4a1   : > { %v2679_v37 = vadd.f32 %v3093_v36, %v2611_v33 }
 0x4a3   : > { %v2749_v39 = vadd.f32 %v3128_v38, %v2679_v37 }
 0x4a5   : > { %2753 = vst.msk [vmem:[%s567_s21] sm:$0x1] %vm2752_vm11, %v2749_v39 }
 0x4a6   : > { %3417 = shalt.err (!%p3414_p3)
}
 0x4a7   : > { %s3418_s4 = scalar_lea.hbm %s2765_s20, 16  ;;  %s3422_s21 = scalar_lea.hbm %s4484_s18, 32 }
 0x4a8   : > { %p3419_p4 = scmp.ne.s32.totalorder %s2765_s20, %s3418_s4  ;;  %p3423_p9 = scmp.lt.s32.totalorder %s2765_s20, %s4484_s18 }
 0x4a9   : > { %p3424_p10 = scmp.lt.s32.totalorder %s3422_s21, %s3418_s4 }
 0x4aa   : > { %p3420_p7 = pnand %p3419_p4, %p3602_p5 }
 0x4ab   : > { %p3425_p11 = por %p3424_p10, %p3423_p9 }
 0x4ac   : > { %p3421_p8 = pneg %p3420_p7 }
 0x4ae   : > { %p3426_p12 = pnand %p3425_p11, %p3421_p8 }
 0x4b0   : > { %3429 = shalt.err (!%p3426_p12)
}
 0x4b1   : > { %3363 = dma.vmem_to_hbm [thread:$0]  (%p3602_p5), %s2768_s24, 16, %s2765_s20, %s2755_s29  }
 0x4b2 PF: > { %s4508_s3 = sld [smem:[#allocation11_spill]]  ;;  %p3369_p13 = scmp.ge.s32.totalorder %s3464_s30, 2 }
 0x4b4   : > { %p3366_p0 = pnand %p3369_p13, %p3606_p6 }
 0x4b6   : > { %p3367_p1 = pneg %p3366_p0 }
 0x4b8   : > { %s2779_s23 = sand.u32 1, %s4508_s3  }
 0x4b9   : > { %s2780_s0 = scalar_lea.sflag [#allocation9], %s2779_s23 }
 0x4ba   : > { %3447 = dma.done.wait (%p3367_p1), %s2780_s0, 16  }
 0x4bb   : > { %3449 = vsyncadd (%p3367_p1), %s2780_s0, 4294967280  ;;  %s4510_s30 = sld [smem:[#allocation13_spill]]  ;;  %s4513_s27 = smov %s3456_s28 }
 0x4bc   : > { %s4511_s4 = sld [smem:[#allocation12_spill]] }
 0x4bd   : > { %s4512_s29 = sld [smem:[#allocation14_spill]] }
 0x4c1   : > { %p28_p2 = scmp.ge.s32.totalorder %s4510_s30, 4  }
 0x4c2   : > { %s4514_s28 = smov %s4511_s4 }
 0x4c3   :  { %30 = sbr.rel (!%p28_p2) target bundleno = 9 (0x9), region = 156 }
 0x4c8   :  { %2784 = vsyncpa [#allocation9], 1 }
 0x4c9   :  { %2786 = vsyncpa [#allocation9 + $0x1], 1 }

</bundles_post_ra>
